<compile_context>
chip_gen: v7x
topology: tpu7x:2x2x1
jax: 0.10.0
libtpu: 0.0.40
codegen_flags: <defaults>
</compile_context>

<pallas_src>
import enum
import functools

import jax
import jax.numpy as jnp
from jax import lax
from jax.experimental import pallas as pl
from jax.experimental.pallas import tpu as pltpu


# ----------------------------------------------------------------------------
# Config (small synthetic BERT)
# ----------------------------------------------------------------------------
HIDDEN = 32          # bert.config.hidden_size
NUM_HEADS = 4
INTERMEDIATE = 64
NUM_LAYERS = 2       # bert.config.num_hidden_layers -> k_steps of PTCModule
VOCAB = 50
MAX_POS = 16
LN_EPS = 1e-12
NEG_INF = -1e9
VMEM_LIMIT_BYTES = 32 * 1024 * 1024   # safe on v5e/v6e/v7x; future-proofing hook

# Packed CLS-head layout along lanes: [CoLA(2) | SST_2(2) | STS_B(1) | QNLI(1)]
HEAD_SLICES = {'CoLA': (0, 2), 'SST_2': (2, 4), 'STS_B': (4, 5), 'QNLI': (5, 6)}
NUM_HEAD_OUT = 6
NUM_ENC_REFS = 20    # number of shared encoder refs at the front of each kernel


class Task(enum.Enum):
    CoLA = 0
    SST_2 = 1
    STS_B = 2
    MNLIm = 3
    MNLImm = 4
    AX = 5
    RTE = 6
    WNLI = 7
    QQP = 8
    MRPC = 9
    QNLI = 10


# ----------------------------------------------------------------------------
# In-kernel math helpers
# ----------------------------------------------------------------------------
def _erf_approx(x):
    """Abramowitz & Stegun 7.1.26 erf (|err| < 1.5e-7 ~ f32 eps)."""
    a1, a2, a3, a4, a5 = 0.254829592, -0.284496736, 1.421413741, -1.453152027, 1.061405429
    p = 0.3275911
    ax = jnp.abs(x)
    t = 1.0 / (1.0 + p * ax)
    poly = ((((a5 * t + a4) * t + a3) * t + a2) * t + a1) * t
    y = 1.0 - poly * jnp.exp(-ax * ax)
    return jnp.where(x < 0.0, -y, y)


def _gelu_exact(x):
    # HF/PyTorch BERT uses exact erf GELU (not the tanh approximation).
    return 0.5 * x * (1.0 + _erf_approx(x * 0.7071067811865476))


def _layer_norm(x, g, b, eps):
    mu = jnp.mean(x, axis=-1, keepdims=True)
    var = jnp.mean((x - mu) ** 2, axis=-1, keepdims=True)
    return (x - mu) * lax.rsqrt(var + eps) * g + b


def _softmax_last(x):
    # Exact division (not approx reciprocal) for parity with the reference.
    x = x - jnp.max(x, axis=-1, keepdims=True)
    e = jnp.exp(x)
    return e / jnp.sum(e, axis=-1, keepdims=True)


# ----------------------------------------------------------------------------
# Shared fused BERT encoder body (embeddings + LN + all layers), single program
# ----------------------------------------------------------------------------
def _bert_encode(B, S, num_heads, num_layers, eps,
                 ids_ref, tti_ref, am_ref,
                 wemb_ref, pemb_ref, temb_ref, embg_ref, embb_ref,
                 wqkv_ref, bqkv_ref, wo_ref, bo_ref, g1_ref, b1_ref,
                 wi_ref, bi_ref, wo2_ref, bo2_ref, g2_ref, b2_ref):
    V, H = wemb_ref.shape
    BS = B * S
    DH = H // num_heads
    scale = 1.0 / float(DH) ** 0.5

    tti_f = tti_ref[...].astype(jnp.float32)          # (B, S)
    am_f = am_ref[...].astype(jnp.float32)            # (B, S)

    # ---- fused embedding lookup (word gather as one-hot matmul) ------------
    ids3 = ids_ref[...][:, :, None]                                         # (B,S,1)
    viota = lax.broadcasted_iota(jnp.int32, (B, S, V), 2)
    onehot = (viota == ids3).astype(jnp.float32).reshape(BS, V)             # (BS,V)
    word = jnp.dot(onehot, wemb_ref[...], preferred_element_type=jnp.float32)

    pos = pemb_ref[0:S, :][None, :, :]                                      # (1,S,H)
    t0 = temb_ref[0:1, :][None, :, :]                                       # (1,1,H)
    t1 = temb_ref[1:2, :][None, :, :]
    tti3 = tti_f[:, :, None]                                                # (B,S,1)
    emb3 = word.reshape(B, S, H) + pos + (1.0 - tti3) * t0 + tti3 * t1
    x = _layer_norm(emb3.reshape(BS, H), embg_ref[...], embb_ref[...], eps)

    # ---- block-diagonal additive attention mask, built once ----------------
    # mask[i, j] = 0 if token i and token j are in the same batch element and
    # key j is a valid (non-padding) token, else -1e9.
    inv_s = 1.0 / float(S)
    row_g = jnp.floor(
        lax.broadcasted_iota(jnp.int32, (BS, BS), 0).astype(jnp.float32) * inv_s)
    col_g = jnp.floor(
        lax.broadcasted_iota(jnp.int32, (BS, BS), 1).astype(jnp.float32) * inv_s)
    key_ok = jnp.concatenate([am_f[b:b + 1, :] for b in range(B)], axis=1) > 0.5  # (1,BS)
    attn_mask = jnp.where((row_g == col_g) & key_ok, 0.0, NEG_INF)                # (BS,BS)

    # ---- encoder layers, fully unrolled in one program ---------------------
    for l in range(num_layers):
        # Packed QKV projection on the whole folded batch: (BS,H)@(H,3H).
        qkv = jnp.dot(x, wqkv_ref[l], preferred_element_type=jnp.float32) + bqkv_ref[l]
        wol = wo_ref[l]
        attn = jnp.zeros((BS, H), jnp.float32)
        for h in range(num_heads):
            # Static lane slices inside a single 96-lane vreg (cheap selects at
            # H=32); no explicit transposes: dot_general contracts dim 1 / dim 1.
            qh = qkv[:, h * DH:(h + 1) * DH]
            kh = qkv[:, H + h * DH:H + (h + 1) * DH]
            vh = qkv[:, 2 * H + h * DH:2 * H + (h + 1) * DH]
            sc = lax.dot_general(qh, kh, (((1,), (1,)), ((), ())),
                                 preferred_element_type=jnp.float32) * scale + attn_mask
            pr = _softmax_last(sc)
            ctx = jnp.dot(pr, vh, preferred_element_type=jnp.float32)       # (BS, DH)
            attn = attn + jnp.dot(ctx, wol[h * DH:(h + 1) * DH, :],
                                  preferred_element_type=jnp.float32)
        attn = attn + bo_ref[l]
        h1 = _layer_norm(x + attn, g1_ref[l], b1_ref[l], eps)

        f = jnp.dot(h1, wi_ref[l], preferred_element_type=jnp.float32) + bi_ref[l]
        f = _gelu_exact(f)
        f = jnp.dot(f, wo2_ref[l], preferred_element_type=jnp.float32) + bo2_ref[l]
        x = _layer_norm(h1 + f, g2_ref[l], b2_ref[l], eps)

    return x, am_f, tti_f                          # x: (B*S, H) last hidden state


# ----------------------------------------------------------------------------
# Kernel 1: encoder + packed CLS heads (CoLA | SST-2 | STS-B | QNLI)
# ----------------------------------------------------------------------------
def _cls_forward_kernel(B, S, num_heads, num_layers, eps, *refs):
    enc_refs = refs[:NUM_ENC_REFS]
    hw_ref, hb_ref, out_ref = refs[NUM_ENC_REFS:]

    x, _, _ = _bert_encode(B, S, num_heads, num_layers, eps, *enc_refs)
    # CLS rows (token 0 of each batch element), then one (B,H)@(H,6) matmul.
    cls = jnp.concatenate([x[b * S:b * S + 1, :] for b in range(B)], axis=0)  # (B,H)
    out_ref[...] = (jnp.dot(cls, hw_ref[...], preferred_element_type=jnp.float32)
                    + hb_ref[...])


# ----------------------------------------------------------------------------
# Kernel 2: encoder + fused PTC module (preprocessing + k GRU/attention steps)
# ----------------------------------------------------------------------------
def _ptc_forward_kernel(B, S, num_heads, num_layers, k_steps, eps, *refs):
    enc_refs = refs[:NUM_ENC_REFS]
    (w1_ref, b1_ref, w2_ref, b2_ref,
     wig_ref, big_ref, whg_ref, bhg_ref, w3_ref, b3_ref, out_ref) = refs[NUM_ENC_REFS:]

    x2d, am_f, tti_f = _bert_encode(B, S, num_heads, num_layers, eps, *enc_refs)
    H = x2d.shape[1]
    BS = B * S
    hid = x2d.reshape(B, S, H)

    # --- preprocess_PTC_input, fused and exactly bug-compatible with the
    #     reference: longest_premise counts token_type_ids==0 INCLUDING
    #     padding, the hypothesis window is the last `longest_hypothesis`
    #     padded positions (flip/[:L]/flip), and zeroed vectors inside the
    #     windows keep their softmax weight (score = bias), exactly as the
    #     zeroed rows do after the PyTorch slicing. ---------------------------
    prem = hid * (am_f * (1.0 - tti_f))[:, :, None]           # (B,S,H)
    hyp = hid * (am_f * tti_f)[:, :, None]

    lens_p = jnp.sum(1.0 - tti_f, axis=-1, keepdims=True)     # (B,1)
    lens_h = jnp.sum(tti_f, axis=-1, keepdims=True)           # (B,1)
    longest_p = jnp.max(lens_p, axis=0, keepdims=True)        # (1,1)
    longest_h = jnp.max(lens_h, axis=0, keepdims=True)        # (1,1)
    posn = lax.broadcasted_iota(jnp.int32, (1, S), 1).astype(jnp.float32)
    prem_add = jnp.where((posn >= 1.0) & (posn < longest_p), 0.0, NEG_INF)   # (1,S)
    hyp_add = jnp.where(posn >= (float(S) - longest_h), 0.0, NEG_INF)        # (1,S)

    # alfas = softmax(W1(hypotheses)) over the hypothesis window.
    a = jnp.sum(hyp * w1_ref[...], axis=-1) + b1_ref[...] + hyp_add          # (B,S)
    alfas = _softmax_last(a)
    s = jnp.sum(alfas[:, :, None] * hyp, axis=1)                             # (B,H)

    layer_out = (jnp.dot(prem.reshape(BS, H), w2_ref[...],
                         preferred_element_type=jnp.float32)
                 + b2_ref[...]).reshape(B, S, H)

    C = out_ref.shape[1]
    acc = jnp.zeros((B, C), jnp.float32)
    # Eval semantics: stochastic-prediction dropout is a no-op, every one of
    # the k_steps contributes and the sum is divided by k_steps.
    for _ in range(k_steps):
        sc = jnp.sum(s[:, None, :] * layer_out, axis=-1) + prem_add          # (B,S)
        betas = _softmax_last(sc)
        x_in = jnp.sum(betas[:, :, None] * prem, axis=1)                     # (B,H)

        # GRU cell (PyTorch gate order r|z|n), gates packed: two (B,H)@(H,3H).
        gi = jnp.dot(x_in, wig_ref[...], preferred_element_type=jnp.float32) + big_ref[...]
        gh = jnp.dot(s, whg_ref[...], preferred_element_type=jnp.float32) + bhg_ref[...]
        r = jax.nn.sigmoid(gi[:, 0:H] + gh[:, 0:H])
        z = jax.nn.sigmoid(gi[:, H:2 * H] + gh[:, H:2 * H])
        n = jnp.tanh(gi[:, 2 * H:3 * H] + r * gh[:, 2 * H:3 * H])
        s = (1.0 - z) * n + z * s

        feats = jnp.concatenate([s, x_in, jnp.abs(s - x_in), x_in * s], axis=-1)  # (B,4H)
        acc = acc + jnp.dot(feats, w3_ref[...], preferred_element_type=jnp.float32) + b3_ref[...]

    out_ref[...] = acc * (1.0 / k_steps)


# ----------------------------------------------------------------------------
# pallas_call wrappers (single program each, no grid, whole arrays in VMEM)
# ----------------------------------------------------------------------------
def _encoder_inputs(p, input_ids, attention_mask, token_type_ids):
    e = p['enc']
    return (input_ids.astype(jnp.int32),
            token_type_ids.astype(jnp.int32),
            attention_mask.astype(jnp.int32),
            p['word_emb'], p['pos_emb'], p['type_emb'],
            p['emb_ln_g'], p['emb_ln_b'],
            e['wqkv'], e['bqkv'], e['wo'], e['bo'], e['g1'], e['b1'],
            e['wi'], e['bi'], e['wo2'], e['bo2'], e['g2'], e['b2'])


def cls_heads_pallas(p, input_ids, attention_mask, token_type_ids):
    B, S = input_ids.shape
    args = _encoder_inputs(p, input_ids, attention_mask, token_type_ids) + (
        p['heads_w'], p['heads_b'])
    return pl.pallas_call(
        functools.partial(_cls_forward_kernel, B, S, NUM_HEADS, NUM_LAYERS, LN_EPS),
        out_shape=jax.ShapeDtypeStruct((B, NUM_HEAD_OUT), jnp.float32),
        compiler_params=pltpu.CompilerParams(vmem_limit_bytes=VMEM_LIMIT_BYTES),
    )(*args)


def ptc_pallas(p, ptc_p, input_ids, attention_mask, token_type_ids, k_steps):
    B, S = input_ids.shape
    C = ptc_p['w3'].shape[1]
    args = _encoder_inputs(p, input_ids, attention_mask, token_type_ids) + (
        ptc_p['w1'], ptc_p['b1'], ptc_p['w2'], ptc_p['b2'],
        ptc_p['wi'], ptc_p['bi'], ptc_p['wh'], ptc_p['bh'],
        ptc_p['w3'], ptc_p['b3'])
    return pl.pallas_call(
        functools.partial(_ptc_forward_kernel, B, S, NUM_HEADS, NUM_LAYERS, k_steps, LN_EPS),
        out_shape=jax.ShapeDtypeStruct((B, C), jnp.float32),
        compiler_params=pltpu.CompilerParams(vmem_limit_bytes=VMEM_LIMIT_BYTES),
    )(*args)


# ----------------------------------------------------------------------------
# Parameter init (deterministic, synthetic, packed/stacked for the kernels)
# ----------------------------------------------------------------------------
def init_params(key):
    keys = iter(jax.random.split(key, 128))
    nrm = lambda shape, std=0.02: jax.random.normal(next(keys), shape, jnp.float32) * std
    L, H, I = NUM_LAYERS, HIDDEN, INTERMEDIATE

    params = {
        'word_emb': nrm((VOCAB, H)),
        'pos_emb': nrm((MAX_POS, H)),
        'type_emb': nrm((2, H)),
        'emb_ln_g': jnp.ones((1, H), jnp.float32),
        'emb_ln_b': jnp.zeros((1, H), jnp.float32),
        'enc': dict(
            wqkv=nrm((L, H, 3 * H)), bqkv=jnp.zeros((L, 1, 3 * H), jnp.float32),
            wo=nrm((L, H, H)),       bo=jnp.zeros((L, 1, H), jnp.float32),
            g1=jnp.ones((L, 1, H), jnp.float32), b1=jnp.zeros((L, 1, H), jnp.float32),
            wi=nrm((L, H, I)),       bi=jnp.zeros((L, 1, I), jnp.float32),
            wo2=nrm((L, I, H)),      bo2=jnp.zeros((L, 1, H), jnp.float32),
            g2=jnp.ones((L, 1, H), jnp.float32), b2=jnp.zeros((L, 1, H), jnp.float32),
        ),
        # CLS heads packed along lanes: CoLA(2) | SST_2(2) | STS_B(1) | QNLI(1)
        'heads_w': nrm((H, NUM_HEAD_OUT), 0.05),
        'heads_b': jnp.zeros((1, NUM_HEAD_OUT), jnp.float32),
    }

    def ptc(C):
        return dict(
            w1=nrm((1, H), 0.05), b1=jnp.zeros((1, 1), jnp.float32),
            w2=nrm((H, H), 0.05), b2=jnp.zeros((1, H), jnp.float32),
            wi=nrm((H, 3 * H), 0.1), bi=jnp.zeros((1, 3 * H), jnp.float32),
            wh=nrm((H, 3 * H), 0.1), bh=jnp.zeros((1, 3 * H), jnp.float32),
            w3=nrm((4 * H, C), 0.05), b3=jnp.zeros((1, C), jnp.float32),
        )

    params['MNLI'] = ptc(3)   # MNLIm / MNLImm / AX share the MNLI module
    params['RTE'] = ptc(2)
    params['WNLI'] = ptc(2)
    params['QQP'] = ptc(2)
    params['MRPC'] = ptc(2)
    return params


# ----------------------------------------------------------------------------
# Model wrapper
# ----------------------------------------------------------------------------
class MultiTaskBertPallas:
    def __init__(self, params, k_steps=NUM_LAYERS):
        self.p = params
        self.k_steps = k_steps
        self.hidden_size = HIDDEN

    # TODO(synk): BertTokenizer (string -> ids) and the HF pretrained checkpoint
    # have no Pallas equivalent; the forward consumes pre-tokenized int32 arrays
    # and deterministic synthetic weights.
    def forward(self, input_ids, attention_mask, token_type_ids, task: Task):
        B = input_ids.shape[0]
        if task in (Task.CoLA, Task.SST_2, Task.STS_B, Task.QNLI):
            heads = cls_heads_pallas(self.p, input_ids, attention_mask, token_type_ids)
            lo, hi = HEAD_SLICES[task.name]
            logits = heads[:, lo:hi]
            if task in (Task.CoLA, Task.SST_2):
                return logits
            if task == Task.STS_B:
                return logits.reshape(-1)
            return jax.nn.sigmoid(logits).reshape(B)          # QNLI
        if task in (Task.MNLIm, Task.MNLImm, Task.AX):
            return ptc_pallas(self.p, self.p['MNLI'], input_ids, attention_mask,
                              token_type_ids, self.k_steps)
        if task in (Task.RTE, Task.WNLI, Task.QQP, Task.MRPC):
            return ptc_pallas(self.p, self.p[task.name], input_ids, attention_mask,
                              token_type_ids, self.k_steps)
        raise ValueError(f"unsupported task {task}")


# ----------------------------------------------------------------------------
# Main
# ----------------------------------------------------------------------------
if __name__ == "__main__":
    B, S = 2, 8
    root = jax.random.PRNGKey(0)
    params = init_params(root)

    input_ids = jax.random.randint(jax.random.fold_in(root, 1), (B, S), 0, VOCAB,
                                   dtype=jnp.int32)
    attention_mask = jnp.array([[1, 1, 1, 1, 1, 1, 1, 0],
                                [1, 1, 1, 1, 1, 1, 0, 0]], dtype=jnp.int32)
    token_type_ids = jnp.array([[0, 0, 0, 0, 1, 1, 1, 0],
                                [0, 0, 0, 1, 1, 1, 0, 0]], dtype=jnp.int32)

    model = MultiTaskBertPallas(params, k_steps=NUM_LAYERS)
    fwd = jax.jit(model.forward, static_argnums=3)   # fully jittable; task static

    outs = {}
    for task in [Task.CoLA, Task.SST_2, Task.STS_B, Task.QNLI, Task.MNLIm, Task.RTE]:
        outs[task.name] = fwd(input_ids, attention_mask, token_type_ids, task)
    outs = jax.block_until_ready(outs)

    expected_shapes = {'CoLA': (B, 2), 'SST_2': (B, 2), 'STS_B': (B,),
                       'QNLI': (B,), 'MNLIm': (B, 3), 'RTE': (B, 2)}
    for name, o in outs.items():
        assert o.shape == expected_shapes[name], (name, o.shape)
        assert bool(jnp.all(jnp.isfinite(o))), name

    print("KERNEL_OK")
</pallas_src>

<mosaic_0001>
module attributes {stable_mosaic.version = 11 : i64} {
  func.func @_cls_forward_kernel(%arg0: memref<2x8xi32, #tpu.memory_space<vmem>>, %arg1: memref<2x8xi32, #tpu.memory_space<vmem>>, %arg2: memref<2x8xi32, #tpu.memory_space<vmem>>, %arg3: memref<50x32xf32, #tpu.memory_space<vmem>>, %arg4: memref<16x32xf32, #tpu.memory_space<vmem>>, %arg5: memref<2x32xf32, #tpu.memory_space<vmem>>, %arg6: memref<1x32xf32, #tpu.memory_space<vmem>>, %arg7: memref<1x32xf32, #tpu.memory_space<vmem>>, %arg8: memref<2x32x96xf32, #tpu.memory_space<vmem>>, %arg9: memref<2x1x96xf32, #tpu.memory_space<vmem>>, %arg10: memref<2x32x32xf32, #tpu.memory_space<vmem>>, %arg11: memref<2x1x32xf32, #tpu.memory_space<vmem>>, %arg12: memref<2x1x32xf32, #tpu.memory_space<vmem>>, %arg13: memref<2x1x32xf32, #tpu.memory_space<vmem>>, %arg14: memref<2x32x64xf32, #tpu.memory_space<vmem>>, %arg15: memref<2x1x64xf32, #tpu.memory_space<vmem>>, %arg16: memref<2x64x32xf32, #tpu.memory_space<vmem>>, %arg17: memref<2x1x32xf32, #tpu.memory_space<vmem>>, %arg18: memref<2x1x32xf32, #tpu.memory_space<vmem>>, %arg19: memref<2x1x32xf32, #tpu.memory_space<vmem>>, %arg20: memref<32x6xf32, #tpu.memory_space<vmem>>, %arg21: memref<1x6xf32, #tpu.memory_space<vmem>>, %arg22: memref<2x6xf32, #tpu.memory_space<vmem>>) attributes {dimension_semantics = [], scalar_prefetch = 0 : i64, scratch_operands = 0 : i64, tpu.core_type = #tpu.core_type<tc>} {
    %c0 = arith.constant 0 : index
    %c0_0 = arith.constant 0 : index
    %0 = vector.load %arg1[%c0, %c0_0] : memref<2x8xi32, #tpu.memory_space<vmem>>, vector<2x8xi32>
    %1 = arith.sitofp %0 : vector<2x8xi32> to vector<2x8xf32>
    %c0_1 = arith.constant 0 : index
    %c0_2 = arith.constant 0 : index
    %2 = vector.load %arg2[%c0_1, %c0_2] : memref<2x8xi32, #tpu.memory_space<vmem>>, vector<2x8xi32>
    %3 = arith.sitofp %2 : vector<2x8xi32> to vector<2x8xf32>
    %c0_3 = arith.constant 0 : index
    %c0_4 = arith.constant 0 : index
    %4 = vector.load %arg0[%c0_3, %c0_4] : memref<2x8xi32, #tpu.memory_space<vmem>>, vector<2x8xi32>
    %5 = vector.shape_cast %4 : vector<2x8xi32> to vector<2x8x1xi32>
    %6 = tpu.iota {dimensions = array<i32: 2>} : vector<2x8x50xi32>
    %7 = vector.broadcast %5 : vector<2x8x1xi32> to vector<2x8x50xi32>
    %8 = arith.cmpi eq, %6, %7 : vector<2x8x50xi32>
    %9 = arith.extui %8 : vector<2x8x50xi1> to vector<2x8x50xi32>
    %10 = arith.sitofp %9 : vector<2x8x50xi32> to vector<2x8x50xf32>
    %11 = vector.shape_cast %10 : vector<2x8x50xf32> to vector<16x50xf32>
    %c0_5 = arith.constant 0 : index
    %c0_6 = arith.constant 0 : index
    %12 = vector.load %arg3[%c0_5, %c0_6] : memref<50x32xf32, #tpu.memory_space<vmem>>, vector<50x32xf32>
    %cst = arith.constant dense<0.000000e+00> : vector<16x32xf32>
    %13 = tpu.matmul %11, %12, %cst {dimension_numbers = #tpu.dot_dimension_numbers<[1], [0], [0], [1], [0, 0, 1, 1], [], []>} : vector<16x50xf32>, vector<50x32xf32>, vector<16x32xf32> -> vector<16x32xf32>
    %c0_7 = arith.constant 0 : index
    %c0_8 = arith.constant 0 : index
    %14 = vector.load %arg4[%c0_7, %c0_8] : memref<16x32xf32, #tpu.memory_space<vmem>>, vector<8x32xf32>
    %15 = vector.shape_cast %14 : vector<8x32xf32> to vector<1x8x32xf32>
    %c0_9 = arith.constant 0 : index
    %c0_10 = arith.constant 0 : index
    %16 = vector.load %arg5[%c0_9, %c0_10] : memref<2x32xf32, #tpu.memory_space<vmem>>, vector<1x32xf32>
    %17 = vector.shape_cast %16 : vector<1x32xf32> to vector<1x1x32xf32>
    %c1 = arith.constant 1 : index
    %c0_11 = arith.constant 0 : index
    %18 = vector.load %arg5[%c1, %c0_11] : memref<2x32xf32, #tpu.memory_space<vmem>>, vector<1x32xf32>
    %19 = vector.shape_cast %18 : vector<1x32xf32> to vector<1x1x32xf32>
    %20 = vector.shape_cast %1 : vector<2x8xf32> to vector<2x8x1xf32>
    %21 = vector.shape_cast %13 : vector<16x32xf32> to vector<2x8x32xf32>
    %22 = vector.broadcast %15 : vector<1x8x32xf32> to vector<2x8x32xf32>
    %23 = arith.addf %21, %22 : vector<2x8x32xf32>
    %cst_12 = arith.constant 1.000000e+00 : f32
    %24 = vector.broadcast %cst_12 : f32 to vector<2x8x1xf32>
    %25 = arith.subf %24, %20 : vector<2x8x1xf32>
    %26 = vector.broadcast %25 : vector<2x8x1xf32> to vector<2x8x32xf32>
    %27 = vector.broadcast %17 : vector<1x1x32xf32> to vector<2x8x32xf32>
    %28 = arith.mulf %26, %27 : vector<2x8x32xf32>
    %29 = arith.addf %23, %28 : vector<2x8x32xf32>
    %30 = vector.broadcast %20 : vector<2x8x1xf32> to vector<2x8x32xf32>
    %31 = vector.broadcast %19 : vector<1x1x32xf32> to vector<2x8x32xf32>
    %32 = arith.mulf %30, %31 : vector<2x8x32xf32>
    %33 = arith.addf %29, %32 : vector<2x8x32xf32>
    %34 = vector.shape_cast %33 : vector<2x8x32xf32> to vector<16x32xf32>
    %c0_13 = arith.constant 0 : index
    %c0_14 = arith.constant 0 : index
    %35 = vector.load %arg6[%c0_13, %c0_14] : memref<1x32xf32, #tpu.memory_space<vmem>>, vector<1x32xf32>
    %c0_15 = arith.constant 0 : index
    %c0_16 = arith.constant 0 : index
    %36 = vector.load %arg7[%c0_15, %c0_16] : memref<1x32xf32, #tpu.memory_space<vmem>>, vector<1x32xf32>
    %cst_17 = arith.constant dense<0.000000e+00> : vector<16xf32>
    %37 = vector.multi_reduction <add>, %34, %cst_17 [1] : vector<16x32xf32> to vector<16xf32>
    %38 = vector.shape_cast %37 : vector<16xf32> to vector<16x1xf32>
    %cst_18 = arith.constant 3.200000e+01 : f32
    %39 = vector.broadcast %cst_18 : f32 to vector<16x1xf32>
    %40 = arith.divf %38, %39 : vector<16x1xf32>
    %41 = vector.broadcast %40 : vector<16x1xf32> to vector<16x32xf32>
    %42 = arith.subf %34, %41 : vector<16x32xf32>
    %43 = arith.mulf %42, %42 : vector<16x32xf32>
    %cst_19 = arith.constant dense<0.000000e+00> : vector<16xf32>
    %44 = vector.multi_reduction <add>, %43, %cst_19 [1] : vector<16x32xf32> to vector<16xf32>
    %45 = vector.shape_cast %44 : vector<16xf32> to vector<16x1xf32>
    %cst_20 = arith.constant 3.200000e+01 : f32
    %46 = vector.broadcast %cst_20 : f32 to vector<16x1xf32>
    %47 = arith.divf %45, %46 : vector<16x1xf32>
    %48 = vector.broadcast %40 : vector<16x1xf32> to vector<16x32xf32>
    %49 = arith.subf %34, %48 : vector<16x32xf32>
    %cst_21 = arith.constant 9.99999996E-13 : f32
    %50 = vector.broadcast %cst_21 : f32 to vector<16x1xf32>
    %51 = arith.addf %47, %50 : vector<16x1xf32>
    %52 = math.rsqrt %51 : vector<16x1xf32>
    %53 = vector.broadcast %52 : vector<16x1xf32> to vector<16x32xf32>
    %54 = arith.mulf %49, %53 : vector<16x32xf32>
    %55 = vector.broadcast %35 : vector<1x32xf32> to vector<16x32xf32>
    %56 = arith.mulf %54, %55 : vector<16x32xf32>
    %57 = vector.broadcast %36 : vector<1x32xf32> to vector<16x32xf32>
    %58 = arith.addf %56, %57 : vector<16x32xf32>
    %59 = tpu.iota {dimensions = array<i32: 0>} : vector<16x16xi32>
    %60 = arith.sitofp %59 : vector<16x16xi32> to vector<16x16xf32>
    %cst_22 = arith.constant 1.250000e-01 : f32
    %61 = vector.broadcast %cst_22 : f32 to vector<16x16xf32>
    %62 = arith.mulf %60, %61 : vector<16x16xf32>
    %63 = math.floor %62 : vector<16x16xf32>
    %64 = tpu.iota {dimensions = array<i32: 1>} : vector<16x16xi32>
    %65 = arith.sitofp %64 : vector<16x16xi32> to vector<16x16xf32>
    %cst_23 = arith.constant 1.250000e-01 : f32
    %66 = vector.broadcast %cst_23 : f32 to vector<16x16xf32>
    %67 = arith.mulf %65, %66 : vector<16x16xf32>
    %68 = math.floor %67 : vector<16x16xf32>
    %69 = vector.extract_strided_slice %3 {offsets = [0, 0], sizes = [1, 8], strides = [1, 1]} : vector<2x8xf32> to vector<1x8xf32>
    %70 = vector.extract_strided_slice %3 {offsets = [1, 0], sizes = [1, 8], strides = [1, 1]} : vector<2x8xf32> to vector<1x8xf32>
    %71 = tpu.concatenate %69, %70 in 1 : vector<1x8xf32>, vector<1x8xf32> -> vector<1x16xf32>
    %cst_24 = arith.constant 5.000000e-01 : f32
    %72 = vector.broadcast %cst_24 : f32 to vector<1x16xf32>
    %73 = arith.cmpf ogt, %71, %72 : vector<1x16xf32>
    %74 = arith.cmpf oeq, %63, %68 : vector<16x16xf32>
    %75 = vector.broadcast %73 : vector<1x16xi1> to vector<16x16xi1>
    %76 = arith.andi %74, %75 : vector<16x16xi1>
    %cst_25 = arith.constant 0.000000e+00 : f32
    %cst_26 = arith.constant -1.000000e+09 : f32
    %77 = vector.broadcast %cst_25 : f32 to vector<16x16xf32>
    %78 = vector.broadcast %cst_26 : f32 to vector<16x16xf32>
    %79 = arith.select %76, %77, %78 : vector<16x16xi1>, vector<16x16xf32>
    %c0_27 = arith.constant 0 : index
    %c0_28 = arith.constant 0 : index
    %c0_29 = arith.constant 0 : index
    %80 = vector.load %arg8[%c0_27, %c0_28, %c0_29] : memref<2x32x96xf32, #tpu.memory_space<vmem>>, vector<1x32x96xf32>
    %81 = vector.shape_cast %80 : vector<1x32x96xf32> to vector<32x96xf32>
    %cst_30 = arith.constant dense<0.000000e+00> : vector<16x96xf32>
    %82 = tpu.matmul %58, %81, %cst_30 {dimension_numbers = #tpu.dot_dimension_numbers<[1], [0], [0], [1], [0, 0, 1, 1], [], []>} : vector<16x32xf32>, vector<32x96xf32>, vector<16x96xf32> -> vector<16x96xf32>
    %c0_31 = arith.constant 0 : index
    %c0_32 = arith.constant 0 : index
    %c0_33 = arith.constant 0 : index
    %83 = vector.load %arg9[%c0_31, %c0_32, %c0_33] : memref<2x1x96xf32, #tpu.memory_space<vmem>>, vector<1x1x96xf32>
    %84 = vector.shape_cast %83 : vector<1x1x96xf32> to vector<1x96xf32>
    %85 = vector.broadcast %84 : vector<1x96xf32> to vector<16x96xf32>
    %86 = arith.addf %82, %85 : vector<16x96xf32>
    %c0_34 = arith.constant 0 : index
    %c0_35 = arith.constant 0 : index
    %c0_36 = arith.constant 0 : index
    %87 = vector.load %arg10[%c0_34, %c0_35, %c0_36] : memref<2x32x32xf32, #tpu.memory_space<vmem>>, vector<1x32x32xf32>
    %88 = vector.shape_cast %87 : vector<1x32x32xf32> to vector<32x32xf32>
    %cst_37 = arith.constant 0.000000e+00 : f32
    %89 = vector.broadcast %cst_37 : f32 to vector<16x32xf32>
    %90 = vector.extract_strided_slice %86 {offsets = [0, 0], sizes = [16, 8], strides = [1, 1]} : vector<16x96xf32> to vector<16x8xf32>
    %91 = vector.extract_strided_slice %86 {offsets = [0, 32], sizes = [16, 8], strides = [1, 1]} : vector<16x96xf32> to vector<16x8xf32>
    %92 = vector.extract_strided_slice %86 {offsets = [0, 64], sizes = [16, 8], strides = [1, 1]} : vector<16x96xf32> to vector<16x8xf32>
    %cst_38 = arith.constant dense<0.000000e+00> : vector<16x16xf32>
    %93 = tpu.matmul %90, %91, %cst_38 {dimension_numbers = #tpu.dot_dimension_numbers<[1], [1], [0], [0], [0, 0, 1, 0], [], []>} : vector<16x8xf32>, vector<16x8xf32>, vector<16x16xf32> -> vector<16x16xf32>
    %cst_39 = arith.constant 0.353553385 : f32
    %94 = vector.broadcast %cst_39 : f32 to vector<16x16xf32>
    %95 = arith.mulf %93, %94 : vector<16x16xf32>
    %96 = arith.addf %95, %79 : vector<16x16xf32>
    %cst_40 = arith.constant dense<0xFF800000> : vector<16xf32>
    %97 = vector.multi_reduction <maximumf>, %96, %cst_40 [1] : vector<16x16xf32> to vector<16xf32>
    %98 = vector.shape_cast %97 : vector<16xf32> to vector<16x1xf32>
    %99 = vector.broadcast %98 : vector<16x1xf32> to vector<16x16xf32>
    %100 = arith.subf %96, %99 : vector<16x16xf32>
    %101 = math.exp %100 : vector<16x16xf32>
    %cst_41 = arith.constant dense<0.000000e+00> : vector<16xf32>
    %102 = vector.multi_reduction <add>, %101, %cst_41 [1] : vector<16x16xf32> to vector<16xf32>
    %103 = vector.shape_cast %102 : vector<16xf32> to vector<16x1xf32>
    %104 = vector.broadcast %103 : vector<16x1xf32> to vector<16x16xf32>
    %105 = arith.divf %101, %104 : vector<16x16xf32>
    %cst_42 = arith.constant dense<0.000000e+00> : vector<16x8xf32>
    %106 = tpu.matmul %105, %92, %cst_42 {dimension_numbers = #tpu.dot_dimension_numbers<[1], [0], [0], [1], [0, 0, 1, 1], [], []>} : vector<16x16xf32>, vector<16x8xf32>, vector<16x8xf32> -> vector<16x8xf32>
    %107 = vector.extract_strided_slice %88 {offsets = [0, 0], sizes = [8, 32], strides = [1, 1]} : vector<32x32xf32> to vector<8x32xf32>
    %cst_43 = arith.constant dense<0.000000e+00> : vector<16x32xf32>
    %108 = tpu.matmul %106, %107, %cst_43 {dimension_numbers = #tpu.dot_dimension_numbers<[1], [0], [0], [1], [0, 0, 1, 1], [], []>} : vector<16x8xf32>, vector<8x32xf32>, vector<16x32xf32> -> vector<16x32xf32>
    %109 = arith.addf %89, %108 : vector<16x32xf32>
    %110 = vector.extract_strided_slice %86 {offsets = [0, 8], sizes = [16, 8], strides = [1, 1]} : vector<16x96xf32> to vector<16x8xf32>
    %111 = vector.extract_strided_slice %86 {offsets = [0, 40], sizes = [16, 8], strides = [1, 1]} : vector<16x96xf32> to vector<16x8xf32>
    %112 = vector.extract_strided_slice %86 {offsets = [0, 72], sizes = [16, 8], strides = [1, 1]} : vector<16x96xf32> to vector<16x8xf32>
    %cst_44 = arith.constant dense<0.000000e+00> : vector<16x16xf32>
    %113 = tpu.matmul %110, %111, %cst_44 {dimension_numbers = #tpu.dot_dimension_numbers<[1], [1], [0], [0], [0, 0, 1, 0], [], []>} : vector<16x8xf32>, vector<16x8xf32>, vector<16x16xf32> -> vector<16x16xf32>
    %cst_45 = arith.constant 0.353553385 : f32
    %114 = vector.broadcast %cst_45 : f32 to vector<16x16xf32>
    %115 = arith.mulf %113, %114 : vector<16x16xf32>
    %116 = arith.addf %115, %79 : vector<16x16xf32>
    %cst_46 = arith.constant dense<0xFF800000> : vector<16xf32>
    %117 = vector.multi_reduction <maximumf>, %116, %cst_46 [1] : vector<16x16xf32> to vector<16xf32>
    %118 = vector.shape_cast %117 : vector<16xf32> to vector<16x1xf32>
    %119 = vector.broadcast %118 : vector<16x1xf32> to vector<16x16xf32>
    %120 = arith.subf %116, %119 : vector<16x16xf32>
    %121 = math.exp %120 : vector<16x16xf32>
    %cst_47 = arith.constant dense<0.000000e+00> : vector<16xf32>
    %122 = vector.multi_reduction <add>, %121, %cst_47 [1] : vector<16x16xf32> to vector<16xf32>
    %123 = vector.shape_cast %122 : vector<16xf32> to vector<16x1xf32>
    %124 = vector.broadcast %123 : vector<16x1xf32> to vector<16x16xf32>
    %125 = arith.divf %121, %124 : vector<16x16xf32>
    %cst_48 = arith.constant dense<0.000000e+00> : vector<16x8xf32>
    %126 = tpu.matmul %125, %112, %cst_48 {dimension_numbers = #tpu.dot_dimension_numbers<[1], [0], [0], [1], [0, 0, 1, 1], [], []>} : vector<16x16xf32>, vector<16x8xf32>, vector<16x8xf32> -> vector<16x8xf32>
    %127 = vector.extract_strided_slice %88 {offsets = [8, 0], sizes = [8, 32], strides = [1, 1]} : vector<32x32xf32> to vector<8x32xf32>
    %cst_49 = arith.constant dense<0.000000e+00> : vector<16x32xf32>
    %128 = tpu.matmul %126, %127, %cst_49 {dimension_numbers = #tpu.dot_dimension_numbers<[1], [0], [0], [1], [0, 0, 1, 1], [], []>} : vector<16x8xf32>, vector<8x32xf32>, vector<16x32xf32> -> vector<16x32xf32>
    %129 = arith.addf %109, %128 : vector<16x32xf32>
    %130 = vector.extract_strided_slice %86 {offsets = [0, 16], sizes = [16, 8], strides = [1, 1]} : vector<16x96xf32> to vector<16x8xf32>
    %131 = vector.extract_strided_slice %86 {offsets = [0, 48], sizes = [16, 8], strides = [1, 1]} : vector<16x96xf32> to vector<16x8xf32>
    %132 = vector.extract_strided_slice %86 {offsets = [0, 80], sizes = [16, 8], strides = [1, 1]} : vector<16x96xf32> to vector<16x8xf32>
    %cst_50 = arith.constant dense<0.000000e+00> : vector<16x16xf32>
    %133 = tpu.matmul %130, %131, %cst_50 {dimension_numbers = #tpu.dot_dimension_numbers<[1], [1], [0], [0], [0, 0, 1, 0], [], []>} : vector<16x8xf32>, vector<16x8xf32>, vector<16x16xf32> -> vector<16x16xf32>
    %cst_51 = arith.constant 0.353553385 : f32
    %134 = vector.broadcast %cst_51 : f32 to vector<16x16xf32>
    %135 = arith.mulf %133, %134 : vector<16x16xf32>
    %136 = arith.addf %135, %79 : vector<16x16xf32>
    %cst_52 = arith.constant dense<0xFF800000> : vector<16xf32>
    %137 = vector.multi_reduction <maximumf>, %136, %cst_52 [1] : vector<16x16xf32> to vector<16xf32>
    %138 = vector.shape_cast %137 : vector<16xf32> to vector<16x1xf32>
    %139 = vector.broadcast %138 : vector<16x1xf32> to vector<16x16xf32>
    %140 = arith.subf %136, %139 : vector<16x16xf32>
    %141 = math.exp %140 : vector<16x16xf32>
    %cst_53 = arith.constant dense<0.000000e+00> : vector<16xf32>
    %142 = vector.multi_reduction <add>, %141, %cst_53 [1] : vector<16x16xf32> to vector<16xf32>
    %143 = vector.shape_cast %142 : vector<16xf32> to vector<16x1xf32>
    %144 = vector.broadcast %143 : vector<16x1xf32> to vector<16x16xf32>
    %145 = arith.divf %141, %144 : vector<16x16xf32>
    %cst_54 = arith.constant dense<0.000000e+00> : vector<16x8xf32>
    %146 = tpu.matmul %145, %132, %cst_54 {dimension_numbers = #tpu.dot_dimension_numbers<[1], [0], [0], [1], [0, 0, 1, 1], [], []>} : vector<16x16xf32>, vector<16x8xf32>, vector<16x8xf32> -> vector<16x8xf32>
    %147 = vector.extract_strided_slice %88 {offsets = [16, 0], sizes = [8, 32], strides = [1, 1]} : vector<32x32xf32> to vector<8x32xf32>
    %cst_55 = arith.constant dense<0.000000e+00> : vector<16x32xf32>
    %148 = tpu.matmul %146, %147, %cst_55 {dimension_numbers = #tpu.dot_dimension_numbers<[1], [0], [0], [1], [0, 0, 1, 1], [], []>} : vector<16x8xf32>, vector<8x32xf32>, vector<16x32xf32> -> vector<16x32xf32>
    %149 = arith.addf %129, %148 : vector<16x32xf32>
    %150 = vector.extract_strided_slice %86 {offsets = [0, 24], sizes = [16, 8], strides = [1, 1]} : vector<16x96xf32> to vector<16x8xf32>
    %151 = vector.extract_strided_slice %86 {offsets = [0, 56], sizes = [16, 8], strides = [1, 1]} : vector<16x96xf32> to vector<16x8xf32>
    %152 = vector.extract_strided_slice %86 {offsets = [0, 88], sizes = [16, 8], strides = [1, 1]} : vector<16x96xf32> to vector<16x8xf32>
    %cst_56 = arith.constant dense<0.000000e+00> : vector<16x16xf32>
    %153 = tpu.matmul %150, %151, %cst_56 {dimension_numbers = #tpu.dot_dimension_numbers<[1], [1], [0], [0], [0, 0, 1, 0], [], []>} : vector<16x8xf32>, vector<16x8xf32>, vector<16x16xf32> -> vector<16x16xf32>
    %cst_57 = arith.constant 0.353553385 : f32
    %154 = vector.broadcast %cst_57 : f32 to vector<16x16xf32>
    %155 = arith.mulf %153, %154 : vector<16x16xf32>
    %156 = arith.addf %155, %79 : vector<16x16xf32>
    %cst_58 = arith.constant dense<0xFF800000> : vector<16xf32>
    %157 = vector.multi_reduction <maximumf>, %156, %cst_58 [1] : vector<16x16xf32> to vector<16xf32>
    %158 = vector.shape_cast %157 : vector<16xf32> to vector<16x1xf32>
    %159 = vector.broadcast %158 : vector<16x1xf32> to vector<16x16xf32>
    %160 = arith.subf %156, %159 : vector<16x16xf32>
    %161 = math.exp %160 : vector<16x16xf32>
    %cst_59 = arith.constant dense<0.000000e+00> : vector<16xf32>
    %162 = vector.multi_reduction <add>, %161, %cst_59 [1] : vector<16x16xf32> to vector<16xf32>
    %163 = vector.shape_cast %162 : vector<16xf32> to vector<16x1xf32>
    %164 = vector.broadcast %163 : vector<16x1xf32> to vector<16x16xf32>
    %165 = arith.divf %161, %164 : vector<16x16xf32>
    %cst_60 = arith.constant dense<0.000000e+00> : vector<16x8xf32>
    %166 = tpu.matmul %165, %152, %cst_60 {dimension_numbers = #tpu.dot_dimension_numbers<[1], [0], [0], [1], [0, 0, 1, 1], [], []>} : vector<16x16xf32>, vector<16x8xf32>, vector<16x8xf32> -> vector<16x8xf32>
    %167 = vector.extract_strided_slice %88 {offsets = [24, 0], sizes = [8, 32], strides = [1, 1]} : vector<32x32xf32> to vector<8x32xf32>
    %cst_61 = arith.constant dense<0.000000e+00> : vector<16x32xf32>
    %168 = tpu.matmul %166, %167, %cst_61 {dimension_numbers = #tpu.dot_dimension_numbers<[1], [0], [0], [1], [0, 0, 1, 1], [], []>} : vector<16x8xf32>, vector<8x32xf32>, vector<16x32xf32> -> vector<16x32xf32>
    %169 = arith.addf %149, %168 : vector<16x32xf32>
    %c0_62 = arith.constant 0 : index
    %c0_63 = arith.constant 0 : index
    %c0_64 = arith.constant 0 : index
    %170 = vector.load %arg11[%c0_62, %c0_63, %c0_64] : memref<2x1x32xf32, #tpu.memory_space<vmem>>, vector<1x1x32xf32>
    %171 = vector.shape_cast %170 : vector<1x1x32xf32> to vector<1x32xf32>
    %172 = vector.broadcast %171 : vector<1x32xf32> to vector<16x32xf32>
    %173 = arith.addf %169, %172 : vector<16x32xf32>
    %174 = arith.addf %58, %173 : vector<16x32xf32>
    %c0_65 = arith.constant 0 : index
    %c0_66 = arith.constant 0 : index
    %c0_67 = arith.constant 0 : index
    %175 = vector.load %arg12[%c0_65, %c0_66, %c0_67] : memref<2x1x32xf32, #tpu.memory_space<vmem>>, vector<1x1x32xf32>
    %176 = vector.shape_cast %175 : vector<1x1x32xf32> to vector<1x32xf32>
    %c0_68 = arith.constant 0 : index
    %c0_69 = arith.constant 0 : index
    %c0_70 = arith.constant 0 : index
    %177 = vector.load %arg13[%c0_68, %c0_69, %c0_70] : memref<2x1x32xf32, #tpu.memory_space<vmem>>, vector<1x1x32xf32>
    %178 = vector.shape_cast %177 : vector<1x1x32xf32> to vector<1x32xf32>
    %cst_71 = arith.constant dense<0.000000e+00> : vector<16xf32>
    %179 = vector.multi_reduction <add>, %174, %cst_71 [1] : vector<16x32xf32> to vector<16xf32>
    %180 = vector.shape_cast %179 : vector<16xf32> to vector<16x1xf32>
    %cst_72 = arith.constant 3.200000e+01 : f32
    %181 = vector.broadcast %cst_72 : f32 to vector<16x1xf32>
    %182 = arith.divf %180, %181 : vector<16x1xf32>
    %183 = vector.broadcast %182 : vector<16x1xf32> to vector<16x32xf32>
    %184 = arith.subf %174, %183 : vector<16x32xf32>
    %185 = arith.mulf %184, %184 : vector<16x32xf32>
    %cst_73 = arith.constant dense<0.000000e+00> : vector<16xf32>
    %186 = vector.multi_reduction <add>, %185, %cst_73 [1] : vector<16x32xf32> to vector<16xf32>
    %187 = vector.shape_cast %186 : vector<16xf32> to vector<16x1xf32>
    %cst_74 = arith.constant 3.200000e+01 : f32
    %188 = vector.broadcast %cst_74 : f32 to vector<16x1xf32>
    %189 = arith.divf %187, %188 : vector<16x1xf32>
    %190 = vector.broadcast %182 : vector<16x1xf32> to vector<16x32xf32>
    %191 = arith.subf %174, %190 : vector<16x32xf32>
    %cst_75 = arith.constant 9.99999996E-13 : f32
    %192 = vector.broadcast %cst_75 : f32 to vector<16x1xf32>
    %193 = arith.addf %189, %192 : vector<16x1xf32>
    %194 = math.rsqrt %193 : vector<16x1xf32>
    %195 = vector.broadcast %194 : vector<16x1xf32> to vector<16x32xf32>
    %196 = arith.mulf %191, %195 : vector<16x32xf32>
    %197 = vector.broadcast %176 : vector<1x32xf32> to vector<16x32xf32>
    %198 = arith.mulf %196, %197 : vector<16x32xf32>
    %199 = vector.broadcast %178 : vector<1x32xf32> to vector<16x32xf32>
    %200 = arith.addf %198, %199 : vector<16x32xf32>
    %c0_76 = arith.constant 0 : index
    %c0_77 = arith.constant 0 : index
    %c0_78 = arith.constant 0 : index
    %201 = vector.load %arg14[%c0_76, %c0_77, %c0_78] : memref<2x32x64xf32, #tpu.memory_space<vmem>>, vector<1x32x64xf32>
    %202 = vector.shape_cast %201 : vector<1x32x64xf32> to vector<32x64xf32>
    %cst_79 = arith.constant dense<0.000000e+00> : vector<16x64xf32>
    %203 = tpu.matmul %200, %202, %cst_79 {dimension_numbers = #tpu.dot_dimension_numbers<[1], [0], [0], [1], [0, 0, 1, 1], [], []>} : vector<16x32xf32>, vector<32x64xf32>, vector<16x64xf32> -> vector<16x64xf32>
    %c0_80 = arith.constant 0 : index
    %c0_81 = arith.constant 0 : index
    %c0_82 = arith.constant 0 : index
    %204 = vector.load %arg15[%c0_80, %c0_81, %c0_82] : memref<2x1x64xf32, #tpu.memory_space<vmem>>, vector<1x1x64xf32>
    %205 = vector.shape_cast %204 : vector<1x1x64xf32> to vector<1x64xf32>
    %206 = vector.broadcast %205 : vector<1x64xf32> to vector<16x64xf32>
    %207 = arith.addf %203, %206 : vector<16x64xf32>
    %cst_83 = arith.constant 5.000000e-01 : f32
    %208 = vector.broadcast %cst_83 : f32 to vector<16x64xf32>
    %209 = arith.mulf %208, %207 : vector<16x64xf32>
    %cst_84 = arith.constant 0.707106769 : f32
    %210 = vector.broadcast %cst_84 : f32 to vector<16x64xf32>
    %211 = arith.mulf %207, %210 : vector<16x64xf32>
    %212 = math.absf %211 : vector<16x64xf32>
    %cst_85 = arith.constant 0.327591091 : f32
    %213 = vector.broadcast %cst_85 : f32 to vector<16x64xf32>
    %214 = arith.mulf %213, %212 : vector<16x64xf32>
    %cst_86 = arith.constant 1.000000e+00 : f32
    %215 = vector.broadcast %cst_86 : f32 to vector<16x64xf32>
    %216 = arith.addf %215, %214 : vector<16x64xf32>
    %cst_87 = arith.constant 1.000000e+00 : f32
    %217 = vector.broadcast %cst_87 : f32 to vector<16x64xf32>
    %218 = arith.divf %217, %216 : vector<16x64xf32>
    %cst_88 = arith.constant 1.06140542 : f32
    %219 = vector.broadcast %cst_88 : f32 to vector<16x64xf32>
    %220 = arith.mulf %219, %218 : vector<16x64xf32>
    %cst_89 = arith.constant -1.45315206 : f32
    %221 = vector.broadcast %cst_89 : f32 to vector<16x64xf32>
    %222 = arith.addf %220, %221 : vector<16x64xf32>
    %223 = arith.mulf %222, %218 : vector<16x64xf32>
    %cst_90 = arith.constant 1.42141378 : f32
    %224 = vector.broadcast %cst_90 : f32 to vector<16x64xf32>
    %225 = arith.addf %223, %224 : vector<16x64xf32>
    %226 = arith.mulf %225, %218 : vector<16x64xf32>
    %cst_91 = arith.constant -0.284496725 : f32
    %227 = vector.broadcast %cst_91 : f32 to vector<16x64xf32>
    %228 = arith.addf %226, %227 : vector<16x64xf32>
    %229 = arith.mulf %228, %218 : vector<16x64xf32>
    %cst_92 = arith.constant 0.254829586 : f32
    %230 = vector.broadcast %cst_92 : f32 to vector<16x64xf32>
    %231 = arith.addf %229, %230 : vector<16x64xf32>
    %232 = arith.mulf %231, %218 : vector<16x64xf32>
    %cst_93 = arith.constant 0.000000e+00 : f32
    %233 = vector.broadcast %cst_93 : f32 to vector<16x64xf32>
    %234 = arith.subf %233, %212 : vector<16x64xf32>
    %235 = arith.mulf %234, %212 : vector<16x64xf32>
    %236 = math.exp %235 : vector<16x64xf32>
    %237 = arith.mulf %232, %236 : vector<16x64xf32>
    %cst_94 = arith.constant 1.000000e+00 : f32
    %238 = vector.broadcast %cst_94 : f32 to vector<16x64xf32>
    %239 = arith.subf %238, %237 : vector<16x64xf32>
    %cst_95 = arith.constant 0.000000e+00 : f32
    %240 = vector.broadcast %cst_95 : f32 to vector<16x64xf32>
    %241 = arith.cmpf olt, %211, %240 : vector<16x64xf32>
    %cst_96 = arith.constant 0.000000e+00 : f32
    %242 = vector.broadcast %cst_96 : f32 to vector<16x64xf32>
    %243 = arith.subf %242, %239 : vector<16x64xf32>
    %244 = arith.select %241, %243, %239 : vector<16x64xi1>, vector<16x64xf32>
    %cst_97 = arith.constant 1.000000e+00 : f32
    %245 = vector.broadcast %cst_97 : f32 to vector<16x64xf32>
    %246 = arith.addf %245, %244 : vector<16x64xf32>
    %247 = arith.mulf %209, %246 : vector<16x64xf32>
    %c0_98 = arith.constant 0 : index
    %c0_99 = arith.constant 0 : index
    %c0_100 = arith.constant 0 : index
    %248 = vector.load %arg16[%c0_98, %c0_99, %c0_100] : memref<2x64x32xf32, #tpu.memory_space<vmem>>, vector<1x64x32xf32>
    %249 = vector.shape_cast %248 : vector<1x64x32xf32> to vector<64x32xf32>
    %cst_101 = arith.constant dense<0.000000e+00> : vector<16x32xf32>
    %250 = tpu.matmul %247, %249, %cst_101 {dimension_numbers = #tpu.dot_dimension_numbers<[1], [0], [0], [1], [0, 0, 1, 1], [], []>} : vector<16x64xf32>, vector<64x32xf32>, vector<16x32xf32> -> vector<16x32xf32>
    %c0_102 = arith.constant 0 : index
    %c0_103 = arith.constant 0 : index
    %c0_104 = arith.constant 0 : index
    %251 = vector.load %arg17[%c0_102, %c0_103, %c0_104] : memref<2x1x32xf32, #tpu.memory_space<vmem>>, vector<1x1x32xf32>
    %252 = vector.shape_cast %251 : vector<1x1x32xf32> to vector<1x32xf32>
    %253 = vector.broadcast %252 : vector<1x32xf32> to vector<16x32xf32>
    %254 = arith.addf %250, %253 : vector<16x32xf32>
    %255 = arith.addf %200, %254 : vector<16x32xf32>
    %c0_105 = arith.constant 0 : index
    %c0_106 = arith.constant 0 : index
    %c0_107 = arith.constant 0 : index
    %256 = vector.load %arg18[%c0_105, %c0_106, %c0_107] : memref<2x1x32xf32, #tpu.memory_space<vmem>>, vector<1x1x32xf32>
    %257 = vector.shape_cast %256 : vector<1x1x32xf32> to vector<1x32xf32>
    %c0_108 = arith.constant 0 : index
    %c0_109 = arith.constant 0 : index
    %c0_110 = arith.constant 0 : index
    %258 = vector.load %arg19[%c0_108, %c0_109, %c0_110] : memref<2x1x32xf32, #tpu.memory_space<vmem>>, vector<1x1x32xf32>
    %259 = vector.shape_cast %258 : vector<1x1x32xf32> to vector<1x32xf32>
    %cst_111 = arith.constant dense<0.000000e+00> : vector<16xf32>
    %260 = vector.multi_reduction <add>, %255, %cst_111 [1] : vector<16x32xf32> to vector<16xf32>
    %261 = vector.shape_cast %260 : vector<16xf32> to vector<16x1xf32>
    %cst_112 = arith.constant 3.200000e+01 : f32
    %262 = vector.broadcast %cst_112 : f32 to vector<16x1xf32>
    %263 = arith.divf %261, %262 : vector<16x1xf32>
    %264 = vector.broadcast %263 : vector<16x1xf32> to vector<16x32xf32>
    %265 = arith.subf %255, %264 : vector<16x32xf32>
    %266 = arith.mulf %265, %265 : vector<16x32xf32>
    %cst_113 = arith.constant dense<0.000000e+00> : vector<16xf32>
    %267 = vector.multi_reduction <add>, %266, %cst_113 [1] : vector<16x32xf32> to vector<16xf32>
    %268 = vector.shape_cast %267 : vector<16xf32> to vector<16x1xf32>
    %cst_114 = arith.constant 3.200000e+01 : f32
    %269 = vector.broadcast %cst_114 : f32 to vector<16x1xf32>
    %270 = arith.divf %268, %269 : vector<16x1xf32>
    %271 = vector.broadcast %263 : vector<16x1xf32> to vector<16x32xf32>
    %272 = arith.subf %255, %271 : vector<16x32xf32>
    %cst_115 = arith.constant 9.99999996E-13 : f32
    %273 = vector.broadcast %cst_115 : f32 to vector<16x1xf32>
    %274 = arith.addf %270, %273 : vector<16x1xf32>
    %275 = math.rsqrt %274 : vector<16x1xf32>
    %276 = vector.broadcast %275 : vector<16x1xf32> to vector<16x32xf32>
    %277 = arith.mulf %272, %276 : vector<16x32xf32>
    %278 = vector.broadcast %257 : vector<1x32xf32> to vector<16x32xf32>
    %279 = arith.mulf %277, %278 : vector<16x32xf32>
    %280 = vector.broadcast %259 : vector<1x32xf32> to vector<16x32xf32>
    %281 = arith.addf %279, %280 : vector<16x32xf32>
    %c1_116 = arith.constant 1 : index
    %c0_117 = arith.constant 0 : index
    %c0_118 = arith.constant 0 : index
    %282 = vector.load %arg8[%c1_116, %c0_117, %c0_118] : memref<2x32x96xf32, #tpu.memory_space<vmem>>, vector<1x32x96xf32>
    %283 = vector.shape_cast %282 : vector<1x32x96xf32> to vector<32x96xf32>
    %cst_119 = arith.constant dense<0.000000e+00> : vector<16x96xf32>
    %284 = tpu.matmul %281, %283, %cst_119 {dimension_numbers = #tpu.dot_dimension_numbers<[1], [0], [0], [1], [0, 0, 1, 1], [], []>} : vector<16x32xf32>, vector<32x96xf32>, vector<16x96xf32> -> vector<16x96xf32>
    %c1_120 = arith.constant 1 : index
    %c0_121 = arith.constant 0 : index
    %c0_122 = arith.constant 0 : index
    %285 = vector.load %arg9[%c1_120, %c0_121, %c0_122] : memref<2x1x96xf32, #tpu.memory_space<vmem>>, vector<1x1x96xf32>
    %286 = vector.shape_cast %285 : vector<1x1x96xf32> to vector<1x96xf32>
    %287 = vector.broadcast %286 : vector<1x96xf32> to vector<16x96xf32>
    %288 = arith.addf %284, %287 : vector<16x96xf32>
    %c1_123 = arith.constant 1 : index
    %c0_124 = arith.constant 0 : index
    %c0_125 = arith.constant 0 : index
    %289 = vector.load %arg10[%c1_123, %c0_124, %c0_125] : memref<2x32x32xf32, #tpu.memory_space<vmem>>, vector<1x32x32xf32>
    %290 = vector.shape_cast %289 : vector<1x32x32xf32> to vector<32x32xf32>
    %cst_126 = arith.constant 0.000000e+00 : f32
    %291 = vector.broadcast %cst_126 : f32 to vector<16x32xf32>
    %292 = vector.extract_strided_slice %288 {offsets = [0, 0], sizes = [16, 8], strides = [1, 1]} : vector<16x96xf32> to vector<16x8xf32>
    %293 = vector.extract_strided_slice %288 {offsets = [0, 32], sizes = [16, 8], strides = [1, 1]} : vector<16x96xf32> to vector<16x8xf32>
    %294 = vector.extract_strided_slice %288 {offsets = [0, 64], sizes = [16, 8], strides = [1, 1]} : vector<16x96xf32> to vector<16x8xf32>
    %cst_127 = arith.constant dense<0.000000e+00> : vector<16x16xf32>
    %295 = tpu.matmul %292, %293, %cst_127 {dimension_numbers = #tpu.dot_dimension_numbers<[1], [1], [0], [0], [0, 0, 1, 0], [], []>} : vector<16x8xf32>, vector<16x8xf32>, vector<16x16xf32> -> vector<16x16xf32>
    %cst_128 = arith.constant 0.353553385 : f32
    %296 = vector.broadcast %cst_128 : f32 to vector<16x16xf32>
    %297 = arith.mulf %295, %296 : vector<16x16xf32>
    %298 = arith.addf %297, %79 : vector<16x16xf32>
    %cst_129 = arith.constant dense<0xFF800000> : vector<16xf32>
    %299 = vector.multi_reduction <maximumf>, %298, %cst_129 [1] : vector<16x16xf32> to vector<16xf32>
    %300 = vector.shape_cast %299 : vector<16xf32> to vector<16x1xf32>
    %301 = vector.broadcast %300 : vector<16x1xf32> to vector<16x16xf32>
    %302 = arith.subf %298, %301 : vector<16x16xf32>
    %303 = math.exp %302 : vector<16x16xf32>
    %cst_130 = arith.constant dense<0.000000e+00> : vector<16xf32>
    %304 = vector.multi_reduction <add>, %303, %cst_130 [1] : vector<16x16xf32> to vector<16xf32>
    %305 = vector.shape_cast %304 : vector<16xf32> to vector<16x1xf32>
    %306 = vector.broadcast %305 : vector<16x1xf32> to vector<16x16xf32>
    %307 = arith.divf %303, %306 : vector<16x16xf32>
    %cst_131 = arith.constant dense<0.000000e+00> : vector<16x8xf32>
    %308 = tpu.matmul %307, %294, %cst_131 {dimension_numbers = #tpu.dot_dimension_numbers<[1], [0], [0], [1], [0, 0, 1, 1], [], []>} : vector<16x16xf32>, vector<16x8xf32>, vector<16x8xf32> -> vector<16x8xf32>
    %309 = vector.extract_strided_slice %290 {offsets = [0, 0], sizes = [8, 32], strides = [1, 1]} : vector<32x32xf32> to vector<8x32xf32>
    %cst_132 = arith.constant dense<0.000000e+00> : vector<16x32xf32>
    %310 = tpu.matmul %308, %309, %cst_132 {dimension_numbers = #tpu.dot_dimension_numbers<[1], [0], [0], [1], [0, 0, 1, 1], [], []>} : vector<16x8xf32>, vector<8x32xf32>, vector<16x32xf32> -> vector<16x32xf32>
    %311 = arith.addf %291, %310 : vector<16x32xf32>
    %312 = vector.extract_strided_slice %288 {offsets = [0, 8], sizes = [16, 8], strides = [1, 1]} : vector<16x96xf32> to vector<16x8xf32>
    %313 = vector.extract_strided_slice %288 {offsets = [0, 40], sizes = [16, 8], strides = [1, 1]} : vector<16x96xf32> to vector<16x8xf32>
    %314 = vector.extract_strided_slice %288 {offsets = [0, 72], sizes = [16, 8], strides = [1, 1]} : vector<16x96xf32> to vector<16x8xf32>
    %cst_133 = arith.constant dense<0.000000e+00> : vector<16x16xf32>
    %315 = tpu.matmul %312, %313, %cst_133 {dimension_numbers = #tpu.dot_dimension_numbers<[1], [1], [0], [0], [0, 0, 1, 0], [], []>} : vector<16x8xf32>, vector<16x8xf32>, vector<16x16xf32> -> vector<16x16xf32>
    %cst_134 = arith.constant 0.353553385 : f32
    %316 = vector.broadcast %cst_134 : f32 to vector<16x16xf32>
    %317 = arith.mulf %315, %316 : vector<16x16xf32>
    %318 = arith.addf %317, %79 : vector<16x16xf32>
    %cst_135 = arith.constant dense<0xFF800000> : vector<16xf32>
    %319 = vector.multi_reduction <maximumf>, %318, %cst_135 [1] : vector<16x16xf32> to vector<16xf32>
    %320 = vector.shape_cast %319 : vector<16xf32> to vector<16x1xf32>
    %321 = vector.broadcast %320 : vector<16x1xf32> to vector<16x16xf32>
    %322 = arith.subf %318, %321 : vector<16x16xf32>
    %323 = math.exp %322 : vector<16x16xf32>
    %cst_136 = arith.constant dense<0.000000e+00> : vector<16xf32>
    %324 = vector.multi_reduction <add>, %323, %cst_136 [1] : vector<16x16xf32> to vector<16xf32>
    %325 = vector.shape_cast %324 : vector<16xf32> to vector<16x1xf32>
    %326 = vector.broadcast %325 : vector<16x1xf32> to vector<16x16xf32>
    %327 = arith.divf %323, %326 : vector<16x16xf32>
    %cst_137 = arith.constant dense<0.000000e+00> : vector<16x8xf32>
    %328 = tpu.matmul %327, %314, %cst_137 {dimension_numbers = #tpu.dot_dimension_numbers<[1], [0], [0], [1], [0, 0, 1, 1], [], []>} : vector<16x16xf32>, vector<16x8xf32>, vector<16x8xf32> -> vector<16x8xf32>
    %329 = vector.extract_strided_slice %290 {offsets = [8, 0], sizes = [8, 32], strides = [1, 1]} : vector<32x32xf32> to vector<8x32xf32>
    %cst_138 = arith.constant dense<0.000000e+00> : vector<16x32xf32>
    %330 = tpu.matmul %328, %329, %cst_138 {dimension_numbers = #tpu.dot_dimension_numbers<[1], [0], [0], [1], [0, 0, 1, 1], [], []>} : vector<16x8xf32>, vector<8x32xf32>, vector<16x32xf32> -> vector<16x32xf32>
    %331 = arith.addf %311, %330 : vector<16x32xf32>
    %332 = vector.extract_strided_slice %288 {offsets = [0, 16], sizes = [16, 8], strides = [1, 1]} : vector<16x96xf32> to vector<16x8xf32>
    %333 = vector.extract_strided_slice %288 {offsets = [0, 48], sizes = [16, 8], strides = [1, 1]} : vector<16x96xf32> to vector<16x8xf32>
    %334 = vector.extract_strided_slice %288 {offsets = [0, 80], sizes = [16, 8], strides = [1, 1]} : vector<16x96xf32> to vector<16x8xf32>
    %cst_139 = arith.constant dense<0.000000e+00> : vector<16x16xf32>
    %335 = tpu.matmul %332, %333, %cst_139 {dimension_numbers = #tpu.dot_dimension_numbers<[1], [1], [0], [0], [0, 0, 1, 0], [], []>} : vector<16x8xf32>, vector<16x8xf32>, vector<16x16xf32> -> vector<16x16xf32>
    %cst_140 = arith.constant 0.353553385 : f32
    %336 = vector.broadcast %cst_140 : f32 to vector<16x16xf32>
    %337 = arith.mulf %335, %336 : vector<16x16xf32>
    %338 = arith.addf %337, %79 : vector<16x16xf32>
    %cst_141 = arith.constant dense<0xFF800000> : vector<16xf32>
    %339 = vector.multi_reduction <maximumf>, %338, %cst_141 [1] : vector<16x16xf32> to vector<16xf32>
    %340 = vector.shape_cast %339 : vector<16xf32> to vector<16x1xf32>
    %341 = vector.broadcast %340 : vector<16x1xf32> to vector<16x16xf32>
    %342 = arith.subf %338, %341 : vector<16x16xf32>
    %343 = math.exp %342 : vector<16x16xf32>
    %cst_142 = arith.constant dense<0.000000e+00> : vector<16xf32>
    %344 = vector.multi_reduction <add>, %343, %cst_142 [1] : vector<16x16xf32> to vector<16xf32>
    %345 = vector.shape_cast %344 : vector<16xf32> to vector<16x1xf32>
    %346 = vector.broadcast %345 : vector<16x1xf32> to vector<16x16xf32>
    %347 = arith.divf %343, %346 : vector<16x16xf32>
    %cst_143 = arith.constant dense<0.000000e+00> : vector<16x8xf32>
    %348 = tpu.matmul %347, %334, %cst_143 {dimension_numbers = #tpu.dot_dimension_numbers<[1], [0], [0], [1], [0, 0, 1, 1], [], []>} : vector<16x16xf32>, vector<16x8xf32>, vector<16x8xf32> -> vector<16x8xf32>
    %349 = vector.extract_strided_slice %290 {offsets = [16, 0], sizes = [8, 32], strides = [1, 1]} : vector<32x32xf32> to vector<8x32xf32>
    %cst_144 = arith.constant dense<0.000000e+00> : vector<16x32xf32>
    %350 = tpu.matmul %348, %349, %cst_144 {dimension_numbers = #tpu.dot_dimension_numbers<[1], [0], [0], [1], [0, 0, 1, 1], [], []>} : vector<16x8xf32>, vector<8x32xf32>, vector<16x32xf32> -> vector<16x32xf32>
    %351 = arith.addf %331, %350 : vector<16x32xf32>
    %352 = vector.extract_strided_slice %288 {offsets = [0, 24], sizes = [16, 8], strides = [1, 1]} : vector<16x96xf32> to vector<16x8xf32>
    %353 = vector.extract_strided_slice %288 {offsets = [0, 56], sizes = [16, 8], strides = [1, 1]} : vector<16x96xf32> to vector<16x8xf32>
    %354 = vector.extract_strided_slice %288 {offsets = [0, 88], sizes = [16, 8], strides = [1, 1]} : vector<16x96xf32> to vector<16x8xf32>
    %cst_145 = arith.constant dense<0.000000e+00> : vector<16x16xf32>
    %355 = tpu.matmul %352, %353, %cst_145 {dimension_numbers = #tpu.dot_dimension_numbers<[1], [1], [0], [0], [0, 0, 1, 0], [], []>} : vector<16x8xf32>, vector<16x8xf32>, vector<16x16xf32> -> vector<16x16xf32>
    %cst_146 = arith.constant 0.353553385 : f32
    %356 = vector.broadcast %cst_146 : f32 to vector<16x16xf32>
    %357 = arith.mulf %355, %356 : vector<16x16xf32>
    %358 = arith.addf %357, %79 : vector<16x16xf32>
    %cst_147 = arith.constant dense<0xFF800000> : vector<16xf32>
    %359 = vector.multi_reduction <maximumf>, %358, %cst_147 [1] : vector<16x16xf32> to vector<16xf32>
    %360 = vector.shape_cast %359 : vector<16xf32> to vector<16x1xf32>
    %361 = vector.broadcast %360 : vector<16x1xf32> to vector<16x16xf32>
    %362 = arith.subf %358, %361 : vector<16x16xf32>
    %363 = math.exp %362 : vector<16x16xf32>
    %cst_148 = arith.constant dense<0.000000e+00> : vector<16xf32>
    %364 = vector.multi_reduction <add>, %363, %cst_148 [1] : vector<16x16xf32> to vector<16xf32>
    %365 = vector.shape_cast %364 : vector<16xf32> to vector<16x1xf32>
    %366 = vector.broadcast %365 : vector<16x1xf32> to vector<16x16xf32>
    %367 = arith.divf %363, %366 : vector<16x16xf32>
    %cst_149 = arith.constant dense<0.000000e+00> : vector<16x8xf32>
    %368 = tpu.matmul %367, %354, %cst_149 {dimension_numbers = #tpu.dot_dimension_numbers<[1], [0], [0], [1], [0, 0, 1, 1], [], []>} : vector<16x16xf32>, vector<16x8xf32>, vector<16x8xf32> -> vector<16x8xf32>
    %369 = vector.extract_strided_slice %290 {offsets = [24, 0], sizes = [8, 32], strides = [1, 1]} : vector<32x32xf32> to vector<8x32xf32>
    %cst_150 = arith.constant dense<0.000000e+00> : vector<16x32xf32>
    %370 = tpu.matmul %368, %369, %cst_150 {dimension_numbers = #tpu.dot_dimension_numbers<[1], [0], [0], [1], [0, 0, 1, 1], [], []>} : vector<16x8xf32>, vector<8x32xf32>, vector<16x32xf32> -> vector<16x32xf32>
    %371 = arith.addf %351, %370 : vector<16x32xf32>
    %c1_151 = arith.constant 1 : index
    %c0_152 = arith.constant 0 : index
    %c0_153 = arith.constant 0 : index
    %372 = vector.load %arg11[%c1_151, %c0_152, %c0_153] : memref<2x1x32xf32, #tpu.memory_space<vmem>>, vector<1x1x32xf32>
    %373 = vector.shape_cast %372 : vector<1x1x32xf32> to vector<1x32xf32>
    %374 = vector.broadcast %373 : vector<1x32xf32> to vector<16x32xf32>
    %375 = arith.addf %371, %374 : vector<16x32xf32>
    %376 = arith.addf %281, %375 : vector<16x32xf32>
    %c1_154 = arith.constant 1 : index
    %c0_155 = arith.constant 0 : index
    %c0_156 = arith.constant 0 : index
    %377 = vector.load %arg12[%c1_154, %c0_155, %c0_156] : memref<2x1x32xf32, #tpu.memory_space<vmem>>, vector<1x1x32xf32>
    %378 = vector.shape_cast %377 : vector<1x1x32xf32> to vector<1x32xf32>
    %c1_157 = arith.constant 1 : index
    %c0_158 = arith.constant 0 : index
    %c0_159 = arith.constant 0 : index
    %379 = vector.load %arg13[%c1_157, %c0_158, %c0_159] : memref<2x1x32xf32, #tpu.memory_space<vmem>>, vector<1x1x32xf32>
    %380 = vector.shape_cast %379 : vector<1x1x32xf32> to vector<1x32xf32>
    %cst_160 = arith.constant dense<0.000000e+00> : vector<16xf32>
    %381 = vector.multi_reduction <add>, %376, %cst_160 [1] : vector<16x32xf32> to vector<16xf32>
    %382 = vector.shape_cast %381 : vector<16xf32> to vector<16x1xf32>
    %cst_161 = arith.constant 3.200000e+01 : f32
    %383 = vector.broadcast %cst_161 : f32 to vector<16x1xf32>
    %384 = arith.divf %382, %383 : vector<16x1xf32>
    %385 = vector.broadcast %384 : vector<16x1xf32> to vector<16x32xf32>
    %386 = arith.subf %376, %385 : vector<16x32xf32>
    %387 = arith.mulf %386, %386 : vector<16x32xf32>
    %cst_162 = arith.constant dense<0.000000e+00> : vector<16xf32>
    %388 = vector.multi_reduction <add>, %387, %cst_162 [1] : vector<16x32xf32> to vector<16xf32>
    %389 = vector.shape_cast %388 : vector<16xf32> to vector<16x1xf32>
    %cst_163 = arith.constant 3.200000e+01 : f32
    %390 = vector.broadcast %cst_163 : f32 to vector<16x1xf32>
    %391 = arith.divf %389, %390 : vector<16x1xf32>
    %392 = vector.broadcast %384 : vector<16x1xf32> to vector<16x32xf32>
    %393 = arith.subf %376, %392 : vector<16x32xf32>
    %cst_164 = arith.constant 9.99999996E-13 : f32
    %394 = vector.broadcast %cst_164 : f32 to vector<16x1xf32>
    %395 = arith.addf %391, %394 : vector<16x1xf32>
    %396 = math.rsqrt %395 : vector<16x1xf32>
    %397 = vector.broadcast %396 : vector<16x1xf32> to vector<16x32xf32>
    %398 = arith.mulf %393, %397 : vector<16x32xf32>
    %399 = vector.broadcast %378 : vector<1x32xf32> to vector<16x32xf32>
    %400 = arith.mulf %398, %399 : vector<16x32xf32>
    %401 = vector.broadcast %380 : vector<1x32xf32> to vector<16x32xf32>
    %402 = arith.addf %400, %401 : vector<16x32xf32>
    %c1_165 = arith.constant 1 : index
    %c0_166 = arith.constant 0 : index
    %c0_167 = arith.constant 0 : index
    %403 = vector.load %arg14[%c1_165, %c0_166, %c0_167] : memref<2x32x64xf32, #tpu.memory_space<vmem>>, vector<1x32x64xf32>
    %404 = vector.shape_cast %403 : vector<1x32x64xf32> to vector<32x64xf32>
    %cst_168 = arith.constant dense<0.000000e+00> : vector<16x64xf32>
    %405 = tpu.matmul %402, %404, %cst_168 {dimension_numbers = #tpu.dot_dimension_numbers<[1], [0], [0], [1], [0, 0, 1, 1], [], []>} : vector<16x32xf32>, vector<32x64xf32>, vector<16x64xf32> -> vector<16x64xf32>
    %c1_169 = arith.constant 1 : index
    %c0_170 = arith.constant 0 : index
    %c0_171 = arith.constant 0 : index
    %406 = vector.load %arg15[%c1_169, %c0_170, %c0_171] : memref<2x1x64xf32, #tpu.memory_space<vmem>>, vector<1x1x64xf32>
    %407 = vector.shape_cast %406 : vector<1x1x64xf32> to vector<1x64xf32>
    %408 = vector.broadcast %407 : vector<1x64xf32> to vector<16x64xf32>
    %409 = arith.addf %405, %408 : vector<16x64xf32>
    %cst_172 = arith.constant 5.000000e-01 : f32
    %410 = vector.broadcast %cst_172 : f32 to vector<16x64xf32>
    %411 = arith.mulf %410, %409 : vector<16x64xf32>
    %cst_173 = arith.constant 0.707106769 : f32
    %412 = vector.broadcast %cst_173 : f32 to vector<16x64xf32>
    %413 = arith.mulf %409, %412 : vector<16x64xf32>
    %414 = math.absf %413 : vector<16x64xf32>
    %cst_174 = arith.constant 0.327591091 : f32
    %415 = vector.broadcast %cst_174 : f32 to vector<16x64xf32>
    %416 = arith.mulf %415, %414 : vector<16x64xf32>
    %cst_175 = arith.constant 1.000000e+00 : f32
    %417 = vector.broadcast %cst_175 : f32 to vector<16x64xf32>
    %418 = arith.addf %417, %416 : vector<16x64xf32>
    %cst_176 = arith.constant 1.000000e+00 : f32
    %419 = vector.broadcast %cst_176 : f32 to vector<16x64xf32>
    %420 = arith.divf %419, %418 : vector<16x64xf32>
    %cst_177 = arith.constant 1.06140542 : f32
    %421 = vector.broadcast %cst_177 : f32 to vector<16x64xf32>
    %422 = arith.mulf %421, %420 : vector<16x64xf32>
    %cst_178 = arith.constant -1.45315206 : f32
    %423 = vector.broadcast %cst_178 : f32 to vector<16x64xf32>
    %424 = arith.addf %422, %423 : vector<16x64xf32>
    %425 = arith.mulf %424, %420 : vector<16x64xf32>
    %cst_179 = arith.constant 1.42141378 : f32
    %426 = vector.broadcast %cst_179 : f32 to vector<16x64xf32>
    %427 = arith.addf %425, %426 : vector<16x64xf32>
    %428 = arith.mulf %427, %420 : vector<16x64xf32>
    %cst_180 = arith.constant -0.284496725 : f32
    %429 = vector.broadcast %cst_180 : f32 to vector<16x64xf32>
    %430 = arith.addf %428, %429 : vector<16x64xf32>
    %431 = arith.mulf %430, %420 : vector<16x64xf32>
    %cst_181 = arith.constant 0.254829586 : f32
    %432 = vector.broadcast %cst_181 : f32 to vector<16x64xf32>
    %433 = arith.addf %431, %432 : vector<16x64xf32>
    %434 = arith.mulf %433, %420 : vector<16x64xf32>
    %cst_182 = arith.constant 0.000000e+00 : f32
    %435 = vector.broadcast %cst_182 : f32 to vector<16x64xf32>
    %436 = arith.subf %435, %414 : vector<16x64xf32>
    %437 = arith.mulf %436, %414 : vector<16x64xf32>
    %438 = math.exp %437 : vector<16x64xf32>
    %439 = arith.mulf %434, %438 : vector<16x64xf32>
    %cst_183 = arith.constant 1.000000e+00 : f32
    %440 = vector.broadcast %cst_183 : f32 to vector<16x64xf32>
    %441 = arith.subf %440, %439 : vector<16x64xf32>
    %cst_184 = arith.constant 0.000000e+00 : f32
    %442 = vector.broadcast %cst_184 : f32 to vector<16x64xf32>
    %443 = arith.cmpf olt, %413, %442 : vector<16x64xf32>
    %cst_185 = arith.constant 0.000000e+00 : f32
    %444 = vector.broadcast %cst_185 : f32 to vector<16x64xf32>
    %445 = arith.subf %444, %441 : vector<16x64xf32>
    %446 = arith.select %443, %445, %441 : vector<16x64xi1>, vector<16x64xf32>
    %cst_186 = arith.constant 1.000000e+00 : f32
    %447 = vector.broadcast %cst_186 : f32 to vector<16x64xf32>
    %448 = arith.addf %447, %446 : vector<16x64xf32>
    %449 = arith.mulf %411, %448 : vector<16x64xf32>
    %c1_187 = arith.constant 1 : index
    %c0_188 = arith.constant 0 : index
    %c0_189 = arith.constant 0 : index
    %450 = vector.load %arg16[%c1_187, %c0_188, %c0_189] : memref<2x64x32xf32, #tpu.memory_space<vmem>>, vector<1x64x32xf32>
    %451 = vector.shape_cast %450 : vector<1x64x32xf32> to vector<64x32xf32>
    %cst_190 = arith.constant dense<0.000000e+00> : vector<16x32xf32>
    %452 = tpu.matmul %449, %451, %cst_190 {dimension_numbers = #tpu.dot_dimension_numbers<[1], [0], [0], [1], [0, 0, 1, 1], [], []>} : vector<16x64xf32>, vector<64x32xf32>, vector<16x32xf32> -> vector<16x32xf32>
    %c1_191 = arith.constant 1 : index
    %c0_192 = arith.constant 0 : index
    %c0_193 = arith.constant 0 : index
    %453 = vector.load %arg17[%c1_191, %c0_192, %c0_193] : memref<2x1x32xf32, #tpu.memory_space<vmem>>, vector<1x1x32xf32>
    %454 = vector.shape_cast %453 : vector<1x1x32xf32> to vector<1x32xf32>
    %455 = vector.broadcast %454 : vector<1x32xf32> to vector<16x32xf32>
    %456 = arith.addf %452, %455 : vector<16x32xf32>
    %457 = arith.addf %402, %456 : vector<16x32xf32>
    %c1_194 = arith.constant 1 : index
    %c0_195 = arith.constant 0 : index
    %c0_196 = arith.constant 0 : index
    %458 = vector.load %arg18[%c1_194, %c0_195, %c0_196] : memref<2x1x32xf32, #tpu.memory_space<vmem>>, vector<1x1x32xf32>
    %459 = vector.shape_cast %458 : vector<1x1x32xf32> to vector<1x32xf32>
    %c1_197 = arith.constant 1 : index
    %c0_198 = arith.constant 0 : index
    %c0_199 = arith.constant 0 : index
    %460 = vector.load %arg19[%c1_197, %c0_198, %c0_199] : memref<2x1x32xf32, #tpu.memory_space<vmem>>, vector<1x1x32xf32>
    %461 = vector.shape_cast %460 : vector<1x1x32xf32> to vector<1x32xf32>
    %cst_200 = arith.constant dense<0.000000e+00> : vector<16xf32>
    %462 = vector.multi_reduction <add>, %457, %cst_200 [1] : vector<16x32xf32> to vector<16xf32>
    %463 = vector.shape_cast %462 : vector<16xf32> to vector<16x1xf32>
    %cst_201 = arith.constant 3.200000e+01 : f32
    %464 = vector.broadcast %cst_201 : f32 to vector<16x1xf32>
    %465 = arith.divf %463, %464 : vector<16x1xf32>
    %466 = vector.broadcast %465 : vector<16x1xf32> to vector<16x32xf32>
    %467 = arith.subf %457, %466 : vector<16x32xf32>
    %468 = arith.mulf %467, %467 : vector<16x32xf32>
    %cst_202 = arith.constant dense<0.000000e+00> : vector<16xf32>
    %469 = vector.multi_reduction <add>, %468, %cst_202 [1] : vector<16x32xf32> to vector<16xf32>
    %470 = vector.shape_cast %469 : vector<16xf32> to vector<16x1xf32>
    %cst_203 = arith.constant 3.200000e+01 : f32
    %471 = vector.broadcast %cst_203 : f32 to vector<16x1xf32>
    %472 = arith.divf %470, %471 : vector<16x1xf32>
    %473 = vector.broadcast %465 : vector<16x1xf32> to vector<16x32xf32>
    %474 = arith.subf %457, %473 : vector<16x32xf32>
    %cst_204 = arith.constant 9.99999996E-13 : f32
    %475 = vector.broadcast %cst_204 : f32 to vector<16x1xf32>
    %476 = arith.addf %472, %475 : vector<16x1xf32>
    %477 = math.rsqrt %476 : vector<16x1xf32>
    %478 = vector.broadcast %477 : vector<16x1xf32> to vector<16x32xf32>
    %479 = arith.mulf %474, %478 : vector<16x32xf32>
    %480 = vector.broadcast %459 : vector<1x32xf32> to vector<16x32xf32>
    %481 = arith.mulf %479, %480 : vector<16x32xf32>
    %482 = vector.broadcast %461 : vector<1x32xf32> to vector<16x32xf32>
    %483 = arith.addf %481, %482 : vector<16x32xf32>
    %484 = vector.extract_strided_slice %483 {offsets = [0, 0], sizes = [1, 32], strides = [1, 1]} : vector<16x32xf32> to vector<1x32xf32>
    %485 = vector.extract_strided_slice %483 {offsets = [8, 0], sizes = [1, 32], strides = [1, 1]} : vector<16x32xf32> to vector<1x32xf32>
    %486 = tpu.concatenate %484, %485 in 0 : vector<1x32xf32>, vector<1x32xf32> -> vector<2x32xf32>
    %c0_205 = arith.constant 0 : index
    %c0_206 = arith.constant 0 : index
    %487 = vector.load %arg20[%c0_205, %c0_206] : memref<32x6xf32, #tpu.memory_space<vmem>>, vector<32x6xf32>
    %cst_207 = arith.constant dense<0.000000e+00> : vector<2x6xf32>
    %488 = tpu.matmul %486, %487, %cst_207 {dimension_numbers = #tpu.dot_dimension_numbers<[1], [0], [0], [1], [0, 0, 1, 1], [], []>} : vector<2x32xf32>, vector<32x6xf32>, vector<2x6xf32> -> vector<2x6xf32>
    %c0_208 = arith.constant 0 : index
    %c0_209 = arith.constant 0 : index
    %489 = vector.load %arg21[%c0_208, %c0_209] : memref<1x6xf32, #tpu.memory_space<vmem>>, vector<1x6xf32>
    %490 = vector.broadcast %489 : vector<1x6xf32> to vector<2x6xf32>
    %491 = arith.addf %488, %490 : vector<2x6xf32>
    %c0_210 = arith.constant 0 : index
    %c0_211 = arith.constant 0 : index
    %492 = vector.load %arg22[%c0_210, %c0_211] : memref<2x6xf32, #tpu.memory_space<vmem>>, vector<2x6xf32>
    tpu.vector_store %arg22[%c0_210, %c0_211], %491 {strides = array<i32>} : memref<2x6xf32, #tpu.memory_space<vmem>>, vector<2x6xf32>,
    return
  }
}

</mosaic_0001>

<bundles_post_ra>
// kernel: forward.1
= control target key start
LH: loop header
LB: loop body
LE: loop exit
PB: predicated region body
PF: predicated region fallthrough
CT: control target
= control target key end

     0   :  { %s5593_s0 = inlined_call_operand.hbm [shape: s32[2,8], index: 0, kind: input, shape index: {}]   ;;  %s5594_s1 = inlined_call_operand.hbm [shape: s32[2,8], index: 1, kind: input, shape index: {}]   ;;  %s5595_s2 = inlined_call_operand.hbm [shape: s32[2,8], index: 2, kind: input, shape index: {}]   ;;  %s5596_s3 = inlined_call_operand.hbm [shape: f32[50,32], index: 3, kind: input, shape index: {}]   ;;  %s5597_s4 = inlined_call_operand.hbm [shape: f32[16,32], index: 4, kind: input, shape index: {}]   ;;  %s5598_s5 = inlined_call_operand.hbm [shape: f32[2,32], index: 5, kind: input, shape index: {}]   ;;  %s5599_s6 = inlined_call_operand.vmem [shape: f32[1,32], index: 6, kind: input, shape index: {}]   ;;  %s5600_s7 = inlined_call_operand.vmem [shape: f32[1,32], index: 7, kind: input, shape index: {}]   ;;  %s5601_s8 = inlined_call_operand.hbm [shape: f32[2,32,96], index: 8, kind: input, shape index: {}]   ;;  %s5602_s9 = inlined_call_operand.vmem [shape: f32[2,1,96], index: 9, kind: input, shape index: {}]   ;;  %s5603_s10 = inlined_call_operand.hbm [shape: f32[2,32,32], index: 10, kind: input, shape index: {}]   ;;  %s5604_s11 = inlined_call_operand.vmem [shape: f32[2,1,32], index: 11, kind: input, shape index: {}, may-alias: {11,13,17,19}]   ;;  %s5605_s12 = inlined_call_operand.vmem [shape: f32[2,1,32], index: 12, kind: input, shape index: {}, may-alias: {12,18}]   ;;  %s5606_s13 = inlined_call_operand.vmem [shape: f32[2,1,32], index: 13, kind: input, shape index: {}, may-alias: {11,13,17,19}]   ;;  %s5607_s14 = inlined_call_operand.vmem [shape: f32[2,32,64], index: 14, kind: input, shape index: {}]   ;;  %s5608_s15 = inlined_call_operand.vmem [shape: f32[2,1,64], index: 15, kind: input, shape index: {}]   ;;  %s5609_s16 = inlined_call_operand.hbm [shape: f32[2,64,32], index: 16, kind: input, shape index: {}]   ;;  %s5610_s17 = inlined_call_operand.vmem [shape: f32[2,1,32], index: 17, kind: input, shape index: {}, may-alias: {11,13,17,19}]   ;;  %s5611_s18 = inlined_call_operand.vmem [shape: f32[2,1,32], index: 18, kind: input, shape index: {}, may-alias: {12,18}]   ;;  %s5612_s19 = inlined_call_operand.vmem [shape: f32[2,1,32], index: 19, kind: input, shape index: {}, may-alias: {11,13,17,19}]   ;;  %s5613_s20 = inlined_call_operand.hbm [shape: f32[32,6], index: 20, kind: input, shape index: {}]   ;;  %s5614_s21 = inlined_call_operand.vmem [shape: f32[1,6], index: 21, kind: input, shape index: {}]   ;;  %s5615_s22 = inlined_call_operand.hbm [shape: f32[2,6], index: 22, kind: output, shape index: {}]  }
   0x1   :  { %5624 = sst [smem:[#allocation27_spill]] %s5593_s0 }
   0x2   :  { %5625 = sst [smem:[#allocation28_spill]] %s5594_s1 }
   0x3   :  { %5626 = sst [smem:[#allocation29_spill]] %s5595_s2 }
   0x4   :  { %5627 = sst [smem:[#allocation30_spill]] %s5596_s3 }
   0x5   :  { %5628 = sst [smem:[#allocation31_spill]] %s5597_s4 }
   0x6   :  { %5629 = sst [smem:[#allocation32_spill]] %s5598_s5 }
   0x7   :  { %5630 = sst [smem:[#allocation33_spill]] %s5599_s6 }
   0x8   :  { %5631 = sst [smem:[#allocation34_spill]] %s5612_s19 }
   0x9   :  { %5632 = sst [smem:[#allocation35_spill]] %s5614_s21 }
   0xa   :  { %5633 = sst [smem:[#allocation36_spill]] %s5615_s22 }
   0xb   :  { %27 = vsyncpa [#allocation3], 0 }
   0xc   :  { %28 = vsyncpa [#allocation6], 0 }
   0xd   :  { %29 = vsyncpa [#allocation9], 0 }
   0xe   :  { %30 = vsyncpa [#allocation12], 0 }
   0xf   :  { %31 = vsyncpa [#allocation15], 0 }
  0x10   :  { %32 = vsyncpa [#allocation18], 0 }
  0x11   :  { %33 = vsyncpa [#allocation4], 0  ;;  %s4884_s3 = smov [#allocation5]   ;;  %s4885_s29 = smov [#allocation8]  }
  0x12   :  { %s50_s28 = sshll.u32 %s4884_s3, 4  ;;  %s69_s30 = sshll.u32 %s4885_s29, 4  ;;  %s51_s28 = int_to_ptr.vmem [resolvable:$true] %s50_s28  ;;  %s5028_s30 = int_to_ptr.vmem [resolvable:$true] %s69_s30 }
  0x13   :  { %s5634_s23 = sld [smem:[#allocation28_spill]] }
  0x19   :  { %s4628_s1 = scalar_lea.hbm %s5634_s23, 32 }
  0x1a   :  { %p4629_p0 = scmp.ne.s32.totalorder %s5634_s23, %s4628_s1  ;;  %p4632_p1 = scmp.lt.u32.totalorder %s4628_s1, %s5634_s23 }
  0x1c   :  { %p4634_p2 = pnand %p4632_p1, %p4629_p0 }
  0x1e   :  { %4637 = shalt.err (!%p4634_p2)
}
  0x1f   :  { %s4638_s26 = scalar_lea.vmem %s51_s28, 32  ;;  %p4643_p4 = scmp.lt.s32.totalorder %s51_s28, %s51_s28 }
  0x20   :  { %p4639_p3 = scmp.ne.s32.totalorder %s51_s28, %s4638_s26  ;;  %p4644_p5 = scmp.lt.s32.totalorder %s4638_s26, %s4638_s26 }
  0x22   :  { %p4645_p6 = por %p4644_p5, %p4643_p4 }
  0x24   :  { %p4646_p7 = pnand %p4645_p6, %p4639_p3 }
  0x26   :  { %4649 = shalt.err (!%p4646_p7)
}
  0x27   :  { %53 = dma.hbm_to_vmem [thread:$0]  %s5634_s23, 32, %s51_s28, [#allocation6]  }
  0x28   :  { %s5635_s4 = sld [smem:[#allocation30_spill]] }
  0x2e   :  { %s4650_s0 = scalar_lea.hbm %s5635_s4, 896 }
  0x2f   :  { %p4651_p8 = scmp.ne.s32.totalorder %s5635_s4, %s4650_s0  ;;  %p4654_p9 = scmp.lt.u32.totalorder %s4650_s0, %s5635_s4 }
  0x31   :  { %p4656_p10 = pnand %p4654_p9, %p4651_p8 }
  0x33   :  { %4659 = shalt.err (!%p4656_p10)
}
  0x34   :  { %s4660_s25 = scalar_lea.vmem %s5028_s30, 896  ;;  %p4665_p12 = scmp.lt.s32.totalorder %s5028_s30, %s5028_s30 }
  0x35   :  { %p4661_p11 = scmp.ne.s32.totalorder %s5028_s30, %s4660_s25  ;;  %p4666_p13 = scmp.lt.s32.totalorder %s4660_s25, %s4660_s25 }
  0x37   :  { %p4667_p0 = por %p4666_p13, %p4665_p12 }
  0x39   :  { %p4668_p1 = pnand %p4667_p0, %p4661_p11 }
  0x3b   :  { %4671 = shalt.err (!%p4668_p1)
}
  0x3c   :  { %s4886_s28 = smov 128   ;;  %s4887_s23 = smov 8  }
  0x3d   :  { %75 = dma.hbm_to_vmem [thread:$0]  %s5635_s4, 896, %s5028_s30, [#allocation9], %s4886_s28, %s4886_s28, %s4887_s23  }
  0x3e   :  { %s4888_s27 = smov [#allocation11]   ;;  %s4889_s29 = smov [#allocation14]  }
  0x3f   :  { %s94_s3 = sshll.u32 %s4888_s27, 4  ;;  %s121_s0 = sshll.u32 %s4889_s29, 4  ;;  %s95_s3 = int_to_ptr.vmem [resolvable:$true] %s94_s3  ;;  %s5062_s0 = int_to_ptr.vmem [resolvable:$true] %s121_s0 }
  0x40   :  { %s5636_s1 = sld [smem:[#allocation32_spill]] }
  0x46   :  { %s4672_s6 = scalar_lea.hbm %s5636_s1, 32 }
  0x47   :  { %p4673_p2 = scmp.ne.s32.totalorder %s5636_s1, %s4672_s6  ;;  %p4676_p3 = scmp.lt.u32.totalorder %s4672_s6, %s5636_s1 }
  0x49   :  { %p4678_p4 = pnand %p4676_p3, %p4673_p2 }
  0x4b   :  { %4681 = shalt.err (!%p4678_p4)
}
  0x4c   :  { %s4682_s30 = scalar_lea.vmem %s95_s3, 32  ;;  %p4687_p6 = scmp.lt.s32.totalorder %s95_s3, %s95_s3 }
  0x4d   :  { %p4683_p5 = scmp.ne.s32.totalorder %s95_s3, %s4682_s30  ;;  %p4688_p7 = scmp.lt.s32.totalorder %s4682_s30, %s4682_s30 }
  0x4f   :  { %p4689_p8 = por %p4688_p7, %p4687_p6 }
  0x51   :  { %p4690_p9 = pnand %p4689_p8, %p4683_p5 }
  0x53   :  { %4693 = shalt.err (!%p4690_p9)
}
  0x54   :  { %97 = dma.hbm_to_vmem [thread:$0]  %s5636_s1, 32, %s95_s3, [#allocation12]  }
  0x55   :  { %s4694_s27 = scalar_lea.hbm %s5603_s10, 1024 }
  0x56   :  { %p4695_p10 = scmp.ne.s32.totalorder %s5603_s10, %s4694_s27  ;;  %p4698_p11 = scmp.lt.u32.totalorder %s4694_s27, %s5603_s10 }
  0x58   :  { %p4700_p12 = pnand %p4698_p11, %p4695_p10 }
  0x5a   :  { %4703 = shalt.err (!%p4700_p12)
}
  0x5b   :  { %s4704_s24 = scalar_lea.vmem %s5062_s0, 1024  ;;  %p4709_p0 = scmp.lt.s32.totalorder %s5062_s0, %s5062_s0 }
  0x5c   :  { %p4705_p13 = scmp.ne.s32.totalorder %s5062_s0, %s4704_s24  ;;  %p4710_p1 = scmp.lt.s32.totalorder %s4704_s24, %s4704_s24 }
  0x5e   :  { %p4711_p2 = por %p4710_p1, %p4709_p0 }
  0x60   :  { %p4712_p3 = pnand %p4711_p2, %p4705_p13 }
  0x62   :  { %4715 = shalt.err (!%p4712_p3)
}
  0x63   :  { %127 = dma.hbm_to_vmem [thread:$0]  %s5603_s10, 1024, %s5062_s0, [#allocation15], %s4886_s28, %s4886_s28, %s4887_s23  }
  0x64   :  { %s4890_s6 = smov [#allocation2]   ;;  %s4891_s30 = smov [#allocation7]  }
  0x65   :  { %s40_s25 = sshll.u32 %s4890_s6, 4  ;;  %s60_s4 = sshll.u32 %s4891_s30, 4  ;;  %s41_s25 = int_to_ptr.vmem [resolvable:$true] %s40_s25  ;;  %s61_s4 = int_to_ptr.vmem [resolvable:$true] %s60_s4 }
  0x66   :  { %s5637_s22 = sld [smem:[#allocation27_spill]] }
  0x6c   :  { %s4716_s27 = scalar_lea.hbm %s5637_s22, 32 }
  0x6d   :  { %p4717_p4 = scmp.ne.s32.totalorder %s5637_s22, %s4716_s27  ;;  %p4720_p5 = scmp.lt.u32.totalorder %s4716_s27, %s5637_s22 }
  0x6f   :  { %p4722_p6 = pnand %p4720_p5, %p4717_p4 }
  0x71   :  { %4725 = shalt.err (!%p4722_p6)
}
  0x72   :  { %s4726_s10 = scalar_lea.vmem %s41_s25, 32  ;;  %p4731_p8 = scmp.lt.s32.totalorder %s41_s25, %s41_s25 }
  0x73   :  { %p4727_p7 = scmp.ne.s32.totalorder %s41_s25, %s4726_s10  ;;  %p4732_p9 = scmp.lt.s32.totalorder %s4726_s10, %s4726_s10 }
  0x75   :  { %p4733_p10 = por %p4732_p9, %p4731_p8 }
  0x77   :  { %p4734_p11 = pnand %p4733_p10, %p4727_p7 }
  0x79   :  { %4737 = shalt.err (!%p4734_p11)
}
  0x7a   :  { %43 = dma.hbm_to_vmem [thread:$0]  %s5637_s22, 32, %s41_s25, [#allocation3]  }
  0x7b   :  { %s5638_s6 = sld [smem:[#allocation29_spill]] }
  0x81   :  { %s4738_s30 = scalar_lea.hbm %s5638_s6, 32 }
  0x82   :  { %p4739_p12 = scmp.ne.s32.totalorder %s5638_s6, %s4738_s30  ;;  %p4742_p13 = scmp.lt.u32.totalorder %s4738_s30, %s5638_s6 }
  0x84   :  { %p4744_p0 = pnand %p4742_p13, %p4739_p12 }
  0x86   :  { %4747 = shalt.err (!%p4744_p0)
}
  0x87   :  { %s4748_s19 = scalar_lea.vmem %s61_s4, 32  ;;  %p4753_p2 = scmp.lt.s32.totalorder %s61_s4, %s61_s4 }
  0x88   :  { %p4749_p1 = scmp.ne.s32.totalorder %s61_s4, %s4748_s19  ;;  %p4754_p3 = scmp.lt.s32.totalorder %s4748_s19, %s4748_s19 }
  0x8a   :  { %p4755_p4 = por %p4754_p3, %p4753_p2 }
  0x8c   :  { %p4756_p5 = pnand %p4755_p4, %p4749_p1 }
  0x8e   :  { %4759 = shalt.err (!%p4756_p5)
}
  0x8f   :  { %63 = dma.hbm_to_vmem [thread:$0]  %s5638_s6, 32, %s61_s4, [#allocation6]  }
  0x90   :  { %s4892_s21 = smov [#allocation10]   ;;  %s4893_s10 = smov [#allocation13]  }
  0x91   :  { %s81_s5 = sshll.u32 %s4892_s21, 4  ;;  %s107_s0 = sshll.u32 %s4893_s10, 4  ;;  %s82_s5 = int_to_ptr.vmem [resolvable:$true] %s81_s5  ;;  %s5120_s0 = int_to_ptr.vmem [resolvable:$true] %s107_s0 }
  0x92   :  { %s5639_s1 = sld [smem:[#allocation31_spill]] }
  0x98   :  { %s4760_s30 = scalar_lea.hbm %s5639_s1, 256 }
  0x99   :  { %p4761_p6 = scmp.ne.s32.totalorder %s5639_s1, %s4760_s30  ;;  %p4764_p7 = scmp.lt.u32.totalorder %s4760_s30, %s5639_s1 }
  0x9b   :  { %p4766_p8 = pnand %p4764_p7, %p4761_p6 }
  0x9d   :  { %4769 = shalt.err (!%p4766_p8)
}
  0x9e   :  { %s4770_s4 = scalar_lea.vmem %s82_s5, 256  ;;  %p4775_p10 = scmp.lt.s32.totalorder %s82_s5, %s82_s5 }
  0x9f   :  { %p4771_p9 = scmp.ne.s32.totalorder %s82_s5, %s4770_s4  ;;  %p4776_p11 = scmp.lt.s32.totalorder %s4770_s4, %s4770_s4 }
  0xa1   :  { %p4777_p12 = por %p4776_p11, %p4775_p10 }
  0xa3   :  { %p4778_p13 = pnand %p4777_p12, %p4771_p9 }
  0xa5   :  { %4781 = shalt.err (!%p4778_p13)
}
  0xa6   :  { %87 = dma.hbm_to_vmem [thread:$0]  %s5639_s1, 256, %s82_s5, [#allocation9], %s4886_s28, %s4886_s28, %s4887_s23  }
  0xa7   :  { %s4782_s21 = scalar_lea.hbm %s5601_s8, 1024 }
  0xa8   :  { %p4783_p0 = scmp.ne.s32.totalorder %s5601_s8, %s4782_s21  ;;  %p4786_p1 = scmp.lt.u32.totalorder %s4782_s21, %s5601_s8 }
  0xaa   :  { %p4788_p2 = pnand %p4786_p1, %p4783_p0 }
  0xac   :  { %4791 = shalt.err (!%p4788_p2)
}
  0xad   :  { %s4792_s26 = scalar_lea.vmem %s5120_s0, 1024  ;;  %p4797_p4 = scmp.lt.s32.totalorder %s5120_s0, %s5120_s0 }
  0xae   :  { %p4793_p3 = scmp.ne.s32.totalorder %s5120_s0, %s4792_s26  ;;  %p4798_p5 = scmp.lt.s32.totalorder %s4792_s26, %s4792_s26 }
  0xb0   :  { %p4799_p6 = por %p4798_p5, %p4797_p4 }
  0xb2   :  { %p4800_p7 = pnand %p4799_p6, %p4793_p3 }
  0xb4   :  { %4803 = shalt.err (!%p4800_p7)
}
  0xb5   :  { %113 = dma.hbm_to_vmem [thread:$0]  %s5601_s8, 1024, %s5120_s0, [#allocation12], %s4886_s28, %s4886_s28, %s4887_s23  }
  0xb6   :  { %s4894_s2 = smov [#allocation16]   ;;  %s4895_s29 = smov [#allocation17]  }
  0xb7   :  { %s143_s27 = sshll.u32 %s4894_s2, 4  ;;  %s161_s4 = sshll.u32 %s4895_s29, 4  ;;  %s144_s27 = int_to_ptr.vmem [resolvable:$true] %s143_s27  ;;  %s5157_s4 = int_to_ptr.vmem [resolvable:$true] %s161_s4 }
  0xb8   :  { %s4804_s25 = scalar_lea.hbm %s5609_s16, 2048 }
  0xb9   :  { %p4805_p8 = scmp.ne.s32.totalorder %s5609_s16, %s4804_s25  ;;  %p4808_p9 = scmp.lt.u32.totalorder %s4804_s25, %s5609_s16 }
  0xbb   :  { %p4810_p10 = pnand %p4808_p9, %p4805_p8 }
  0xbd   :  { %4813 = shalt.err (!%p4810_p10)
}
  0xbe   :  { %s4814_s8 = scalar_lea.vmem %s144_s27, 2048  ;;  %p4819_p12 = scmp.lt.s32.totalorder %s144_s27, %s144_s27 }
  0xbf   :  { %p4815_p11 = scmp.ne.s32.totalorder %s144_s27, %s4814_s8  ;;  %p4820_p13 = scmp.lt.s32.totalorder %s4814_s8, %s4814_s8 }
  0xc1   :  { %p4821_p0 = por %p4820_p13, %p4819_p12 }
  0xc3   :  { %p4822_p1 = pnand %p4821_p0, %p4815_p11 }
  0xc5   :  { %4825 = shalt.err (!%p4822_p1)
}
  0xc6   :  { %149 = dma.hbm_to_vmem [thread:$0]  %s5609_s16, 2048, %s144_s27, [#allocation15], %s4886_s28, %s4886_s28, %s4887_s23  }
  0xc7   :  { %s4826_s5 = scalar_lea.hbm %s5613_s20, 512 }
  0xc8   :  { %p4827_p2 = scmp.ne.s32.totalorder %s5613_s20, %s4826_s5  ;;  %p4830_p3 = scmp.lt.u32.totalorder %s4826_s5, %s5613_s20 }
  0xca   :  { %p4832_p4 = pnand %p4830_p3, %p4827_p2 }
  0xcc   :  { %4835 = shalt.err (!%p4832_p4)
}
  0xcd   :  { %s4836_s19 = scalar_lea.vmem %s5157_s4, 512  ;;  %p4841_p6 = scmp.lt.s32.totalorder %s5157_s4, %s5157_s4 }
  0xce   :  { %p4837_p5 = scmp.ne.s32.totalorder %s5157_s4, %s4836_s19  ;;  %p4842_p7 = scmp.lt.s32.totalorder %s4836_s19, %s4836_s19 }
  0xd0   :  { %p4843_p8 = por %p4842_p7, %p4841_p6 }
  0xd2   :  { %p4844_p9 = pnand %p4843_p8, %p4837_p5 }
  0xd4   :  { %4847 = shalt.err (!%p4844_p9)
}
  0xd5   :  { %167 = dma.hbm_to_vmem [thread:$0]  %s5613_s20, 512, %s5157_s4, [#allocation18], %s4886_s28, %s4886_s28, %s4887_s23  }
  0xd6   :  { %4870 = dma.done.wait [#allocation3], 32  }
  0xd7   :  { %4871 = vsyncadd [#allocation3], 4294967264 }
  0xd8   :  { %4872 = dma.done.wait [#allocation6], 64  }
  0xd9   :  { %4873 = vsyncadd [#allocation6], 4294967232 }
  0xda   :  { %4874 = dma.done.wait [#allocation9], 1152  }
  0xdb   :  { %4875 = vsyncadd [#allocation9], 4294966144 }
  0xdc   :  { %4876 = dma.done.wait [#allocation12], 1056  }
  0xdd   :  { %4877 = vsyncadd [#allocation12], 4294966240 }
  0xde   :  { %4878 = dma.done.wait [#allocation15], 3072  }
  0xdf   :  { %4879 = vsyncadd [#allocation15], 4294964224 }
  0xe0   :  { %4880 = dma.done.wait [#allocation18], 512  }
  0xe1   :  { %4881 = vsyncadd [#allocation18], 4294966784  ;;  %v205_v0 = vlaneseq  ;;  %v204_v4 = vld [vmem:[#allocation2] sm:$0x3]  ;;  %v227_v5 = vld [vmem:[#allocation8] sm:$0xff]  ;;  %vm241_vm0 = vcmask 1041408  }
  0xe2   :  { %v228_v6 = vld [vmem:[#allocation8 + $0x8] sm:$0xff]  ;;  %v229_v9 = vld [vmem:[#allocation8 + $0x10] sm:$0xff]  ;;  %v230_v10 = vld [vmem:[#allocation8 + $0x18] sm:$0xff]  ;;  %vm234_vm1 = vcmask 408576   ;;  %v4896_v23 = vmov 0.0   ;;  %vm359_vm4 = vcmask 261120  }
  0xe3   :  { %v5194_v1 = vshrl.u32 %v205_v0, 7  ;;  %v4245_v8 = vpack.c.bf16 %v228_v6, %v227_v5  ;;  %v4249_v11 = vpack.c.bf16 %v230_v10, %v229_v9  ;;  %v231_v12 = vld [vmem:[#allocation8 + $0x20] sm:$0xff]  ;;  %v232_v13 = vld [vmem:[#allocation8 + $0x28] sm:$0xff]  ;;  %v200_v14 = vld [vmem:[#allocation5] sm:$0x3]  ;;  %v5202_v21 = vand.u32 127, %v205_v0 }
  0xe4   :  { %v201_v16 = vcvt.s32.f32 %v200_v14  ;;  %v4253_v17 = vpack.c.bf16 %v232_v13, %v231_v12  ;;  %v233_v20 = vld [vmem:[#allocation8 + $0x30] sm:$0x3]  ;;  %v3727_v30 = vld [vmem:[#allocation11] ss:$0 sm:$0xff]  ;;  %v320_v32 = vld [vmem:[#allocation10] sm:$0xff]  ;;  %s5640_s4 = sld [smem:[#allocation33_spill]] }
  0xe5   :  { %v5197_v2 = vsub.s32 0, %v5194_v1  ;;  %v214_v3 = vsub.s32 1, %v5194_v1  ;;  %4246 = vmatprep.subr.bf16.mxu0 %v4245_v8  ;;  %v3728_v34 = vld [vmem:[#allocation11 + $0x1] ss:$0 sm:$0xff]  ;;  %v435_v58 = vld [vmem:[#allocation13] sm:$0xff]  ;;  %v436_v59 = vld [vmem:[#allocation13 + $0x8] sm:$0xff] }
  0xe6   :  { %4248 = vmatpush3.bf16.msra.mxu0 %v4245_v8  ;;  %v437_v60 = vld [vmem:[#allocation13 + $0x10] sm:$0xff]  ;;  %v4257_v61 = vpack.c.bf16 %v436_v59, %v435_v58  ;;  %v438_v62 = vld [vmem:[#allocation13 + $0x18] sm:$0xff]  ;;  %vm420_vm5 = vcmask 64512   ;;  %vm624_vm13 = vcmask 130048   ;;  %s4901_s24 = smov 120   ;;  %s4902_s8 = smov 88  }
  0xe7   :  { %v208_v7 = vrot.slane %v204_v4, %v5197_v2  ;;  %v215_v15 = vrot.slane %v204_v4, %v214_v3  ;;  %4250 = vmatprep.subr.bf16.mxu0 %v4249_v11  ;;  %v326_v18 = vrot.slane %v201_v16, %v5197_v2  ;;  %v333_v19 = vrot.slane %v201_v16, %v214_v3  ;;  %vm5244_vm6 = vmpackc.low %vm420_vm5, %vm420_vm5  ;;  %s4903_s0 = smov 112   ;;  %s4904_s3 = smov 80  }
  0xe8   :  { %v4261_v63 = vpack.c.bf16 %v438_v62, %v437_v60  ;;  %4258 = vmatprep.subr.bf16.mxu1 %v4257_v61  ;;  %s4905_s30 = smov 72   ;;  %s4906_s26 = smov 104  }
  0xe9   :  { %210 = vbcast.lane.b32.xlu0 %v208_v7, 256  ;;  %328 = vbcast.lane.b32.xlu1 %v326_v18, 256  ;;  %v3731_v18 = vld [vmem:[%s5602_s9] ss:$0 sm:$0xff]  ;;  %s4907_s5 = smov 56   ;;  %s4908_s1 = smov 48  }
  0xea   :  { %4252 = vmatpush3.bf16.msra.mxu0 %v4249_v11  ;;  %4260 = vmatpush3.bf16.msra.mxu1 %v4257_v61  ;;  %v3729_v9 = vld [vmem:[%s5640_s4] ss:$0 sm:$0xff]  ;;  %s4909_s2 = smov 40   ;;  %s5643_s21 = sld [smem:[#allocation34_spill]] }
  0xeb   :  { %4254 = vmatprep.subr.bf16.mxu0 %v4253_v17  ;;  %4262 = vmatprep.subr.bf16.mxu1 %v4261_v63  ;;  %v3730_v11 = vld [vmem:[%s5600_s7] ss:$0 sm:$0xff]  ;;  %s4897_s7 = smov 96   ;;  %s5644_s4 = sld [smem:[#allocation35_spill]] }
  0xed   :  { %217 = vbcast.lane.b32.xlu0 %v215_v15, 256  ;;  %335 = vbcast.lane.b32.xlu1 %v333_v19, 256 }
  0xee   :  { %4256 = vmatpush3.bf16.msra.mxu0 %v4253_v17  ;;  %4264 = vmatpush3.bf16.msra.mxu1 %v4261_v63 }
  0xef   :  { %3995 = vmatprep.subr.msk.mxu0 %vm241_vm0, %v233_v20 }
  0xf2   :  { %3996 = vmatpush3.msk.msra.mxu0 %vm241_vm0, %v233_v20  ;;  %vm1890_vm0 = vcmask 523264  }
 0x15b   :  { %v211_v22 = vpop.permute.xlu0 %210  ;;  %v329_v27 = vpop.permute.xlu1 %328 }
 0x15c   :  { %vm221_vm2 = vcmp.eq.s32.totalorder %v5202_v21, %v211_v22  ;;  %v339_v31 = vsub.f32 1.0, %v329_v27  ;;  %v353_v42 = vmul.f32 %v3728_v34, %v329_v27 }
 0x15d   :  { %v3722_v24 = vsel %vm221_vm2, 1.0, %v4896_v23 }
 0x15e   :  { %3997 = vmatprep.mubr.msk.f32.mxu0 %vm234_vm1, %v3722_v24  ;;  %v345_v35 = vmul.f32 %v3727_v30, %v339_v31 }
 0x15f   :  { %v218_v25 = vpop.permute.xlu0 %217  ;;  %v336_v28 = vpop.permute.xlu1 %335 }
 0x160   :  { %vm222_vm3 = vcmp.eq.s32.totalorder %v5202_v21, %v218_v25  ;;  %v340_v29 = vsub.f32 1.0, %v336_v28  ;;  %v354_v37 = vmul.f32 %v3728_v34, %v336_v28  ;;  %v405_v34 = vadd.s32 8, %v5194_v1 }
 0x161   :  { %v3723_v26 = vsel %vm222_vm3, 1.0, %v4896_v23  ;;  %vm4911_vm3 = vmmov 0  }
 0x162   :  { %3998 = vmatmul.mubr.msk.f32.vlgmr.msra.gmra.mrb[0].mxu0 %vm234_vm1, %v3723_v26  ;;  %v346_v33 = vmul.f32 %v3727_v30, %v340_v29  ;;  %v202_v26 = vld [vmem:[#allocation7] sm:$0x3] }
 0x163   :  { %v203_v27 = vcvt.s32.f32 %v202_v26 }
 0x165   :  { %v416_v28 = vrot.slane %v203_v27, 1 }
 0x235   :  { %v3999_v36 = vpop.f32.mrb[0].mxu0 }
 0x236   :  { %v338_v38 = vadd.f32 %v3999_v36, %v320_v32  ;;  %v311_v39 = vpop.f32.mrb[1].mxu0 }
 0x237   :  { %v337_v40 = vadd.f32 %v320_v32, %v311_v39  ;;  %v406_v39 = vcvt.s32.f32 %v5194_v1 }
 0x238   :  { %v348_v41 = vadd.f32 %v346_v33, %v338_v38  ;;  %v412_v38 = vcvt.s32.f32 %v5202_v21 }
 0x239   :  { %v347_v43 = vadd.f32 %v345_v35, %v337_v40 }
 0x23a   :  { %v356_v44 = vadd.f32 %v354_v37, %v348_v41  ;;  %v407_v37 = vcvt.s32.f32 %v405_v34  ;;  %v413_v41 = vmul.f32 0.125, %v412_v38 }
 0x23b   :  { %v355_v45 = vadd.f32 %v353_v42, %v347_v43  ;;  %v408_v42 = vmul.f32 0.125, %v406_v39  ;;  %v4898_v43 = vmov 0  }
 0x23c   :  { %v363_v46 = vsel %vm359_vm4, %v356_v44, 0.0  ;;  %v409_v40 = vmul.f32 0.125, %v407_v37 }
 0x23d   :  { %364 = vadd.xlane.f32.xlu1 %v363_v46  ;;  %v360_v47 = vsel %vm359_vm4, %v355_v45, 0.0  ;;  %v414_v46 = vfloor.f32 %v413_v41 }
 0x23e   :  { %361 = vadd.xlane.f32.xlu0 %v360_v47 }
 0x2ca   :  { %v365_v48 = vpop.xlane.xlu1 %364 }
 0x2cb   :  { %v368_v49 = vmul.f32 0.03125, %v365_v48  ;;  %v362_v50 = vpop.xlane.xlu0 %361  ;;  %v410_v48 = vfloor.f32 %v408_v42 }
 0x2cc   :  { %v367_v51 = vmul.f32 0.03125, %v362_v50 }
 0x2cd   :  { %v370_v52 = vsub.f32 %v356_v44, %v368_v49  ;;  %vm423_vm10 = vcmp.eq.f32.partialorder %v410_v48, %v414_v46  ;;  %v4899_v49 = vmov -1e+09  }
 0x2ce   :  { %v369_v53 = vsub.f32 %v355_v45, %v367_v51  ;;  %v411_v45 = vfloor.f32 %v409_v40 }
 0x2cf   :  { %v372_v56 = vmul.f32 %v370_v52, %v370_v52 }
 0x2d0   :  { %v371_v54 = vmul.f32 %v369_v53, %v369_v53  ;;  %vm424_vm8 = vcmp.eq.f32.partialorder %v411_v45, %v414_v46 }
 0x2d1   :  { %v376_v57 = vsel %vm359_vm4, %v372_v56, 0.0 }
 0x2d2   :  { %v373_v55 = vsel %vm359_vm4, %v371_v54, 0.0 }
 0x2d3   :  { %374 = vadd.xlane.f32.xlu0 %v373_v55 }
 0x2d7   :  { %377 = vadd.xlane.f32.xlu0 %v376_v57 }
 0x2ed   :  { %417 = vrot.lane.b32.xlu0 %v416_v28, %s4887_s23  ;;  %s4900_s23 = smov 64  }
 0x360   :  { %v375_v0 = vpop.xlane.xlu0 %374 }
 0x361   :  { %v379_v3 = vmul.f32 0.03125, %v375_v0 }
 0x363   :  { %v381_v4 = vadd.f32 1e-12, %v379_v3 }
 0x364   :  { %v378_v5 = vpop.xlane.xlu0 %377 }
 0x365   :  { %4528 = vrsqrt.f32 %v381_v4  ;;  %v380_v6 = vmul.f32 0.03125, %v378_v5 }
 0x367   :  { %v382_v7 = vadd.f32 1e-12, %v380_v6 }
 0x368   :  { %v418_v35 = vpop.permute.xlu0 %417 }
 0x369   :  { %4530 = vrsqrt.f32 %v382_v7  ;;  %v421_v36 = vsel %vm420_vm5, %v203_v27, %v418_v35 }
 0x36a   :  { %vm422_vm7 = vcmp.gt.f32.partialorder %v421_v36, 0.5 }
 0x36b   :  { %v425_v44 = vsel %vm422_vm7, 1, %v4898_v43 }
 0x36c   :  { %v429_v47 = vrot.slane %v425_v44, %v5197_v2 }
 0x36e   :  { %vm430_vm9 = vcmp.eq.s32.totalorder %v429_v47, 1 }
 0x36f   :  { %v4529_v8 = vpop.eup %4528  ;;  %vm432_vm11 = vmand %vm424_vm8, %vm430_vm9 }
 0x370   :  { %v385_v10 = vmul.f32 %v4529_v8, %v369_v53  ;;  %vm431_vm12 = vmand %vm423_vm10, %vm430_vm9  ;;  %v5259_v21 = vsel %vm432_vm11, 0.0, %v4899_v49 }
 0x371   :  { %v5261_v50 = vsel %vm431_vm12, 0.0, %v4899_v49 }
 0x372   :  { %v393_v12 = vmul.f32 %v3729_v9, %v385_v10 }
 0x373   :  { %v4531_v13 = vpop.eup %4530 }
 0x374   :  { %v386_v14 = vmul.f32 %v4531_v13, %v370_v52  ;;  %v5218_v15 = vadd.f32 %v3730_v11, %v393_v12 }
 0x376   :  { %v394_v16 = vmul.f32 %v3729_v9, %v386_v14  ;;  %4008 = vmatprep.mubr.msk.f32.mxu1 %vm359_vm4, %v5218_v15 }
 0x378   :  { %v5222_v17 = vadd.f32 %v3730_v11, %v394_v16 }
 0x37a   :  { %4009 = vmatmul.mubr.msk.f32.vlgmr.msra.gmra.mrb[0].mxu1 %vm359_vm4, %v5222_v17 }
 0x44d   :  { %v4010_v19 = vpop.f32.mrb[0].mxu1 }
 0x44e   :  { %v5229_v20 = vadd.f32 %v4010_v19, %v3731_v18  ;;  %v518_v22 = vpop.f32.mrb[1].mxu1 }
 0x44f   :  { %v5231_v24 = vadd.f32 %v3731_v18, %v518_v22 }
 0x451   :  { %4015 = vmatprep.mubr.msk.f32.mxu1 %vm420_vm5, %v5231_v24  ;;  %v5237_v25 = vpack.i.bf16 %v5229_v20, %v5231_v24 }
 0x453   :  { %4449 = vrot.lane.b32.xlu1 %v5237_v25, %s4897_s7 }
 0x4c5   :  { %v4450_v29 = vpop.permute.xlu1 %4449 }
 0x4c6   :  { %v4452_v30 = vunpack.i.h.bf16 %v4450_v29  ;;  %v4451_v31 = vunpack.i.l.bf16 %v4450_v29 }
 0x4c8   :  { %v4265_v33 = vpack.c.bf16 %v4452_v30, %v4451_v31 }
 0x4ca   :  { %4267 = vmatprep.subr.msk.bf16.mxu1 %vm5244_vm6, %v4265_v33 }
 0x4cb   :  { %4270 = vmatpush3.bf16.xpose.msk.msra.mxu1 %vm5244_vm6, %v4265_v33 }
 0x4d2   :  { %4016 = vmatmul.mubr.msk.f32.vlgmr.msra.gmra.mrb[2].mxu1 %vm420_vm5, %v5229_v20 }
 0x5a5   :  { %v4017_v1 = vpop.f32.mrb[2].mxu1 }
 0x5a6   :  { %v621_v51 = vmul.f32 0.35355338, %v4017_v1  ;;  %v611_v52 = vpop.f32.mrb[3].mxu1 }
 0x5a7   :  { %v620_v53 = vmul.f32 0.35355338, %v611_v52 }
 0x5a8   :  { %v623_v54 = vadd.f32 %v621_v51, %v5259_v21 }
 0x5a9   :  { %v622_v2 = vadd.f32 %v620_v53, %v5261_v50 }
 0x5aa   :  { %v628_v55 = vsel %vm624_vm13, %v623_v54, -inf }
 0x5ab   :  { %629 = vmax.xlane.f32.xlu0 %v628_v55  ;;  %v625_v56 = vsel %vm624_vm13, %v622_v2, -inf }
 0x5ac   :  { %626 = vmax.xlane.f32.xlu1 %v625_v56 }
 0x5bd   :  { %4454 = vrot.lane.b32.xlu1 %v5237_v25, %s4900_s23 }
 0x5c1   :  { %734 = vrot.lane.b32.xlu1 %v5231_v24, %s4901_s24 }
 0x638   :  { %v630_v57 = vpop.xlane.xlu0 %629 }
 0x639   :  { %v632_v58 = vsub.f32 %v623_v54, %v630_v57  ;;  %v627_v59 = vpop.xlane.xlu1 %626 }
 0x63a   :  { %v631_v60 = vsub.f32 %v622_v2, %v627_v59 }
 0x63b   :  { %v635_v61 = vmul.f32 1.442695, %v632_v58 }
 0x63c   :  { %v633_v62 = vmul.f32 1.442695, %v631_v60 }
 0x63d   :  { %4532 = vpow2.f32 %v635_v61  ;;  %v4455_v63 = vpop.permute.xlu1 %4454 }
 0x63e   :  { %4534 = vpow2.f32 %v633_v62  ;;  %v4457_v0 = vunpack.i.h.bf16 %v4455_v63  ;;  %v4456_v3 = vunpack.i.l.bf16 %v4455_v63 }
 0x640   :  { %v4271_v4 = vpack.c.bf16 %v4457_v0, %v4456_v3 }
 0x641   :  { %v735_v9 = vpop.permute.xlu1 %734 }
 0x642   :  { %4272 = vmatprep.subr.bf16.mxu1 %v4271_v4 }
 0x643   :  { %4274 = vmatpush3.bf16.msra.mxu1 %v4271_v4 }
 0x647   :  { %v4533_v5 = vpop.eup %4532 }
 0x648   :  { %v4535_v6 = vpop.eup %4534  ;;  %v640_v7 = vsel %vm624_vm13, %v4533_v5, 0.0 }
 0x649   :  { %641 = vadd.xlane.f32.xlu0 %v640_v7  ;;  %v637_v8 = vsel %vm624_vm13, %v4535_v6, 0.0 }
 0x64a   :  { %638 = vadd.xlane.f32.xlu1 %v637_v8 }
 0x65b   :  { %736 = vrot.lane.b32.xlu1 %v5229_v20, %s4901_s24 }
 0x65f   :  { %4459 = vrot.lane.b32.xlu0 %v5237_v25, %s4902_s8  ;;  %1100 = vrot.lane.b32.xlu1 %v5231_v24, %s4903_s0 }
 0x663   :  { %4464 = vrot.lane.b32.xlu0 %v5237_v25, %s4904_s3 }
 0x667   :  { %1102 = vrot.lane.b32.xlu0 %v5229_v20, %s4903_s0 }
 0x6d6   :  { %v642_v10 = vpop.xlane.xlu0 %641 }
 0x6d7   :  { %4536 = vrcp.f32 %v642_v10  ;;  %v639_v11 = vpop.xlane.xlu1 %638 }
 0x6d8   :  { %4538 = vrcp.f32 %v639_v11 }
 0x6da   :  { %v4460_v12 = vpop.permute.xlu0 %4459 }
 0x6db   :  { %v4462_v13 = vunpack.i.h.bf16 %v4460_v12  ;;  %v4461_v14 = vunpack.i.l.bf16 %v4460_v12  ;;  %v737_v31 = vpop.permute.xlu1 %736 }
 0x6dd   :  { %v4275_v16 = vpack.c.bf16 %v4462_v13, %v4461_v14 }
 0x6de   :  { %v4465_v18 = vpop.permute.xlu0 %4464 }
 0x6df   :  { %4277 = vmatprep.subr.msk.bf16.mxu1 %vm5244_vm6, %v4275_v16  ;;  %v4467_v26 = vunpack.i.h.bf16 %v4465_v18  ;;  %v4466_v27 = vunpack.i.l.bf16 %v4465_v18  ;;  %v1101_v33 = vpop.permute.xlu1 %1100 }
 0x6e1   :  { %v4537_v19 = vpop.eup %4536  ;;  %v4285_v30 = vpack.c.bf16 %v4467_v26, %v4466_v27 }
 0x6e2   :  { %v4539_v22 = vpop.eup %4538  ;;  %v646_v29 = vmul.f32 %v4537_v19, %v4533_v5  ;;  %v1103_v34 = vpop.permute.xlu0 %1102 }
 0x6e3   :  { %v644_v28 = vmul.f32 %v4539_v22, %v4535_v6 }
 0x6e5   :  { %4022 = vmatprep.mubr.msk.f32.mxu1 %vm624_vm13, %v644_v28 }
 0x6e6   :  { %4023 = vmatmul.mubr.msk.f32.vlgmr.msra.gmra.mrb[4].mxu1 %vm624_vm13, %v646_v29 }
 0x6e7   :  { %4280 = vmatpush3.bf16.xpose.msk.msra.mxu1 %vm5244_vm6, %v4275_v16  ;;  %4029 = vmatprep.mubr.msk.f32.mxu1 %vm420_vm5, %v735_v9 }
 0x6e8   :  { %4287 = vmatprep.subr.msk.bf16.mxu1 %vm5244_vm6, %v4285_v30 }
 0x6ee   :  { %4030 = vmatmul.mubr.msk.f32.vlgmr.msra.gmra.mrb[6].mxu1 %vm420_vm5, %v737_v31  ;;  %v528_v31 = vld [vmem:[#allocation14 + $0x8] sm:$0xff] }
 0x6ef   :  { %4290 = vmatpush3.bf16.xpose.msk.msra.mxu1 %vm5244_vm6, %v4285_v30  ;;  %4053 = vmatprep.mubr.msk.f32.mxu1 %vm420_vm5, %v1101_v33  ;;  %v527_v33 = vld [vmem:[#allocation14] sm:$0xff] }
 0x6f6   :  { %4054 = vmatmul.mubr.msk.f32.vlgmr.msra.gmra.mrb[8].mxu1 %vm420_vm5, %v1103_v34 }
 0x7b9   :  { %v5297_v35 = vpop.f32.mrb[4].mxu1 }
 0x7ba   :  { %v5299_v36 = vpop.f32.mrb[5].mxu1 }
 0x7c1   :  { %v4031_v37 = vpop.f32.mrb[6].mxu1 }
 0x7c2   :  { %v826_v38 = vmul.f32 0.35355338, %v4031_v37  ;;  %v816_v39 = vpop.f32.mrb[7].mxu1 }
 0x7c3   :  { %v825_v40 = vmul.f32 0.35355338, %v816_v39 }
 0x7c4   :  { %v828_v41 = vadd.f32 %v826_v38, %v5259_v21 }
 0x7c5   :  { %v827_v42 = vadd.f32 %v825_v40, %v5261_v50 }
 0x7c6   :  { %v832_v43 = vsel %vm624_vm13, %v828_v41, -inf }
 0x7c7   :  { %833 = vmax.xlane.f32.xlu0 %v832_v43  ;;  %v829_v44 = vsel %vm624_vm13, %v827_v42, -inf }
 0x7c8   :  { %830 = vmax.xlane.f32.xlu1 %v829_v44 }
 0x7c9   :  { %v4055_v45 = vpop.f32.mrb[8].mxu1 }
 0x7ca   :  { %v1182_v46 = vpop.f32.mrb[9].mxu1  ;;  %v1192_v57 = vmul.f32 0.35355338, %v4055_v45 }
 0x7cb   :  { %v1191_v56 = vmul.f32 0.35355338, %v1182_v46 }
 0x7cc   :  { %v1194_v59 = vadd.f32 %v1192_v57, %v5259_v21 }
 0x7cd   :  { %v1193_v58 = vadd.f32 %v1191_v56, %v5261_v50 }
 0x7ce   :  { %v1198_v61 = vsel %vm624_vm13, %v1194_v59, -inf }
 0x7cf   :  { %v1195_v60 = vsel %vm624_vm13, %v1193_v58, -inf }
 0x854   :  { %v834_v47 = vpop.xlane.xlu0 %833 }
 0x855   :  { %v836_v48 = vsub.f32 %v828_v41, %v834_v47  ;;  %v831_v49 = vpop.xlane.xlu1 %830 }
 0x856   :  { %v835_v1 = vsub.f32 %v827_v42, %v831_v49 }
 0x857   :  { %v839_v51 = vmul.f32 1.442695, %v836_v48 }
 0x858   :  { %v837_v52 = vmul.f32 1.442695, %v835_v1 }
 0x859   :  { %4540 = vpow2.f32 %v839_v51 }
 0x85a   :  { %4542 = vpow2.f32 %v837_v52 }
 0x863   :  { %v4541_v53 = vpop.eup %4540 }
 0x864   :  { %v4543_v54 = vpop.eup %4542  ;;  %v844_v2 = vsel %vm624_vm13, %v4541_v53, 0.0 }
 0x865   :  { %845 = vadd.xlane.f32.xlu1 %v844_v2  ;;  %v841_v55 = vsel %vm624_vm13, %v4543_v54, 0.0  ;;  %v529_v2 = vld [vmem:[#allocation14 + $0x10] sm:$0xff] }
 0x866   :  { %842 = vadd.xlane.f32.xlu0 %v841_v55 }
 0x876   :  { %4474 = vrot.lane.b32.xlu1 %v5237_v25, %s4905_s30 }
 0x87a   :  { %1387 = vrot.lane.b32.xlu1 %v5231_v24, %s4906_s26 }
 0x87c   :  { %4469 = vrot.lane.b32.xlu0 %v5237_v25, %s4907_s5 }
 0x880   :  { %1389 = vrot.lane.b32.xlu0 %v5229_v20, %s4906_s26 }
 0x89e   :  { %1196 = vmax.xlane.f32.xlu1 %v1195_v60 }
 0x89f   :  { %1199 = vmax.xlane.f32.xlu0 %v1198_v61 }
 0x8f2   :  { %v846_v24 = vpop.xlane.xlu1 %845 }
 0x8f3   :  { %4544 = vrcp.f32 %v846_v24  ;;  %v843_v62 = vpop.xlane.xlu0 %842 }
 0x8f4   :  { %4546 = vrcp.f32 %v843_v62 }
 0x8f6   :  { %v4475_v63 = vpop.permute.xlu1 %4474 }
 0x8f7   :  { %v4477_v0 = vunpack.i.h.bf16 %v4475_v63  ;;  %v4476_v3 = vunpack.i.l.bf16 %v4475_v63  ;;  %v4470_v20 = vpop.permute.xlu0 %4469 }
 0x8f8   :  { %v4472_v4 = vunpack.i.h.bf16 %v4470_v20  ;;  %v4471_v5 = vunpack.i.l.bf16 %v4470_v20 }
 0x8f9   :  { %v4295_v6 = vpack.c.bf16 %v4477_v0, %v4476_v3 }
 0x8fa   :  { %v4281_v7 = vpack.c.bf16 %v4472_v4, %v4471_v5  ;;  %v1388_v8 = vpop.permute.xlu1 %1387 }
 0x8fb   :  { %4297 = vmatprep.subr.msk.bf16.mxu1 %vm5244_vm6, %v4295_v6  ;;  %4072 = vmatprep.mubr.msk.f32.mxu1 %vm420_vm5, %v1388_v8  ;;  %v1390_v13 = vpop.permute.xlu0 %1389  ;;  %v530_v8 = vld [vmem:[#allocation14 + $0x18] sm:$0xff] }
 0x8fc   :  { %4282 = vmatprep.subr.bf16.mxu0 %v4281_v7  ;;  %4300 = vmatpush3.bf16.xpose.msk.msra.mxu1 %vm5244_vm6, %v4295_v6 }
 0x8fd   :  { %v4545_v9 = vpop.eup %4544  ;;  %4284 = vmatpush3.bf16.msra.mxu0 %v4281_v7 }
 0x8fe   :  { %v4547_v10 = vpop.eup %4546  ;;  %v850_v12 = vmul.f32 %v4545_v9, %v4541_v53  ;;  %4039 = vmatprep.subr.mxu0 %v528_v31 }
 0x8ff   :  { %v848_v11 = vmul.f32 %v4547_v10, %v4543_v54 }
 0x901   :  { %4036 = vmatprep.mubr.msk.f32.mxu0 %vm624_vm13, %v848_v11 }
 0x902   :  { %4037 = vmatmul.mubr.msk.f32.vlgmr.msra.gmra.mrb[2].mxu0 %vm624_vm13, %v850_v12 }
 0x903   :  { %4073 = vmatmul.mubr.msk.f32.vlgmr.msra.gmra.mrb[10].mxu1 %vm420_vm5, %v1390_v13  ;;  %4040 = vmatpush3.msra.mxu0 %v528_v31 }
 0x904   :  { %4044 = vmatprep.subr.mxu0 %v527_v33 }
 0x92b   :  { %v1197_v14 = vpop.xlane.xlu1 %1196 }
 0x92c   :  { %v1201_v16 = vsub.f32 %v1193_v58, %v1197_v14  ;;  %v1200_v18 = vpop.xlane.xlu0 %1199  ;;  %v3766_v14 = vld [vmem:[%s5604_s11] ss:$0 sm:$0xff] }
 0x92d   :  { %v1202_v19 = vsub.f32 %v1194_v59, %v1200_v18 }
 0x92e   :  { %v1203_v22 = vmul.f32 1.442695, %v1201_v16 }
 0x92f   :  { %v1205_v26 = vmul.f32 1.442695, %v1202_v19 }
 0x930   :  { %4548 = vpow2.f32 %v1203_v22 }
 0x931   :  { %4550 = vpow2.f32 %v1205_v26 }
 0x93a   :  { %v4549_v27 = vpop.eup %4548 }
 0x93b   :  { %v4551_v28 = vpop.eup %4550  ;;  %v1207_v29 = vsel %vm624_vm13, %v4549_v27, 0.0 }
 0x93c   :  { %1208 = vadd.xlane.f32.xlu0 %v1207_v29  ;;  %v1210_v30 = vsel %vm624_vm13, %v4551_v28, 0.0 }
 0x93d   :  { %1211 = vadd.xlane.f32.xlu1 %v1210_v30 }
 0x952   :  { %4479 = vrot.lane.b32.xlu0 %v5237_v25, %s4908_s1 }
 0x9c9   :  { %v1209_v34 = vpop.xlane.xlu0 %1208 }
 0x9ca   :  { %4552 = vrcp.f32 %v1209_v34  ;;  %v1212_v38 = vpop.xlane.xlu1 %1211 }
 0x9cb   :  { %4554 = vrcp.f32 %v1212_v38 }
 0x9cd   :  { %v4480_v37 = vpop.permute.xlu0 %4479 }
 0x9ce   :  { %v4482_v39 = vunpack.i.h.bf16 %v4480_v37  ;;  %v4481_v40 = vunpack.i.l.bf16 %v4480_v37 }
 0x9d0   :  { %v4291_v45 = vpack.c.bf16 %v4482_v39, %v4481_v40 }
 0x9d4   :  { %v4553_v49 = vpop.eup %4552 }
 0x9d5   :  { %v4038_v41 = vpop.f32.mrb[2].mxu0  ;;  %v4555_v52 = vpop.eup %4554  ;;  %v1214_v53 = vmul.f32 %v4553_v49, %v4549_v27 }
 0x9d6   :  { %v929_v42 = vpop.f32.mrb[3].mxu0  ;;  %v4074_v43 = vpop.f32.mrb[10].mxu1 }
 0x9d7   :  { %4041 = vmatprep.mubr.msk.f32.mxu0 %vm420_vm5, %v929_v42  ;;  %v1469_v44 = vpop.f32.mrb[11].mxu1  ;;  %v1479_v47 = vmul.f32 0.35355338, %v4074_v43  ;;  %v1730_v42 = vld [vmem:[%s5607_s14 + $0x8] sm:$0xff] }
 0x9d8   :  { %v1478_v46 = vmul.f32 0.35355338, %v1469_v44  ;;  %4042 = vmatmul.mubr.msk.f32.vlgmr.msra.gmra.mrb[4].mxu0 %vm420_vm5, %v4038_v41  ;;  %v1731_v44 = vld [vmem:[%s5607_s14 + $0x10] sm:$0xff] }
 0x9d9   :  { %4045 = vmatpush3.msra.mxu0 %v527_v33  ;;  %4046 = vmatprep.mubr.msk.f32.mxu0 %vm420_vm5, %v5299_v36  ;;  %v1481_v51 = vadd.f32 %v1479_v47, %v5259_v21  ;;  %v1216_v36 = vmul.f32 %v4555_v52, %v4551_v28 }
 0x9da   :  { %4292 = vmatprep.subr.bf16.mxu0 %v4291_v45  ;;  %v1480_v48 = vadd.f32 %v1478_v46, %v5261_v50 }
 0x9db   :  { %v1485_v54 = vsel %vm624_vm13, %v1481_v51, -inf }
 0x9dc   :  { %v1482_v1 = vsel %vm624_vm13, %v1480_v48, -inf }
 0x9dd   :  { %1483 = vmax.xlane.f32.xlu1 %v1482_v1 }
 0x9e0   :  { %4047 = vmatmul.mubr.msk.f32.vlgmr.msra.gmra.mrb[4].mxu0 %vm420_vm5, %v5297_v35 }
 0x9e1   :  { %4294 = vmatpush3.bf16.msra.mxu0 %v4291_v45  ;;  %4060 = vmatprep.mubr.msk.f32.mxu0 %vm624_vm13, %v1214_v53  ;;  %v1732_v45 = vld [vmem:[%s5607_s14 + $0x18] sm:$0xff] }
 0x9e2   :  { %1486 = vmax.xlane.f32.xlu1 %v1485_v54  ;;  %4063 = vmatprep.subr.mxu0 %v529_v2  ;;  %v4309_v46 = vpack.c.bf16 %v1732_v45, %v1731_v44  ;;  %v3767_v54 = vld [vmem:[%s5605_s12] ss:$0 sm:$0xff] }
 0x9e4   :  { %4061 = vmatmul.mubr.msk.f32.vlgmr.msra.gmra.mrb[6].mxu0 %vm624_vm13, %v1216_v36 }
 0x9e5   :  { %4064 = vmatpush3.msra.mxu0 %v529_v2  ;;  %v3768_v2 = vld [vmem:[%s5606_s13] ss:$0 sm:$0xff] }
 0xa6a   :  { %v1484_v55 = vpop.xlane.xlu1 %1483 }
 0xa6b   :  { %v1488_v56 = vsub.f32 %v1480_v48, %v1484_v55 }
 0xa6d   :  { %v1490_v59 = vmul.f32 1.442695, %v1488_v56 }
 0xa6f   :  { %v1487_v57 = vpop.xlane.xlu1 %1486 }
 0xa70   :  { %v1489_v58 = vsub.f32 %v1481_v51, %v1487_v57 }
 0xa72   :  { %v1492_v60 = vmul.f32 1.442695, %v1489_v58 }
 0xa74   :  { %4556 = vpow2.f32 %v1492_v60 }
 0xa75   :  { %4558 = vpow2.f32 %v1490_v59 }
 0xa7e   :  { %v4557_v35 = vpop.eup %4556 }
 0xa7f   :  { %v1497_v61 = vsel %vm624_vm13, %v4557_v35, 0.0  ;;  %v4559_v24 = vpop.eup %4558 }
 0xa80   :  { %1498 = vadd.xlane.f32.xlu1 %v1497_v61  ;;  %v1494_v62 = vsel %vm624_vm13, %v4559_v24, 0.0  ;;  %v1876_v61 = vld [vmem:[#allocation16 + $0x8] sm:$0xff] }
 0xa84   :  { %1495 = vadd.xlane.f32.xlu1 %v1494_v62  ;;  %v1877_v62 = vld [vmem:[#allocation16 + $0x10] sm:$0xff] }
 0xa95   :  { %4484 = vrot.lane.b32.xlu1 %v5237_v25, %s4909_s2 }
 0xab7   :  { %v4062_v63 = vpop.f32.mrb[6].mxu0 }
 0xab8   :  { %v1295_v0 = vpop.f32.mrb[7].mxu0 }
 0xab9   :  { %4065 = vmatprep.mubr.msk.f32.mxu0 %vm420_vm5, %v1295_v0 }
 0xaba   :  { %4066 = vmatmul.mubr.msk.f32.vlgmr.msra.gmra.mrb[4].mxu0 %vm420_vm5, %v4062_v63  ;;  %v1878_v63 = vld [vmem:[#allocation16 + $0x18] sm:$0xff] }
 0xabb   :  { %v4317_v0 = vpack.c.bf16 %v1878_v63, %v1877_v62 }
 0xb0d   :  { %v1499_v3 = vpop.xlane.xlu1 %1498 }
 0xb0e   :  { %4560 = vrcp.f32 %v1499_v3  ;;  %v1879_v3 = vld [vmem:[#allocation16 + $0x20] sm:$0xff] }
 0xb11   :  { %v1496_v20 = vpop.xlane.xlu1 %1495 }
 0xb12   :  { %4562 = vrcp.f32 %v1496_v20  ;;  %v1880_v20 = vld [vmem:[#allocation16 + $0x28] sm:$0xff] }
 0xb15   :  { %v4485_v4 = vpop.permute.xlu1 %4484 }
 0xb16   :  { %v4487_v5 = vunpack.i.h.bf16 %v4485_v4  ;;  %v4486_v6 = vunpack.i.l.bf16 %v4485_v4  ;;  %v4321_v4 = vpack.c.bf16 %v1880_v20, %v1879_v3 }
 0xb18   :  { %v4301_v7 = vpack.c.bf16 %v4487_v5, %v4486_v6  ;;  %v4561_v9 = vpop.eup %4560  ;;  %v1881_v5 = vld [vmem:[#allocation16 + $0x30] sm:$0xff]  ;;  %v1882_v6 = vld [vmem:[#allocation16 + $0x38] sm:$0xff] }
 0xb19   :  { %v1503_v11 = vmul.f32 %v4561_v9, %v4557_v35  ;;  %v1875_v35 = vld [vmem:[#allocation16] sm:$0xff] }
 0xb1a   :  { %4302 = vmatprep.subr.bf16.mxu0 %v4301_v7 }
 0xb1b   :  { %4304 = vmatpush3.bf16.msra.mxu0 %v4301_v7  ;;  %v4325_v7 = vpack.c.bf16 %v1882_v6, %v1881_v5  ;;  %v3772_v5 = vld [vmem:[%s5610_s17] ss:$0 sm:$0xff] }
 0xb1c   :  { %v4563_v10 = vpop.eup %4562  ;;  %4082 = vmatprep.subr.mxu0 %v530_v8 }
 0xb1d   :  { %v1501_v25 = vmul.f32 %v4563_v10, %v4559_v24  ;;  %v4313_v24 = vpack.c.bf16 %v1876_v61, %v1875_v35 }
 0xb1f   :  { %4079 = vmatprep.mubr.msk.f32.mxu0 %vm624_vm13, %v1501_v25 }
 0xb20   :  { %4080 = vmatmul.mubr.msk.f32.vlgmr.msra.gmra.mrb[8].mxu0 %vm624_vm13, %v1503_v11 }
 0xb21   :  { %4083 = vmatpush3.msra.mxu0 %v530_v8  ;;  %v3769_v8 = vld [vmem:[%s5608_s15] ss:$0 sm:$0xff] }
 0xb22   :  { %4314 = vmatprep.subr.bf16.mxu0 %v4313_v24 }
 0xbf3   :  { %v4081_v12 = vpop.f32.mrb[8].mxu0 }
 0xbf4   :  { %v1582_v13 = vpop.f32.mrb[9].mxu0 }
 0xbf5   :  { %4084 = vmatprep.mubr.msk.f32.mxu0 %vm420_vm5, %v1582_v13 }
 0xbf6   :  { %4085 = vmatmul.mubr.msk.f32.vlgmr.msra.gmra.mrb[4].mxu0 %vm420_vm5, %v4081_v12 }
 0xbf7   :  { %4316 = vmatpush3.bf16.msra.mxu0 %v4313_v24 }
 0xbf8   :  { %4318 = vmatprep.subr.bf16.mxu0 %v4317_v0 }
 0xbfb   :  { %4320 = vmatpush3.bf16.msra.mxu0 %v4317_v0 }
 0xbfc   :  { %4322 = vmatprep.subr.bf16.mxu0 %v4321_v4 }
 0xbff   :  { %4324 = vmatpush3.bf16.msra.mxu0 %v4321_v4 }
 0xc00   :  { %4326 = vmatprep.subr.bf16.mxu0 %v4325_v7 }
 0xc03   :  { %4328 = vmatpush3.bf16.msra.mxu0 %v4325_v7 }
 0xcc9   :  { %v4086_v16 = vpop.f32.mrb[4].mxu0 }
 0xcca   :  { %v1682_v18 = vadd.f32 %v4086_v16, %v3766_v14  ;;  %v1663_v19 = vpop.f32.mrb[5].mxu0 }
 0xccb   :  { %v1681_v22 = vadd.f32 %v3766_v14, %v1663_v19 }
 0xccc   :  { %v1684_v26 = vadd.f32 %v1682_v18, %v5222_v17 }
 0xccd   :  { %v1683_v27 = vadd.f32 %v1681_v22, %v5218_v15  ;;  %v1729_v15 = vld [vmem:[%s5607_s14] sm:$0xff] }
 0xcce   :  { %v1690_v28 = vsel %vm359_vm4, %v1684_v26, 0.0  ;;  %v4305_v43 = vpack.c.bf16 %v1730_v42, %v1729_v15 }
 0xccf   :  { %1691 = vadd.xlane.f32.xlu1 %v1690_v28  ;;  %v1687_v29 = vsel %vm359_vm4, %v1683_v27, 0.0 }
 0xcd0   :  { %1688 = vadd.xlane.f32.xlu0 %v1687_v29  ;;  %4306 = vmatprep.subr.bf16.mxu1 %v4305_v43 }
 0xcd1   :  { %4308 = vmatpush3.bf16.msra.mxu1 %v4305_v43 }
 0xcd2   :  { %4310 = vmatprep.subr.bf16.mxu1 %v4309_v46 }
 0xcd5   :  { %4312 = vmatpush3.bf16.msra.mxu1 %v4309_v46 }
 0xd5c   :  { %v1692_v30 = vpop.xlane.xlu1 %1691 }
 0xd5d   :  { %v1694_v31 = vmul.f32 0.03125, %v1692_v30  ;;  %v1689_v33 = vpop.xlane.xlu0 %1688 }
 0xd5e   :  { %v1693_v34 = vmul.f32 0.03125, %v1689_v33 }
 0xd5f   :  { %v1696_v37 = vsub.f32 %v1684_v26, %v1694_v31 }
 0xd60   :  { %v1695_v38 = vsub.f32 %v1683_v27, %v1693_v34 }
 0xd61   :  { %v1698_v41 = vmul.f32 %v1696_v37, %v1696_v37 }
 0xd62   :  { %v1697_v39 = vmul.f32 %v1695_v38, %v1695_v38 }
 0xd63   :  { %v1702_v17 = vsel %vm359_vm4, %v1698_v41, 0.0 }
 0xd64   :  { %v1699_v40 = vsel %vm359_vm4, %v1697_v39, 0.0 }
 0xd65   :  { %1700 = vadd.xlane.f32.xlu0 %v1699_v40 }
 0xd69   :  { %1703 = vadd.xlane.f32.xlu0 %v1702_v17 }
 0xdf2   :  { %v1701_v47 = vpop.xlane.xlu0 %1700 }
 0xdf3   :  { %v1705_v48 = vmul.f32 0.03125, %v1701_v47 }
 0xdf5   :  { %v1707_v49 = vadd.f32 1e-12, %v1705_v48 }
 0xdf6   :  { %v1704_v1 = vpop.xlane.xlu0 %1703 }
 0xdf7   :  { %4564 = vrsqrt.f32 %v1707_v49  ;;  %v1706_v51 = vmul.f32 0.03125, %v1704_v1 }
 0xdf9   :  { %v1708_v52 = vadd.f32 1e-12, %v1706_v51 }
 0xdfb   :  { %4566 = vrsqrt.f32 %v1708_v52 }
 0xe01   :  { %v4565_v53 = vpop.eup %4564 }
 0xe02   :  { %v1711_v36 = vmul.f32 %v4565_v53, %v1695_v38 }
 0xe04   :  { %v1719_v55 = vmul.f32 %v3767_v54, %v1711_v36 }
 0xe05   :  { %v4567_v56 = vpop.eup %4566 }
 0xe06   :  { %v1712_v57 = vmul.f32 %v4567_v56, %v1696_v37  ;;  %v5380_v58 = vadd.f32 %v3768_v2, %v1719_v55 }
 0xe08   :  { %v1720_v59 = vmul.f32 %v3767_v54, %v1712_v57  ;;  %4095 = vmatprep.mubr.msk.f32.mxu1 %vm359_vm4, %v5380_v58 }
 0xe0a   :  { %v5384_v60 = vadd.f32 %v3768_v2, %v1720_v59 }
 0xe0c   :  { %4096 = vmatmul.mubr.msk.f32.vlgmr.msra.gmra.mrb[12].mxu1 %vm359_vm4, %v5384_v60 }
 0xedf   :  { %v4097_v9 = vpop.f32.mrb[12].mxu1 }
 0xee0   :  { %v1818_v10 = vadd.f32 %v4097_v9, %v3769_v8  ;;  %v1812_v25 = vpop.f32.mrb[13].mxu1 }
 0xee1   :  { %v1813_v11 = vadd.f32 %v3769_v8, %v1812_v25 }
 0xee2   :  { %v1824_v12 = vmul.f32 0.70710677, %v1818_v10  ;;  %v1822_v3 = vmul.f32 0.5, %v1818_v10 }
 0xee3   :  { %v1823_v13 = vmul.f32 0.70710677, %v1813_v11  ;;  %v1821_v63 = vmul.f32 0.5, %v1813_v11 }
 0xee4   :  { %v1826_v14 = vand.u32 2147483647, %v1824_v12  ;;  %vm1866_vm14 = vcmp.lt.f32.partialorder %v1824_v12, 0.0 }
 0xee5   :  { %v1825_v16 = vand.u32 2147483647, %v1823_v13  ;;  %vm1865_vm15 = vcmp.lt.f32.partialorder %v1823_v13, 0.0 }
 0xee6   :  { %v1828_v18 = vmul.f32 0.3275911, %v1826_v14  ;;  %v1854_v27 = vsub.f32 0.0, %v1826_v14 }
 0xee7   :  { %v1827_v19 = vmul.f32 0.3275911, %v1825_v16  ;;  %v1853_v28 = vsub.f32 0.0, %v1825_v16 }
 0xee8   :  { %v1830_v22 = vadd.f32 1.0, %v1828_v18  ;;  %v1856_v30 = vmul.f32 %v1854_v27, %v1826_v14 }
 0xee9   :  { %v1829_v26 = vadd.f32 1.0, %v1827_v19  ;;  %v1855_v34 = vmul.f32 %v1853_v28, %v1825_v16 }
 0xeea   :  { %4568 = vrcp.f32 %v1830_v22  ;;  %v1859_v39 = vmul.f32 1.442695, %v1856_v30 }
 0xeeb   :  { %4570 = vrcp.f32 %v1829_v26  ;;  %v1857_v17 = vmul.f32 1.442695, %v1855_v34 }
 0xeec   :  { %4572 = vpow2.f32 %v1859_v39 }
 0xeed   :  { %4574 = vpow2.f32 %v1857_v17 }
 0xef4   :  { %v4569_v29 = vpop.eup %4568 }
 0xef5   :  { %v4571_v31 = vpop.eup %4570  ;;  %v1836_v33 = vmul.f32 1.0614054, %v4569_v29 }
 0xef6   :  { %v1835_v37 = vmul.f32 1.0614054, %v4571_v31  ;;  %v4573_v53 = vpop.eup %4572 }
 0xef7   :  { %v1838_v38 = vadd.f32 -1.4531521, %v1836_v33  ;;  %v4575_v36 = vpop.eup %4574  ;;  %v2022_v33 = vld [vmem:[#allocation13 + $0x38] sm:$0xff] }
 0xef8   :  { %v1837_v40 = vadd.f32 -1.4531521, %v1835_v37 }
 0xef9   :  { %v1840_v41 = vmul.f32 %v4569_v29, %v1838_v38 }
 0xefa   :  { %v1839_v15 = vmul.f32 %v4571_v31, %v1837_v40 }
 0xefb   :  { %v1842_v42 = vadd.f32 1.4214138, %v1840_v41 }
 0xefc   :  { %v1841_v43 = vadd.f32 1.4214138, %v1839_v15 }
 0xefd   :  { %v1844_v44 = vmul.f32 %v4569_v29, %v1842_v42  ;;  %v3775_v42 = vld [vmem:[%s5611_s18] ss:$0 sm:$0xff] }
 0xefe   :  { %v1843_v45 = vmul.f32 %v4571_v31, %v1841_v43 }
 0xeff   :  { %v1846_v46 = vadd.f32 -0.28449672, %v1844_v44  ;;  %v3776_v44 = vld [vmem:[%s5643_s21] ss:$0 sm:$0xff] }
 0xf00   :  { %v1845_v47 = vadd.f32 -0.28449672, %v1843_v45 }
 0xf01   :  { %v1848_v48 = vmul.f32 %v4569_v29, %v1846_v46 }
 0xf02   :  { %v1847_v49 = vmul.f32 %v4571_v31, %v1845_v47 }
 0xf03   :  { %v1850_v1 = vadd.f32 0.2548296, %v1848_v48 }
 0xf04   :  { %v1849_v51 = vadd.f32 0.2548296, %v1847_v49 }
 0xf05   :  { %v1852_v52 = vmul.f32 %v4569_v29, %v1850_v1  ;;  %v2019_v29 = vld [vmem:[#allocation13 + $0x20] sm:$0xff] }
 0xf06   :  { %v1851_v54 = vmul.f32 %v4571_v31, %v1849_v51  ;;  %v2021_v31 = vld [vmem:[#allocation13 + $0x30] sm:$0xff] }
 0xf07   :  { %v1862_v2 = vmul.f32 %v4573_v53, %v1852_v52  ;;  %v4333_v34 = vpack.c.bf16 %v2022_v33, %v2021_v31  ;;  %v3778_v51 = vld [vmem:[%s5602_s9 + $0x1] ss:$0 sm:$0xff] }
 0xf08   :  { %v1861_v55 = vmul.f32 %v4575_v36, %v1851_v54 }
 0xf09   :  { %v1864_v56 = vsub.f32 1.0, %v1862_v2 }
 0xf0a   :  { %v1863_v57 = vsub.f32 1.0, %v1861_v55 }
 0xf0b   :  { %v1868_v59 = vsub.f32 0.0, %v1864_v56 }
 0xf0c   :  { %v1867_v35 = vsub.f32 0.0, %v1863_v57 }
 0xf0d   :  { %v1870_v61 = vsel %vm1866_vm14, %v1868_v59, %v1864_v56 }
 0xf0e   :  { %v1872_v24 = vadd.f32 1.0, %v1870_v61  ;;  %v1869_v62 = vsel %vm1865_vm15, %v1867_v35, %v1863_v57 }
 0xf0f   :  { %v1871_v0 = vadd.f32 1.0, %v1869_v62 }
 0xf10   :  { %v1874_v4 = vmul.f32 %v1872_v24, %v1822_v3 }
 0xf11   :  { %v1873_v20 = vmul.f32 %v1871_v0, %v1821_v63 }
 0xf13   :  { %4114 = vmatprep.mubr.msk.f32.mxu0 %vm1890_vm0, %v1873_v20 }
 0xf14   :  { %4115 = vmatmul.mubr.msk.f32.vlgmr.msra.gmra.mrb[10].mxu0 %vm1890_vm0, %v1874_v4 }
 0xfe7   :  { %v4116_v6 = vpop.f32.mrb[10].mxu0 }
 0xfe8   :  { %v1963_v7 = vpop.f32.mrb[11].mxu0  ;;  %v1969_v8 = vadd.f32 %v4116_v6, %v3772_v5 }
 0xfe9   :  { %v1964_v9 = vadd.f32 %v3772_v5, %v1963_v7 }
 0xfea   :  { %v1973_v10 = vadd.f32 %v1969_v8, %v5384_v60  ;;  %v2020_v60 = vld [vmem:[#allocation13 + $0x28] sm:$0xff] }
 0xfeb   :  { %v1972_v25 = vadd.f32 %v1964_v9, %v5380_v58  ;;  %v4329_v30 = vpack.c.bf16 %v2020_v60, %v2019_v29 }
 0xfec   :  { %v1979_v12 = vsel %vm359_vm4, %v1973_v10, 0.0 }
 0xfed   :  { %v1976_v11 = vsel %vm359_vm4, %v1972_v25, 0.0  ;;  %4330 = vmatprep.subr.bf16.mxu1 %v4329_v30 }
 0xfee   :  { %1977 = vadd.xlane.f32.xlu0 %v1976_v11  ;;  %4332 = vmatpush3.bf16.msra.mxu1 %v4329_v30 }
 0xfef   :  { %4334 = vmatprep.subr.bf16.mxu1 %v4333_v34 }
 0xff2   :  { %1980 = vadd.xlane.f32.xlu0 %v1979_v12  ;;  %4336 = vmatpush3.bf16.msra.mxu1 %v4333_v34 }
0x107b   :  { %v1978_v13 = vpop.xlane.xlu0 %1977 }
0x107c   :  { %v1982_v14 = vmul.f32 0.03125, %v1978_v13 }
0x107e   :  { %v1984_v16 = vsub.f32 %v1972_v25, %v1982_v14 }
0x107f   :  { %v1981_v18 = vpop.xlane.xlu0 %1980 }
0x1080   :  { %v1983_v19 = vmul.f32 0.03125, %v1981_v18  ;;  %v1986_v22 = vmul.f32 %v1984_v16, %v1984_v16 }
0x1082   :  { %v1985_v26 = vsub.f32 %v1973_v10, %v1983_v19  ;;  %v1988_v27 = vsel %vm359_vm4, %v1986_v22, 0.0 }
0x1083   :  { %1989 = vadd.xlane.f32.xlu0 %v1988_v27 }
0x1084   :  { %v1987_v28 = vmul.f32 %v1985_v26, %v1985_v26 }
0x1086   :  { %v1991_v58 = vsel %vm359_vm4, %v1987_v28, 0.0 }
0x1087   :  { %1992 = vadd.xlane.f32.xlu1 %v1991_v58 }
0x1110   :  { %v1990_v37 = vpop.xlane.xlu0 %1989 }
0x1111   :  { %v1994_v38 = vmul.f32 0.03125, %v1990_v37 }
0x1113   :  { %v1996_v39 = vadd.f32 1e-12, %v1994_v38 }
0x1114   :  { %v1993_v40 = vpop.xlane.xlu1 %1992 }
0x1115   :  { %4576 = vrsqrt.f32 %v1996_v39  ;;  %v1995_v41 = vmul.f32 0.03125, %v1993_v40 }
0x1117   :  { %v1997_v17 = vadd.f32 1e-12, %v1995_v41 }
0x1119   :  { %4578 = vrsqrt.f32 %v1997_v17 }
0x111f   :  { %v4577_v15 = vpop.eup %4576 }
0x1120   :  { %v2000_v43 = vmul.f32 %v4577_v15, %v1984_v16 }
0x1122   :  { %v2008_v45 = vmul.f32 %v3775_v42, %v2000_v43 }
0x1123   :  { %v4579_v46 = vpop.eup %4578 }
0x1124   :  { %v2001_v47 = vmul.f32 %v4579_v46, %v1985_v26  ;;  %v5408_v48 = vadd.f32 %v3776_v44, %v2008_v45 }
0x1126   :  { %v2009_v49 = vmul.f32 %v3775_v42, %v2001_v47  ;;  %4125 = vmatprep.mubr.msk.f32.mxu1 %vm359_vm4, %v5408_v48 }
0x1128   :  { %v5412_v1 = vadd.f32 %v3776_v44, %v2009_v49 }
0x112a   :  { %4126 = vmatmul.mubr.msk.f32.vlgmr.msra.gmra.mrb[14].mxu1 %vm359_vm4, %v5412_v1 }
0x11fd   :  { %v4127_v52 = vpop.f32.mrb[14].mxu1 }
0x11fe   :  { %v5419_v53 = vadd.f32 %v4127_v52, %v3778_v51  ;;  %v2103_v54 = vpop.f32.mrb[15].mxu1 }
0x11ff   :  { %v5421_v36 = vadd.f32 %v3778_v51, %v2103_v54 }
0x1201   :  { %4132 = vmatprep.mubr.msk.f32.mxu1 %vm420_vm5, %v5421_v36  ;;  %v5427_v2 = vpack.i.bf16 %v5419_v53, %v5421_v36 }
0x1203   :  { %4494 = vrot.lane.b32.xlu1 %v5427_v2, %s4902_s8  ;;  %4489 = vrot.lane.b32.xlu0 %v5427_v2, %s4897_s7 }
0x1207   :  { %2319 = vrot.lane.b32.xlu1 %v5421_v36, %s4901_s24  ;;  %2321 = vrot.lane.b32.xlu0 %v5419_v53, %s4901_s24 }
0x120b   :  { %4499 = vrot.lane.b32.xlu1 %v5427_v2, %s4904_s3  ;;  %2685 = vrot.lane.b32.xlu0 %v5421_v36, %s4903_s0 }
0x120f   :  { %2687 = vrot.lane.b32.xlu1 %v5419_v53, %s4903_s0 }
0x1275   :  { %v4495_v55 = vpop.permute.xlu1 %4494  ;;  %v4490_v56 = vpop.permute.xlu0 %4489 }
0x1276   :  { %v4497_v57 = vunpack.i.h.bf16 %v4495_v55  ;;  %v4496_v59 = vunpack.i.l.bf16 %v4495_v55  ;;  %v4492_v35 = vunpack.i.h.bf16 %v4490_v56  ;;  %v4491_v61 = vunpack.i.l.bf16 %v4490_v56 }
0x1278   :  { %v4337_v24 = vpack.c.bf16 %v4492_v35, %v4491_v61  ;;  %v4347_v63 = vpack.c.bf16 %v4497_v57, %v4496_v59 }
0x1279   :  { %v2320_v62 = vpop.permute.xlu1 %2319  ;;  %v2322_v5 = vpop.permute.xlu0 %2321 }
0x127a   :  { %4339 = vmatprep.subr.msk.bf16.mxu1 %vm5244_vm6, %v4337_v24 }
0x127b   :  { %4342 = vmatpush3.bf16.xpose.msk.msra.mxu1 %vm5244_vm6, %v4337_v24 }
0x127c   :  { %4349 = vmatprep.subr.msk.bf16.mxu1 %vm5244_vm6, %v4347_v63 }
0x127d   :  { %v4500_v0 = vpop.permute.xlu1 %4499  ;;  %v2686_v6 = vpop.permute.xlu0 %2685 }
0x127e   :  { %v4502_v3 = vunpack.i.h.bf16 %v4500_v0  ;;  %v4501_v20 = vunpack.i.l.bf16 %v4500_v0 }
0x1280   :  { %v4357_v4 = vpack.c.bf16 %v4502_v3, %v4501_v20 }
0x1281   :  { %v2688_v7 = vpop.permute.xlu1 %2687 }
0x1282   :  { %4133 = vmatmul.mubr.msk.f32.vlgmr.msra.gmra.mrb[16].mxu1 %vm420_vm5, %v5419_v53 }
0x1283   :  { %4352 = vmatpush3.bf16.xpose.msk.msra.mxu1 %vm5244_vm6, %v4347_v63  ;;  %4146 = vmatprep.mubr.msk.f32.mxu1 %vm420_vm5, %v2320_v62 }
0x1284   :  { %4359 = vmatprep.subr.msk.bf16.mxu1 %vm5244_vm6, %v4357_v4 }
0x128a   :  { %4147 = vmatmul.mubr.msk.f32.vlgmr.msra.gmra.mrb[18].mxu1 %vm420_vm5, %v2322_v5 }
0x128b   :  { %4362 = vmatpush3.bf16.xpose.msk.msra.mxu1 %vm5244_vm6, %v4357_v4  ;;  %4170 = vmatprep.mubr.msk.f32.mxu1 %vm420_vm5, %v2686_v6 }
0x1292   :  { %4171 = vmatmul.mubr.msk.f32.vlgmr.msra.gmra.mrb[20].mxu1 %vm420_vm5, %v2688_v7 }
0x1355   :  { %v4134_v8 = vpop.f32.mrb[16].mxu1 }
0x1356   :  { %v2207_v9 = vmul.f32 0.35355338, %v4134_v8  ;;  %v2197_v25 = vpop.f32.mrb[17].mxu1 }
0x1357   :  { %v2206_v11 = vmul.f32 0.35355338, %v2197_v25 }
0x1358   :  { %v2209_v10 = vadd.f32 %v2207_v9, %v5259_v21 }
0x1359   :  { %v2208_v12 = vadd.f32 %v2206_v11, %v5261_v50 }
0x135a   :  { %v2213_v13 = vsel %vm624_vm13, %v2209_v10, -inf }
0x135b   :  { %2214 = vmax.xlane.f32.xlu1 %v2213_v13  ;;  %v2210_v14 = vsel %vm624_vm13, %v2208_v12, -inf }
0x135c   :  { %2211 = vmax.xlane.f32.xlu0 %v2210_v14 }
0x135d   :  { %v4148_v16 = vpop.f32.mrb[18].mxu1 }
0x135e   :  { %v2401_v18 = vpop.f32.mrb[19].mxu1  ;;  %v2411_v19 = vmul.f32 0.35355338, %v4148_v16 }
0x135f   :  { %v2410_v22 = vmul.f32 0.35355338, %v2401_v18 }
0x1360   :  { %v2413_v28 = vadd.f32 %v2411_v19, %v5259_v21 }
0x1361   :  { %v2412_v26 = vadd.f32 %v2410_v22, %v5261_v50 }
0x1362   :  { %v2417_v60 = vsel %vm624_vm13, %v2413_v28, -inf }
0x1363   :  { %v2414_v27 = vsel %vm624_vm13, %v2412_v26, -inf }
0x1364   :  { %2415 = vmax.xlane.f32.xlu0 %v2414_v27 }
0x1365   :  { %v4172_v58 = vpop.f32.mrb[20].mxu1 }
0x1366   :  { %v2767_v29 = vpop.f32.mrb[21].mxu1  ;;  %v2777_v54 = vmul.f32 0.35355338, %v4172_v58 }
0x1367   :  { %v2776_v55 = vmul.f32 0.35355338, %v2767_v29 }
0x1368   :  { %2418 = vmax.xlane.f32.xlu0 %v2417_v60  ;;  %v2779_v57 = vadd.f32 %v2777_v54, %v5259_v21 }
0x1369   :  { %v2778_v56 = vadd.f32 %v2776_v55, %v5261_v50 }
0x136a   :  { %v2783_v35 = vsel %vm624_vm13, %v2779_v57, -inf }
0x136b   :  { %v2780_v59 = vsel %vm624_vm13, %v2778_v56, -inf }
0x13e8   :  { %v2215_v30 = vpop.xlane.xlu1 %2214 }
0x13e9   :  { %v2217_v31 = vsub.f32 %v2209_v10, %v2215_v30  ;;  %v2212_v33 = vpop.xlane.xlu0 %2211 }
0x13ea   :  { %v2216_v34 = vsub.f32 %v2208_v12, %v2212_v33 }
0x13eb   :  { %v2220_v37 = vmul.f32 1.442695, %v2217_v31 }
0x13ec   :  { %v2218_v38 = vmul.f32 1.442695, %v2216_v34 }
0x13ed   :  { %4580 = vpow2.f32 %v2220_v37  ;;  %v2114_v37 = vld [vmem:[#allocation14 + $0x28] sm:$0xff] }
0x13ee   :  { %4582 = vpow2.f32 %v2218_v38  ;;  %v2113_v38 = vld [vmem:[#allocation14 + $0x20] sm:$0xff] }
0x13f1   :  { %v2416_v39 = vpop.xlane.xlu0 %2415 }
0x13f2   :  { %v2420_v40 = vsub.f32 %v2412_v26, %v2416_v39 }
0x13f4   :  { %v2422_v41 = vmul.f32 1.442695, %v2420_v40 }
0x13f5   :  { %v2419_v17 = vpop.xlane.xlu0 %2418 }
0x13f6   :  { %4584 = vpow2.f32 %v2422_v41  ;;  %v2421_v15 = vsub.f32 %v2413_v28, %v2419_v17 }
0x13f7   :  { %v4581_v42 = vpop.eup %4580 }
0x13f8   :  { %v4583_v43 = vpop.eup %4582  ;;  %v2424_v44 = vmul.f32 1.442695, %v2421_v15  ;;  %v2225_v45 = vsel %vm624_vm13, %v4581_v42, 0.0 }
0x13f9   :  { %2226 = vadd.xlane.f32.xlu0 %v2225_v45  ;;  %v2222_v46 = vsel %vm624_vm13, %v4583_v43, 0.0 }
0x13fa   :  { %4586 = vpow2.f32 %v2424_v44  ;;  %2223 = vadd.xlane.f32.xlu1 %v2222_v46 }
0x1400   :  { %v4585_v47 = vpop.eup %4584 }
0x1401   :  { %v2426_v49 = vsel %vm624_vm13, %v4585_v47, 0.0 }
0x1402   :  { %2427 = vadd.xlane.f32.xlu1 %v2426_v49 }
0x1404   :  { %v4587_v51 = vpop.eup %4586 }
0x1405   :  { %v2429_v52 = vsel %vm624_vm13, %v4587_v51, 0.0 }
0x1406   :  { %2430 = vadd.xlane.f32.xlu0 %v2429_v52 }
0x1413   :  { %4504 = vrot.lane.b32.xlu1 %v5427_v2, %s4900_s23 }
0x1417   :  { %4514 = vrot.lane.b32.xlu1 %v5427_v2, %s4905_s30 }
0x141b   :  { %2972 = vrot.lane.b32.xlu1 %v5421_v36, %s4906_s26 }
0x141c   :  { %4509 = vrot.lane.b32.xlu0 %v5427_v2, %s4907_s5 }
0x1420   :  { %2974 = vrot.lane.b32.xlu0 %v5419_v53, %s4906_s26 }
0x143f   :  { %2781 = vmax.xlane.f32.xlu1 %v2780_v59  ;;  %2784 = vmax.xlane.f32.xlu0 %v2783_v35 }
0x1486   :  { %v2227_v36 = vpop.xlane.xlu0 %2226 }
0x1487   :  { %v2224_v61 = vpop.xlane.xlu1 %2223 }
0x1488   :  { %4588 = vrcp.f32 %v2224_v61 }
0x1489   :  { %4590 = vrcp.f32 %v2227_v36 }
0x148f   :  { %v2428_v24 = vpop.xlane.xlu1 %2427 }
0x1490   :  { %4592 = vrcp.f32 %v2428_v24  ;;  %v2115_v24 = vld [vmem:[#allocation14 + $0x30] sm:$0xff] }
0x1492   :  { %v4589_v62 = vpop.eup %4588 }
0x1493   :  { %v4505_v53 = vpop.permute.xlu1 %4504  ;;  %v2431_v63 = vpop.xlane.xlu0 %2430  ;;  %v2229_v0 = vmul.f32 %v4589_v62, %v4583_v43 }
0x1494   :  { %v4507_v3 = vunpack.i.h.bf16 %v4505_v53  ;;  %v4506_v20 = vunpack.i.l.bf16 %v4505_v53  ;;  %4594 = vrcp.f32 %v2431_v63  ;;  %v4591_v5 = vpop.eup %4590 }
0x1495   :  { %4139 = vmatprep.mubr.msk.f32.mxu0 %vm624_vm13, %v2229_v0  ;;  %v2231_v12 = vmul.f32 %v4591_v5, %v4581_v42 }
0x1496   :  { %v4343_v4 = vpack.c.bf16 %v4507_v3, %v4506_v20 }
0x1497   :  { %v4515_v6 = vpop.permute.xlu1 %4514  ;;  %v4510_v7 = vpop.permute.xlu0 %4509 }
0x1498   :  { %v4517_v8 = vunpack.i.h.bf16 %v4515_v6  ;;  %v4516_v9 = vunpack.i.l.bf16 %v4515_v6  ;;  %v4512_v25 = vunpack.i.h.bf16 %v4510_v7  ;;  %v4511_v11 = vunpack.i.l.bf16 %v4510_v7  ;;  %4344 = vmatprep.subr.bf16.mxu0 %v4343_v4 }
0x1499   :  { %4346 = vmatpush3.bf16.msra.mxu0 %v4343_v4 }
0x149a   :  { %v4593_v10 = vpop.eup %4592  ;;  %v4367_v13 = vpack.c.bf16 %v4517_v8, %v4516_v9  ;;  %v4353_v14 = vpack.c.bf16 %v4512_v25, %v4511_v11 }
0x149b   :  { %v2973_v16 = vpop.permute.xlu1 %2972  ;;  %v2433_v18 = vmul.f32 %v4593_v10, %v4585_v47  ;;  %v2975_v26 = vpop.permute.xlu0 %2974 }
0x149c   :  { %4140 = vmatmul.mubr.msk.f32.vlgmr.msra.gmra.mrb[12].mxu0 %vm624_vm13, %v2231_v12  ;;  %4354 = vmatprep.subr.bf16.mxu0 %v4353_v14 }
0x149d   :  { %4369 = vmatprep.subr.msk.bf16.mxu1 %vm5244_vm6, %v4367_v13  ;;  %4189 = vmatprep.mubr.msk.f32.mxu1 %vm420_vm5, %v2973_v16 }
0x149e   :  { %v4595_v19 = vpop.eup %4594  ;;  %4356 = vmatpush3.bf16.msra.mxu0 %v4353_v14  ;;  %4153 = vmatprep.mubr.msk.f32.mxu0 %vm624_vm13, %v2433_v18 }
0x149f   :  { %v2435_v22 = vmul.f32 %v4595_v19, %v4587_v51  ;;  %4372 = vmatpush3.bf16.xpose.msk.msra.mxu1 %vm5244_vm6, %v4367_v13  ;;  %4156 = vmatprep.subr.mxu0 %v2114_v37  ;;  %v2116_v13 = vld [vmem:[#allocation14 + $0x38] sm:$0xff]  ;;  %vm3700_vm6 = vcmask 41984  }
0x14a1   :  { %4154 = vmatmul.mubr.msk.f32.vlgmr.msra.gmra.mrb[14].mxu0 %vm624_vm13, %v2435_v22 }
0x14a2   :  { %4157 = vmatpush3.msra.mxu0 %v2114_v37 }
0x14a3   :  { %4161 = vmatprep.subr.mxu0 %v2113_v38 }
0x14a6   :  { %4190 = vmatmul.mubr.msk.f32.vlgmr.msra.gmra.mrb[22].mxu1 %vm420_vm5, %v2975_v26  ;;  %v3814_v26 = vld [vmem:[%s5604_s11 + $0x1] ss:$0 sm:$0xff] }
0x14cc   :  { %v2782_v27 = vpop.xlane.xlu1 %2781  ;;  %v2785_v28 = vpop.xlane.xlu0 %2784 }
0x14cd   :  { %v2786_v58 = vsub.f32 %v2778_v56, %v2782_v27  ;;  %v2787_v29 = vsub.f32 %v2779_v57, %v2785_v28 }
0x14cf   :  { %v2788_v60 = vmul.f32 1.442695, %v2786_v58  ;;  %v2790_v30 = vmul.f32 1.442695, %v2787_v29 }
0x14d1   :  { %4596 = vpow2.f32 %v2788_v60 }
0x14d2   :  { %4598 = vpow2.f32 %v2790_v30 }
0x14db   :  { %v4597_v31 = vpop.eup %4596 }
0x14dc   :  { %v4599_v33 = vpop.eup %4598  ;;  %v2792_v34 = vsel %vm624_vm13, %v4597_v31, 0.0 }
0x14dd   :  { %2793 = vadd.xlane.f32.xlu0 %v2792_v34  ;;  %v2795_v32 = vsel %vm624_vm13, %v4599_v33, 0.0 }
0x14de   :  { %2796 = vadd.xlane.f32.xlu1 %v2795_v32 }
0x14f3   :  { %4519 = vrot.lane.b32.xlu0 %v5427_v2, %s4908_s1 }
0x156a   :  { %v2794_v39 = vpop.xlane.xlu0 %2793 }
0x156b   :  { %v2797_v15 = vpop.xlane.xlu1 %2796  ;;  %4600 = vrcp.f32 %v2794_v39 }
0x156c   :  { %4602 = vrcp.f32 %v2797_v15 }
0x156e   :  { %v4520_v41 = vpop.permute.xlu0 %4519 }
0x156f   :  { %v4141_v40 = vpop.f32.mrb[12].mxu0  ;;  %v4522_v42 = vunpack.i.h.bf16 %v4520_v41  ;;  %v4521_v43 = vunpack.i.l.bf16 %v4520_v41 }
0x1570   :  { %v2310_v17 = vpop.f32.mrb[13].mxu0 }
0x1571   :  { %v4363_v46 = vpack.c.bf16 %v4522_v42, %v4521_v43  ;;  %v3820_v42 = vld [vmem:[%s5607_s14 + $0x28] sm:$0xff] }
0x1574   :  { %v4155_v44 = vpop.f32.mrb[14].mxu0 }
0x1575   :  { %v2514_v45 = vpop.f32.mrb[15].mxu0  ;;  %v4601_v54 = vpop.eup %4600 }
0x1576   :  { %4158 = vmatprep.mubr.msk.f32.mxu0 %vm420_vm5, %v2514_v45  ;;  %v4603_v56 = vpop.eup %4602  ;;  %v2799_v59 = vmul.f32 %v4601_v54, %v4597_v31  ;;  %v3822_v45 = vld [vmem:[%s5607_s14 + $0x38] sm:$0xff] }
0x1577   :  { %4159 = vmatmul.mubr.msk.f32.vlgmr.msra.gmra.mrb[16].mxu0 %vm420_vm5, %v4155_v44  ;;  %v2801_v61 = vmul.f32 %v4603_v56, %v4599_v33  ;;  %v3821_v44 = vld [vmem:[%s5607_s14 + $0x30] sm:$0xff] }
0x1578   :  { %4162 = vmatpush3.msra.mxu0 %v2113_v38  ;;  %4163 = vmatprep.mubr.msk.f32.mxu0 %vm420_vm5, %v2310_v17 }
0x1579   :  { %v4191_v47 = vpop.f32.mrb[22].mxu1  ;;  %4364 = vmatprep.subr.bf16.mxu0 %v4363_v46 }
0x157a   :  { %v3054_v49 = vpop.f32.mrb[23].mxu1  ;;  %v3064_v51 = vmul.f32 0.35355338, %v4191_v47 }
0x157b   :  { %v3063_v52 = vmul.f32 0.35355338, %v3054_v49 }
0x157c   :  { %v3066_v35 = vadd.f32 %v3064_v51, %v5259_v21 }
0x157d   :  { %v3065_v55 = vadd.f32 %v3063_v52, %v5261_v50 }
0x157e   :  { %v3070_v36 = vsel %vm624_vm13, %v3066_v35, -inf }
0x157f   :  { %v3067_v57 = vsel %vm624_vm13, %v3065_v55, -inf  ;;  %4164 = vmatmul.mubr.msk.f32.vlgmr.msra.gmra.mrb[16].mxu0 %vm420_vm5, %v4141_v40 }
0x1580   :  { %3068 = vmax.xlane.f32.xlu1 %v3067_v57  ;;  %4366 = vmatpush3.bf16.msra.mxu0 %v4363_v46  ;;  %v4381_v46 = vpack.c.bf16 %v3822_v45, %v3821_v44  ;;  %v3817_v57 = vld [vmem:[%s5605_s12 + $0x1] ss:$0 sm:$0xff] }
0x1581   :  { %4177 = vmatprep.mubr.msk.f32.mxu0 %vm624_vm13, %v2799_v59  ;;  %4180 = vmatprep.subr.mxu0 %v2115_v24 }
0x1583   :  { %4178 = vmatmul.mubr.msk.f32.vlgmr.msra.gmra.mrb[18].mxu0 %vm624_vm13, %v2801_v61 }
0x1584   :  { %3071 = vmax.xlane.f32.xlu1 %v3070_v36  ;;  %4181 = vmatpush3.msra.mxu0 %v2115_v24 }
0x160d   :  { %v3069_v50 = vpop.xlane.xlu1 %3068 }
0x160e   :  { %v3073_v62 = vsub.f32 %v3065_v55, %v3069_v50 }
0x1610   :  { %v3075_v0 = vmul.f32 1.442695, %v3073_v62 }
0x1611   :  { %v3072_v53 = vpop.xlane.xlu1 %3071 }
0x1612   :  { %v3074_v63 = vsub.f32 %v3066_v35, %v3072_v53  ;;  %v3818_v35 = vld [vmem:[%s5606_s13 + $0x1] ss:$0 sm:$0xff] }
0x1614   :  { %v3077_v3 = vmul.f32 1.442695, %v3074_v63  ;;  %v3466_v63 = vld [vmem:[#allocation16 + $0x40] sm:$0xff] }
0x1616   :  { %4604 = vpow2.f32 %v3077_v3 }
0x1617   :  { %4606 = vpow2.f32 %v3075_v0  ;;  %v3467_v0 = vld [vmem:[#allocation16 + $0x48] sm:$0xff] }
0x1618   :  { %v4385_v3 = vpack.c.bf16 %v3467_v0, %v3466_v63 }
0x1620   :  { %v4605_v21 = vpop.eup %4604 }
0x1621   :  { %v3082_v20 = vsel %vm624_vm13, %v4605_v21, 0.0  ;;  %v4607_v4 = vpop.eup %4606 }
0x1622   :  { %3083 = vadd.xlane.f32.xlu1 %v3082_v20  ;;  %v3079_v5 = vsel %vm624_vm13, %v4607_v4, 0.0  ;;  %v3469_v20 = vld [vmem:[#allocation16 + $0x58] sm:$0xff] }
0x1626   :  { %3080 = vadd.xlane.f32.xlu1 %v3079_v5  ;;  %v3470_v5 = vld [vmem:[#allocation16 + $0x60] sm:$0xff] }
0x1637   :  { %4524 = vrot.lane.b32.xlu1 %v5427_v2, %s4909_s2 }
0x1656   :  { %v4179_v6 = vpop.f32.mrb[18].mxu0 }
0x1657   :  { %v2880_v7 = vpop.f32.mrb[19].mxu0 }
0x1658   :  { %4182 = vmatprep.mubr.msk.f32.mxu0 %vm420_vm5, %v2880_v7 }
0x1659   :  { %4183 = vmatmul.mubr.msk.f32.vlgmr.msra.gmra.mrb[16].mxu0 %vm420_vm5, %v4179_v6  ;;  %v3471_v6 = vld [vmem:[#allocation16 + $0x68] sm:$0xff] }
0x165a   :  { %v4393_v7 = vpack.c.bf16 %v3471_v6, %v3470_v5  ;;  %v3828_v5 = vld [vmem:[%s5610_s17 + $0x1] ss:$0 sm:$0xff] }
0x16af   :  { %v3084_v8 = vpop.xlane.xlu1 %3083 }
0x16b0   :  { %4608 = vrcp.f32 %v3084_v8  ;;  %v3472_v8 = vld [vmem:[#allocation16 + $0x70] sm:$0xff] }
0x16b3   :  { %v3081_v9 = vpop.xlane.xlu1 %3080 }
0x16b4   :  { %4610 = vrcp.f32 %v3081_v9  ;;  %v3473_v9 = vld [vmem:[#allocation16 + $0x78] sm:$0xff] }
0x16b7   :  { %v4525_v25 = vpop.permute.xlu1 %4524 }
0x16b8   :  { %v4527_v11 = vunpack.i.h.bf16 %v4525_v25  ;;  %v4526_v10 = vunpack.i.l.bf16 %v4525_v25  ;;  %v4397_v25 = vpack.c.bf16 %v3473_v9, %v3472_v8 }
0x16ba   :  { %v4373_v12 = vpack.c.bf16 %v4527_v11, %v4526_v10  ;;  %v4609_v14 = vpop.eup %4608  ;;  %v3824_v11 = vld [vmem:[%s5608_s15 + $0x1] ss:$0 sm:$0xff] }
0x16bb   :  { %v3088_v18 = vmul.f32 %v4609_v14, %v4605_v21  ;;  %v3468_v21 = vld [vmem:[#allocation16 + $0x50] sm:$0xff] }
0x16bc   :  { %4374 = vmatprep.subr.bf16.mxu0 %v4373_v12 }
0x16bd   :  { %4376 = vmatpush3.bf16.msra.mxu0 %v4373_v12 }
0x16be   :  { %v4611_v16 = vpop.eup %4610  ;;  %4199 = vmatprep.subr.mxu0 %v2116_v13 }
0x16bf   :  { %v3086_v2 = vmul.f32 %v4611_v16, %v4607_v4  ;;  %v4389_v4 = vpack.c.bf16 %v3469_v20, %v3468_v21 }
0x16c1   :  { %4196 = vmatprep.mubr.msk.f32.mxu0 %vm624_vm13, %v3086_v2 }
0x16c2   :  { %4197 = vmatmul.mubr.msk.f32.vlgmr.msra.gmra.mrb[20].mxu0 %vm624_vm13, %v3088_v18 }
0x16c3   :  { %4200 = vmatpush3.msra.mxu0 %v2116_v13 }
0x16c4   :  { %4386 = vmatprep.subr.bf16.mxu0 %v4385_v3 }
0x1795   :  { %v4198_v19 = vpop.f32.mrb[20].mxu0 }
0x1796   :  { %v3167_v22 = vpop.f32.mrb[21].mxu0 }
0x1797   :  { %4201 = vmatprep.mubr.msk.f32.mxu0 %vm420_vm5, %v3167_v22 }
0x1798   :  { %4202 = vmatmul.mubr.msk.f32.vlgmr.msra.gmra.mrb[16].mxu0 %vm420_vm5, %v4198_v19  ;;  %vm3614_vm5 = vcmask 1040384  }
0x1799   :  { %4388 = vmatpush3.bf16.msra.mxu0 %v4385_v3 }
0x179a   :  { %4390 = vmatprep.subr.bf16.mxu0 %v4389_v4 }
0x179d   :  { %4392 = vmatpush3.bf16.msra.mxu0 %v4389_v4 }
0x179e   :  { %4394 = vmatprep.subr.bf16.mxu0 %v4393_v7 }
0x17a1   :  { %4396 = vmatpush3.bf16.msra.mxu0 %v4393_v7 }
0x17a2   :  { %4398 = vmatprep.subr.bf16.mxu0 %v4397_v25 }
0x17a5   :  { %4400 = vmatpush3.bf16.msra.mxu0 %v4397_v25 }
0x186b   :  { %v4203_v27 = vpop.f32.mrb[16].mxu0 }
0x186c   :  { %v3268_v28 = vadd.f32 %v4203_v27, %v3814_v26  ;;  %v3248_v58 = vpop.f32.mrb[17].mxu0 }
0x186d   :  { %v3267_v29 = vadd.f32 %v3814_v26, %v3248_v58 }
0x186e   :  { %v3270_v60 = vadd.f32 %v3268_v28, %v5412_v1 }
0x186f   :  { %v3269_v30 = vadd.f32 %v3267_v29, %v5408_v48  ;;  %v3819_v48 = vld [vmem:[%s5607_s14 + $0x20] sm:$0xff] }
0x1870   :  { %v3278_v31 = vsel %vm359_vm4, %v3270_v60, 0.0  ;;  %v4377_v43 = vpack.c.bf16 %v3820_v42, %v3819_v48 }
0x1871   :  { %3279 = vadd.xlane.f32.xlu1 %v3278_v31  ;;  %v3275_v33 = vsel %vm359_vm4, %v3269_v30, 0.0 }
0x1872   :  { %3276 = vadd.xlane.f32.xlu0 %v3275_v33  ;;  %4378 = vmatprep.subr.bf16.mxu1 %v4377_v43 }
0x1873   :  { %4380 = vmatpush3.bf16.msra.mxu1 %v4377_v43 }
0x1874   :  { %4382 = vmatprep.subr.bf16.mxu1 %v4381_v46 }
0x1877   :  { %4384 = vmatpush3.bf16.msra.mxu1 %v4381_v46 }
0x18fe   :  { %v3280_v34 = vpop.xlane.xlu1 %3279 }
0x18ff   :  { %v3282_v32 = vmul.f32 0.03125, %v3280_v34  ;;  %v3277_v37 = vpop.xlane.xlu0 %3276 }
0x1900   :  { %v3281_v38 = vmul.f32 0.03125, %v3277_v37 }
0x1901   :  { %v3284_v39 = vsub.f32 %v3270_v60, %v3282_v32 }
0x1902   :  { %v3283_v40 = vsub.f32 %v3269_v30, %v3281_v38 }
0x1903   :  { %v3286_v15 = vmul.f32 %v3284_v39, %v3284_v39 }
0x1904   :  { %v3285_v41 = vmul.f32 %v3283_v40, %v3283_v40 }
0x1905   :  { %v3290_v1 = vsel %vm359_vm4, %v3286_v15, 0.0 }
0x1906   :  { %v3287_v17 = vsel %vm359_vm4, %v3285_v41, 0.0 }
0x1907   :  { %3288 = vadd.xlane.f32.xlu0 %v3287_v17 }
0x190b   :  { %3291 = vadd.xlane.f32.xlu0 %v3290_v1 }
0x1994   :  { %v3289_v47 = vpop.xlane.xlu0 %3288 }
0x1995   :  { %v3293_v49 = vmul.f32 0.03125, %v3289_v47 }
0x1997   :  { %v3295_v51 = vadd.f32 1e-12, %v3293_v49 }
0x1998   :  { %v3292_v52 = vpop.xlane.xlu0 %3291 }
0x1999   :  { %4612 = vrsqrt.f32 %v3295_v51  ;;  %v3294_v54 = vmul.f32 0.03125, %v3292_v52 }
0x199b   :  { %v3296_v55 = vadd.f32 1e-12, %v3294_v54 }
0x199d   :  { %4614 = vrsqrt.f32 %v3296_v55 }
0x19a3   :  { %v4613_v56 = vpop.eup %4612 }
0x19a4   :  { %v3299_v59 = vmul.f32 %v4613_v56, %v3283_v40 }
0x19a6   :  { %v3307_v61 = vmul.f32 %v3817_v57, %v3299_v59 }
0x19a7   :  { %v4615_v36 = vpop.eup %4614 }
0x19a8   :  { %v3300_v24 = vmul.f32 %v4615_v36, %v3284_v39  ;;  %v5548_v50 = vadd.f32 %v3818_v35, %v3307_v61 }
0x19aa   :  { %v3308_v62 = vmul.f32 %v3817_v57, %v3300_v24  ;;  %4212 = vmatprep.mubr.msk.f32.mxu1 %vm359_vm4, %v5548_v50 }
0x19ac   :  { %v5552_v53 = vadd.f32 %v3818_v35, %v3308_v62 }
0x19ae   :  { %4213 = vmatmul.mubr.msk.f32.vlgmr.msra.gmra.mrb[24].mxu1 %vm359_vm4, %v5552_v53 }
0x19af   :  { %4242 = vmatprep.mubr.msk.f32.mxu1 %vm4911_vm3, %v4896_v23 }
0x1a81   :  { %v4214_v10 = vpop.f32.mrb[24].mxu1 }
0x1a82   :  { %v3408_v12 = vadd.f32 %v4214_v10, %v3824_v11  ;;  %v3402_v13 = vpop.f32.mrb[25].mxu1 }
0x1a83   :  { %v3403_v14 = vadd.f32 %v3824_v11, %v3402_v13 }
0x1a84   :  { %v3414_v16 = vmul.f32 0.70710677, %v3408_v12  ;;  %v3412_v21 = vmul.f32 0.5, %v3408_v12 }
0x1a85   :  { %v3413_v2 = vmul.f32 0.70710677, %v3403_v14  ;;  %v3411_v0 = vmul.f32 0.5, %v3403_v14 }
0x1a86   :  { %v3416_v18 = vand.u32 2147483647, %v3414_v16  ;;  %vm3456_vm1 = vcmp.lt.f32.partialorder %v3414_v16, 0.0 }
0x1a87   :  { %v3415_v19 = vand.u32 2147483647, %v3413_v2  ;;  %vm3455_vm2 = vcmp.lt.f32.partialorder %v3413_v2, 0.0 }
0x1a88   :  { %v3418_v22 = vmul.f32 0.3275911, %v3416_v18  ;;  %v3444_v58 = vsub.f32 0.0, %v3416_v18 }
0x1a89   :  { %v3417_v26 = vmul.f32 0.3275911, %v3415_v19  ;;  %v3443_v29 = vsub.f32 0.0, %v3415_v19 }
0x1a8a   :  { %v3420_v27 = vadd.f32 1.0, %v3418_v22  ;;  %v3446_v30 = vmul.f32 %v3444_v58, %v3416_v18 }
0x1a8b   :  { %v3419_v28 = vadd.f32 1.0, %v3417_v26  ;;  %v3445_v34 = vmul.f32 %v3443_v29, %v3415_v19  ;;  %v4910_v29 = vmov 0.0|0.0  }
0x1a8c   :  { %4616 = vrcp.f32 %v3420_v27  ;;  %v3449_v38 = vmul.f32 1.442695, %v3446_v30  ;;  %4401 = vmatprep.subr.bf16.mxu1 %v4910_v29  ;;  %v3619_v30 = vld [vmem:[#allocation17 + $0x18] sm:$0xff] }
0x1a8d   :  { %4618 = vrcp.f32 %v3419_v28  ;;  %v3447_v41 = vmul.f32 1.442695, %v3445_v34  ;;  %v3616_v28 = vld [vmem:[#allocation17] sm:$0xff] }
0x1a8e   :  { %4620 = vpow2.f32 %v3449_v38 }
0x1a8f   :  { %4622 = vpow2.f32 %v3447_v41  ;;  %v3833_v41 = vld [vmem:[%s5611_s18 + $0x1] ss:$0 sm:$0xff]  ;;  %s4912_s18 = smov [#allocation19]  }
0x1a90   :  { %s3708_s25 = sshll.u32 %s4912_s18, 4  ;;  %s3709_s25 = int_to_ptr.vmem [resolvable:$true] %s3708_s25 }
0x1a91   :  { %s4848_s22 = scalar_lea.vmem %s3709_s25, 32  ;;  %p4853_p11 = scmp.lt.s32.totalorder %s3709_s25, %s3709_s25 }
0x1a92   :  { %p4849_p10 = scmp.ne.s32.totalorder %s3709_s25, %s4848_s22  ;;  %p4854_p12 = scmp.lt.s32.totalorder %s4848_s22, %s4848_s22 }
0x1a94   :  { %p4855_p13 = por %p4854_p12, %p4853_p11 }
0x1a96   :  { %v4617_v60 = vpop.eup %4616  ;;  %p4856_p0 = pnand %p4855_p13, %p4849_p10 }
0x1a97   :  { %v4619_v31 = vpop.eup %4618  ;;  %v3426_v33 = vmul.f32 1.0614054, %v4617_v60 }
0x1a98   :  { %v3425_v32 = vmul.f32 1.0614054, %v4619_v31  ;;  %v4621_v52 = vpop.eup %4620 }
0x1a99   :  { %v3428_v37 = vadd.f32 -1.4531521, %v3426_v33  ;;  %v4623_v55 = vpop.eup %4622 }
0x1a9a   :  { %v3427_v39 = vadd.f32 -1.4531521, %v3425_v32 }
0x1a9b   :  { %v3430_v40 = vmul.f32 %v4617_v60, %v3428_v37 }
0x1a9c   :  { %v3429_v17 = vmul.f32 %v4619_v31, %v3427_v39 }
0x1a9d   :  { %v3432_v15 = vadd.f32 1.4214138, %v3430_v40 }
0x1a9e   :  { %v3431_v1 = vadd.f32 1.4214138, %v3429_v17 }
0x1a9f   :  { %v3434_v48 = vmul.f32 %v4617_v60, %v3432_v15  ;;  %v3834_v15 = vld [vmem:[%s5643_s21 + $0x1] ss:$0 sm:$0xff] }
0x1aa0   :  { %v3433_v42 = vmul.f32 %v4619_v31, %v3431_v1 }
0x1aa1   :  { %v3436_v43 = vadd.f32 -0.28449672, %v3434_v48 }
0x1aa2   :  { %v3435_v44 = vadd.f32 -0.28449672, %v3433_v42 }
0x1aa3   :  { %v3438_v45 = vmul.f32 %v4617_v60, %v3436_v43 }
0x1aa4   :  { %v3437_v46 = vmul.f32 %v4619_v31, %v3435_v44 }
0x1aa5   :  { %v3440_v47 = vadd.f32 0.2548296, %v3438_v45 }
0x1aa6   :  { %v3439_v49 = vadd.f32 0.2548296, %v3437_v46 }
0x1aa7   :  { %v3442_v51 = vmul.f32 %v4617_v60, %v3440_v47  ;;  %v3618_v60 = vld [vmem:[#allocation17 + $0x10] sm:$0xff] }
0x1aa8   :  { %v3441_v54 = vmul.f32 %v4619_v31, %v3439_v49  ;;  %v4405_v31 = vpack.c.bf16 %v3619_v30, %v3618_v60  ;;  %v3835_v47 = vld [vmem:[%s5644_s4] ss:$0 sm:$0xff] }
0x1aa9   :  { %v3452_v56 = vmul.f32 %v4621_v52, %v3442_v51 }
0x1aaa   :  { %v3451_v57 = vmul.f32 %v4623_v55, %v3441_v54 }
0x1aab   :  { %v3454_v59 = vsub.f32 1.0, %v3452_v56 }
0x1aac   :  { %v3453_v35 = vsub.f32 1.0, %v3451_v57 }
0x1aad   :  { %v3458_v61 = vsub.f32 0.0, %v3454_v59 }
0x1aae   :  { %v3457_v36 = vsub.f32 0.0, %v3453_v35 }
0x1aaf   :  { %v3460_v24 = vsel %vm3456_vm1, %v3458_v61, %v3454_v59 }
0x1ab0   :  { %v3462_v62 = vadd.f32 1.0, %v3460_v24  ;;  %v3459_v63 = vsel %vm3455_vm2, %v3457_v36, %v3453_v35 }
0x1ab1   :  { %v3461_v3 = vadd.f32 1.0, %v3459_v63 }
0x1ab2   :  { %v3464_v4 = vmul.f32 %v3462_v62, %v3412_v21 }
0x1ab3   :  { %v3463_v20 = vmul.f32 %v3461_v3, %v3411_v0 }
0x1ab5   :  { %4231 = vmatprep.mubr.msk.f32.mxu0 %vm1890_vm0, %v3463_v20 }
0x1ab6   :  { %4232 = vmatmul.mubr.msk.f32.vlgmr.msra.gmra.mrb[22].mxu0 %vm1890_vm0, %v3464_v4 }
0x1b89   :  { %v4233_v6 = vpop.f32.mrb[22].mxu0 }
0x1b8a   :  { %v3560_v7 = vadd.f32 %v4233_v6, %v3828_v5  ;;  %v3554_v8 = vpop.f32.mrb[23].mxu0 }
0x1b8b   :  { %v3555_v9 = vadd.f32 %v3828_v5, %v3554_v8 }
0x1b8c   :  { %v3564_v25 = vadd.f32 %v3560_v7, %v5552_v53 }
0x1b8d   :  { %v3563_v10 = vadd.f32 %v3555_v9, %v5548_v50  ;;  %v3617_v50 = vld [vmem:[#allocation17 + $0x8] sm:$0xff] }
0x1b8e   :  { %v3572_v11 = vsel %vm359_vm4, %v3564_v25, 0.0  ;;  %v4402_v58 = vpack.c.bf16 %v3617_v50, %v3616_v28 }
0x1b8f   :  { %3573 = vadd.xlane.f32.xlu0 %v3572_v11  ;;  %v3569_v12 = vsel %vm359_vm4, %v3563_v10, 0.0 }
0x1b90   :  { %4403 = vmatpush3.bf16.msra.mxu1 %v4402_v58 }
0x1b91   :  { %4404 = vmatprep.subr.bf16.mxu1 %v4910_v29 }
0x1b93   :  { %3570 = vadd.xlane.f32.xlu0 %v3569_v12 }
0x1b94   :  { %4406 = vmatpush3.bf16.msra.mxu1 %v4405_v31 }
0x1c1c   :  { %v3574_v13 = vpop.xlane.xlu0 %3573 }
0x1c1d   :  { %v3576_v14 = vmul.f32 0.03125, %v3574_v13 }
0x1c1f   :  { %v3578_v16 = vsub.f32 %v3564_v25, %v3576_v14 }
0x1c20   :  { %v3571_v2 = vpop.xlane.xlu0 %3570 }
0x1c21   :  { %v3575_v18 = vmul.f32 0.03125, %v3571_v2  ;;  %v3580_v19 = vmul.f32 %v3578_v16, %v3578_v16 }
0x1c23   :  { %v3577_v22 = vsub.f32 %v3563_v10, %v3575_v18  ;;  %v3584_v26 = vsel %vm359_vm4, %v3580_v19, 0.0 }
0x1c24   :  { %3585 = vadd.xlane.f32.xlu0 %v3584_v26 }
0x1c25   :  { %v3579_v27 = vmul.f32 %v3577_v22, %v3577_v22 }
0x1c27   :  { %v3581_v53 = vsel %vm359_vm4, %v3579_v27, 0.0 }
0x1c28   :  { %3582 = vadd.xlane.f32.xlu1 %v3581_v53 }
0x1cb1   :  { %v3586_v33 = vpop.xlane.xlu0 %3585 }
0x1cb2   :  { %v3588_v34 = vmul.f32 0.03125, %v3586_v33 }
0x1cb4   :  { %v3590_v32 = vadd.f32 1e-12, %v3588_v34 }
0x1cb5   :  { %v3583_v37 = vpop.xlane.xlu1 %3582 }
0x1cb6   :  { %4624 = vrsqrt.f32 %v3590_v32  ;;  %v3587_v38 = vmul.f32 0.03125, %v3583_v37 }
0x1cb8   :  { %v3589_v39 = vadd.f32 1e-12, %v3587_v38 }
0x1cba   :  { %4626 = vrsqrt.f32 %v3589_v39 }
0x1cc0   :  { %v4625_v40 = vpop.eup %4624 }
0x1cc1   :  { %v3594_v17 = vmul.f32 %v4625_v40, %v3578_v16 }
0x1cc3   :  { %v3602_v23 = vmul.f32 %v3833_v41, %v3594_v17 }
0x1cc4   :  { %v4627_v1 = vpop.eup %4626 }
0x1cc5   :  { %v3593_v48 = vmul.f32 %v4627_v1, %v3577_v22  ;;  %v3610_v42 = vadd.f32 %v3834_v15, %v3602_v23 }
0x1cc7   :  { %v3601_v43 = vmul.f32 %v3833_v41, %v3593_v48  ;;  %v3612_v45 = vrot.slane %v3610_v42, 7 }
0x1cc9   :  { %v3609_v44 = vadd.f32 %v3834_v15, %v3601_v43 }
0x1ccb   :  { %v3615_v46 = vsel %vm3614_vm5, %v3609_v44, %v3612_v45 }
0x1ccc   :  { %4243 = vmatmul.mubr.msk.f32.vlgmr.msra.gmra.mrb[26].mxu1 %vm359_vm4, %v3615_v46 }
0x1d9f   :  { %v3696_v49 = vpop.f32.mrb[26].mxu1 }
0x1da0   :  { %v3697_v51 = vadd.f32 %v3835_v47, %v3696_v49  ;;  %v4244_v52 = vpop.f32.mrb[27].mxu1 }
0x1da2   :  { %3701 = vst.msk [vmem:[#allocation19] sm:$0x3] %vm3700_vm6, %v3697_v51 }
0x1da3   :  { %4859 = shalt.err (!%p4856_p0)
}
0x1da4   :  { %s5645_s29 = sld [smem:[#allocation36_spill]] }
0x1daa   :  { %s4860_s9 = scalar_lea.hbm %s5645_s29, 32 }
0x1dab   :  { %p4861_p1 = scmp.ne.s32.totalorder %s5645_s29, %s4860_s9  ;;  %p4864_p2 = scmp.lt.u32.totalorder %s4860_s9, %s5645_s29 }
0x1dad   :  { %p4866_p3 = pnand %p4864_p2, %p4861_p1 }
0x1daf   :  { %4869 = shalt.err (!%p4866_p3)
}
0x1db0   :  { %3711 = dma.vmem_to_hbm [thread:$0]  %s3709_s25, 32, %s5645_s29, [#allocation4]  }
0x1db1   :  { %4882 = dma.done.wait [#allocation4], 32  }
0x1db2   :  { %4883 = vsyncadd [#allocation4], 4294967264 }
0x1db3   :  { %3715 = vsyncpa [#allocation3], 1 }
0x1db4   :  { %3716 = vsyncpa [#allocation6], 1 }
0x1db5   :  { %3717 = vsyncpa [#allocation9], 1 }
0x1db6   :  { %3718 = vsyncpa [#allocation12], 1 }
0x1db7   :  { %3719 = vsyncpa [#allocation15], 1 }
0x1db8   :  { %3720 = vsyncpa [#allocation18], 1 }
0x1db9   :  { %3721 = vsyncpa [#allocation4], 1 }

</bundles_post_ra>
